<compile_context>
chip_gen: v5e
topology: v5e:2x2
jax: 0.10.0
libtpu: 0.0.40
codegen_flags: <defaults>
</compile_context>

<pallas_src>
import functools

import jax
import jax.numpy as jnp
from jax.experimental import pallas as pl
from jax.experimental.pallas import tpu as pltpu

EPS = 1e-5
LANE = 128                        # TPU lane width; channel dims are padded to this.
VMEM_LIMIT = 48 * 1024 * 1024     # explicit scoped-VMEM limit (< v7x 64 MiB physical).


def _round_up(x, m):
    return (x + m - 1) // m * m


# ----------------------------------------------------------------------------
# Kernel 1: [optional input BN-affine+ReLU] -> 3x3 "same" conv (bias-free,
#           bf16 MXU inputs, f32 accumulation) -> per-image BN partial stats.
#   x_ref     : (1, H, W, Cin)   bf16 input tile (raw, or previous conv output)
#   w_ref     : (9, Cin, Cout)   bf16 weights, tap-major (dy*3+dx)
#   sc_ref    : (1, Cin) f32     input BN scale (ignored for the first layer)
#   sh_ref    : (1, Cin) f32     input BN shift (ignored for the first layer)
#   y_ref     : (1, H, W, Cout)  bf16 conv output
#   stats_ref : (1, 2, Cout) f32 row 0 = sum_{h,w} y, row 1 = sum_{h,w} y*y
#   xp_ref    : (H+2, W+2, Cin)  f32 VMEM halo scratch
# ----------------------------------------------------------------------------
def _conv3x3_bn_kernel(apply_in_bnrelu,
                       x_ref, w_ref, sc_ref, sh_ref,
                       y_ref, stats_ref,
                       xp_ref):
    H, W, Cin = x_ref.shape[1], x_ref.shape[2], x_ref.shape[3]
    Cout = y_ref.shape[3]

    x = x_ref[0].astype(jnp.float32)                           # (H, W, Cin)
    if apply_in_bnrelu:
        # Previous layer's BatchNorm affine + ReLU, fused onto the freshly
        # DMA'd input tile (no separate elementwise HBM pass).
        scale = sc_ref[...].reshape(1, 1, Cin)
        shift = sh_ref[...].reshape(1, 1, Cin)
        x = jnp.maximum(x * scale + shift, 0.0)

    # Zero only the 1-pixel halo border; the interior is fully overwritten every
    # grid step.  Done every step (not @pl.when(program_id==0)) so it remains
    # correct when the "parallel" batch axis is split across TensorCores.
    xp_ref[pl.ds(0, 1), :, :] = jnp.zeros((1, W + 2, Cin), jnp.float32)
    xp_ref[pl.ds(H + 1, 1), :, :] = jnp.zeros((1, W + 2, Cin), jnp.float32)
    xp_ref[:, pl.ds(0, 1), :] = jnp.zeros((H + 2, 1, Cin), jnp.float32)
    xp_ref[:, pl.ds(W + 1, 1), :] = jnp.zeros((H + 2, 1, Cin), jnp.float32)
    xp_ref[pl.ds(1, H), pl.ds(1, W), :] = x
    xp = xp_ref[...]                                           # (H+2, W+2, Cin)

    # 9 accumulating matmuls with K = Cin (lane-padded): no im2col slab, no
    # lane-axis concatenate.  bf16 MXU inputs, f32 accumulation.
    acc = jnp.zeros((H * W, Cout), jnp.float32)
    for t in range(9):
        dy, dx = divmod(t, 3)
        tap = xp[dy:dy + H, dx:dx + W, :].reshape(H * W, Cin).astype(jnp.bfloat16)
        acc = acc + jnp.dot(tap, w_ref[t], preferred_element_type=jnp.float32)

    y_ref[0] = acc.reshape(H, W, Cout).astype(y_ref.dtype)     # bf16 inter-layer store

    # Per-image per-channel BN partial stats, packed into one (2, Cout) block.
    s = jnp.sum(acc, axis=0, keepdims=True)
    q = jnp.sum(acc * acc, axis=0, keepdims=True)
    stats_ref[0] = jnp.concatenate([s, q], axis=0)


def conv3x3_bn_stats(x_nhwc, w9, in_scale=None, in_shift=None):
    """3x3 'same' conv (bias-free) with optional fused input BN-affine+ReLU.

    x_nhwc : (N, H, W, Cin_pad) bf16    w9 : (9, Cin_pad, Cout_pad) bf16
    Returns (y, stats) with
      y     : (N, H, W, Cout_pad) bf16
      stats : (N, 2, Cout_pad) f32   [sum, sum-of-squares] over (H, W)
    """
    N, H, W, Cin = x_nhwc.shape
    Cout = w9.shape[-1]
    apply_in = in_scale is not None
    if not apply_in:
        in_scale = jnp.ones((Cin,), jnp.float32)
        in_shift = jnp.zeros((Cin,), jnp.float32)
    kernel = functools.partial(_conv3x3_bn_kernel, apply_in)

    # TODO(synk): row-tile H (grid=(N, H//TH), (TH+2)-row halo, per-tile partial
    # stats) once H*W*C tiles approach the v7x 64 MiB VMEM budget.
    return pl.pallas_call(
        kernel,
        out_shape=(
            jax.ShapeDtypeStruct((N, H, W, Cout), jnp.bfloat16),
            jax.ShapeDtypeStruct((N, 2, Cout), jnp.float32),
        ),
        grid=(N,),
        in_specs=[
            pl.BlockSpec((1, H, W, Cin), lambda n: (n, 0, 0, 0)),
            pl.BlockSpec((9, Cin, Cout), lambda n: (0, 0, 0)),
            pl.BlockSpec((1, Cin), lambda n: (0, 0)),
            pl.BlockSpec((1, Cin), lambda n: (0, 0)),
        ],
        out_specs=(
            pl.BlockSpec((1, H, W, Cout), lambda n: (n, 0, 0, 0)),
            pl.BlockSpec((1, 2, Cout), lambda n: (n, 0, 0)),
        ),
        scratch_shapes=[pltpu.VMEM((H + 2, W + 2, Cin), jnp.float32)],
        compiler_params=pltpu.CompilerParams(
            dimension_semantics=("parallel",),
            vmem_limit_bytes=VMEM_LIMIT),
    )(x_nhwc, w9, in_scale.reshape(1, Cin), in_shift.reshape(1, Cin))


# ----------------------------------------------------------------------------
# Kernel 2: fused BN-affine + ReLU for the final layer (writes over its input).
# ----------------------------------------------------------------------------
def _bn_relu_kernel(y_ref, sc_ref, sh_ref, o_ref):
    C = o_ref.shape[3]
    scale = sc_ref[...].reshape(1, 1, C)
    shift = sh_ref[...].reshape(1, 1, C)
    o_ref[0] = jnp.maximum(y_ref[0].astype(jnp.float32) * scale + shift,
                           0.0).astype(o_ref.dtype)


def bn_relu(y, scale, shift):
    N, H, W, C = y.shape
    return pl.pallas_call(
        _bn_relu_kernel,
        out_shape=jax.ShapeDtypeStruct((N, H, W, C), jnp.bfloat16),
        grid=(N,),
        in_specs=[
            pl.BlockSpec((1, H, W, C), lambda n: (n, 0, 0, 0)),
            pl.BlockSpec((1, C), lambda n: (0, 0)),
            pl.BlockSpec((1, C), lambda n: (0, 0)),
        ],
        out_specs=pl.BlockSpec((1, H, W, C), lambda n: (n, 0, 0, 0)),
        input_output_aliases={0: 0},          # write over y2, no extra HBM alloc
        compiler_params=pltpu.CompilerParams(
            dimension_semantics=("parallel",),
            vmem_limit_bytes=VMEM_LIMIT),
    )(y, scale.reshape(1, C), shift.reshape(1, C))


# ----------------------------------------------------------------------------
# Parameter packing / BN combine (tiny (N, C)-sized work that stays in JAX)
# ----------------------------------------------------------------------------
def _pad_weights(w_hwio, cin_p, cout_p):
    kh, kw, cin, cout = w_hwio.shape
    w = jnp.pad(w_hwio, ((0, 0), (0, 0), (0, cin_p - cin), (0, cout_p - cout)))
    return w.reshape(kh * kw, cin_p, cout_p).astype(jnp.bfloat16)


def _pad_vec(v, c_p, fill):
    return jnp.pad(v, (0, c_p - v.shape[0]),
                   constant_values=fill).astype(jnp.float32)


def _bn_scale_shift(stats, gamma, beta, count):
    """Training-mode BN (biased variance) from per-image partial sums."""
    s = jnp.sum(stats[:, 0, :], axis=0)                # (C,)
    q = jnp.sum(stats[:, 1, :], axis=0)
    mean = s / count
    var = jnp.maximum(q / count - mean * mean, 0.0)
    scale = gamma / jnp.sqrt(var + EPS)
    shift = beta - mean * scale
    return scale, shift


# ----------------------------------------------------------------------------
# ConvBlock forward
# ----------------------------------------------------------------------------
def conv_block_forward(x_nchw, params):
    N, Cin, H, W = x_nchw.shape
    Cout = params["w1"].shape[-1]
    Cin_p, Cout_p = _round_up(Cin, LANE), _round_up(Cout, LANE)
    count = N * H * W

    # NCHW -> NHWC, channel-pad to the lane width, cast to bf16 (one prep pass).
    # TODO(synk): fold this transpose (and the output one) into the first/last
    # kernels once channel counts are already lane multiples.
    x = jnp.transpose(x_nchw, (0, 2, 3, 1))
    x = jnp.pad(x, ((0, 0), (0, 0), (0, 0), (0, Cin_p - Cin))).astype(jnp.bfloat16)

    w1 = _pad_weights(params["w1"], Cin_p, Cout_p)
    w2 = _pad_weights(params["w2"], Cout_p, Cout_p)
    g1 = _pad_vec(params["gamma1"], Cout_p, 1.0)
    b1 = _pad_vec(params["beta1"], Cout_p, 0.0)
    g2 = _pad_vec(params["gamma2"], Cout_p, 1.0)
    b2 = _pad_vec(params["beta2"], Cout_p, 0.0)

    # Layer 1: conv (bias dropped: cancels under training-mode BN) + BN1 stats.
    y1, st1 = conv3x3_bn_stats(x, w1)
    scale1, shift1 = _bn_scale_shift(st1, g1, b1, count)

    # Layer 2: BN1-affine+ReLU fused onto the input tile, conv2, BN2 stats.
    y2, st2 = conv3x3_bn_stats(y1, w2, scale1, shift1)
    scale2, shift2 = _bn_scale_shift(st2, g2, b2, count)

    out = bn_relu(y2, scale2, shift2)                  # (N, H, W, Cout_p) bf16
    out = out[..., :Cout].astype(jnp.float32)          # drop channel padding
    return jnp.transpose(out, (0, 3, 1, 2))            # NHWC -> NCHW


# ----------------------------------------------------------------------------
# Pure-JAX references for validation
#   conv_dtype=f32, use_bias=True  : exact PyTorch training-mode semantics
#   conv_dtype=bf16, use_bias=False: mirrors the kernel's bf16 rounding points
# ----------------------------------------------------------------------------
def reference_forward(x_nchw, params, conv_dtype=jnp.float32, use_bias=True):
    bf16_path = conv_dtype == jnp.bfloat16
    x = jnp.transpose(x_nchw, (0, 2, 3, 1)).astype(jnp.float32)
    for i in (1, 2):
        w = params[f"w{i}"].astype(conv_dtype)
        y = jax.lax.conv_general_dilated(
            x.astype(conv_dtype), w, window_strides=(1, 1), padding="SAME",
            dimension_numbers=("NHWC", "HWIO", "NHWC"),
            preferred_element_type=jnp.float32)
        if use_bias:
            y = y + params[f"b{i}"]
        if bf16_path:
            y = y.astype(jnp.bfloat16).astype(jnp.float32)   # inter-layer store
        mean = jnp.mean(y, axis=(0, 1, 2))
        var = jnp.mean(jnp.square(y - mean), axis=(0, 1, 2))
        x = jnp.maximum((y - mean) / jnp.sqrt(var + EPS) * params[f"gamma{i}"]
                        + params[f"beta{i}"], 0.0)
    if bf16_path:
        x = x.astype(jnp.bfloat16).astype(jnp.float32)       # final bf16 store
    return jnp.transpose(x, (0, 3, 1, 2))


def init_params(key, in_channels, out_channels):
    ks = jax.random.split(key, 6)
    return {
        "w1": 0.1 * jax.random.normal(ks[0], (3, 3, in_channels, out_channels), jnp.float32),
        "b1": 0.05 * jax.random.normal(ks[1], (out_channels,), jnp.float32),
        "gamma1": 1.0 + 0.1 * jax.random.normal(ks[2], (out_channels,), jnp.float32),
        "beta1": 0.05 * jax.random.normal(ks[3], (out_channels,), jnp.float32),
        "w2": 0.1 * jax.random.normal(ks[4], (3, 3, out_channels, out_channels), jnp.float32),
        "b2": 0.05 * jax.random.normal(ks[5], (out_channels,), jnp.float32),
        "gamma2": jnp.ones((out_channels,), jnp.float32),
        "beta2": jnp.zeros((out_channels,), jnp.float32),
    }


if __name__ == "__main__":
    key = jax.random.PRNGKey(0)
    k_x, k_p = jax.random.split(key)

    N, Cin, Cout, H, W = 2, 4, 8, 16, 16
    x = jax.random.normal(k_x, (N, Cin, H, W), jnp.float32)   # PyTorch NCHW input
    params = init_params(k_p, Cin, Cout)

    out = jax.block_until_ready(jax.jit(conv_block_forward)(x, params))
    assert out.shape == (N, Cout, H, W), out.shape

    # Tight check against a reference that mirrors the kernel's bf16 rounding.
    ref_m = reference_forward(x, params, conv_dtype=jnp.bfloat16, use_bias=False)
    err_m = float(jnp.max(jnp.abs(out - ref_m)))
    assert jnp.allclose(out, ref_m, atol=3e-2, rtol=3e-2), f"bf16-matched err={err_m}"

    # Loose sanity check against exact f32 PyTorch semantics (with conv bias).
    ref_e = reference_forward(x, params)
    err_e = float(jnp.max(jnp.abs(out - ref_e)))
    assert jnp.allclose(out, ref_e, atol=2.5e-1, rtol=1e-1), f"f32-exact err={err_e}"

    print("KERNEL_OK")
</pallas_src>

<mosaic_0001>
module attributes {stable_mosaic.version = 11 : i64} {
  func.func @_conv3x3_bn_kernel(%arg0: i32, %arg1: memref<1x16x16x128xbf16, #tpu.memory_space<vmem>>, %arg2: memref<9x128x128xbf16, #tpu.memory_space<vmem>>, %arg3: memref<1x128xf32, #tpu.memory_space<vmem>>, %arg4: memref<1x128xf32, #tpu.memory_space<vmem>>, %arg5: memref<1x16x16x128xbf16, #tpu.memory_space<vmem>>, %arg6: memref<1x2x128xf32, #tpu.memory_space<vmem>>, %arg7: memref<18x18x128xf32, #tpu.memory_space<vmem>>) attributes {dimension_semantics = [#tpu.dimension_semantics<parallel>], iteration_bounds = array<i64: 2>, scalar_prefetch = 0 : i64, scratch_operands = 1 : i64, tpu.core_type = #tpu.core_type<tc>, window_params = [{transform_indices = @transform_0, window_bounds = array<i64: 1, 16, 16, 128>}, {pipeline_mode = #tpu.pipeline_mode<synchronous>, transform_indices = @transform_1, window_bounds = array<i64: 9, 128, 128>}, {pipeline_mode = #tpu.pipeline_mode<synchronous>, transform_indices = @transform_2, window_bounds = array<i64: 1, 128>}, {pipeline_mode = #tpu.pipeline_mode<synchronous>, transform_indices = @transform_3, window_bounds = array<i64: 1, 128>}, {transform_indices = @transform_4, window_bounds = array<i64: 1, 16, 16, 128>}, {transform_indices = @transform_5, window_bounds = array<i64: 1, 2, 128>}]} {
    %c0 = arith.constant 0 : index
    %c0_0 = arith.constant 0 : index
    %c0_1 = arith.constant 0 : index
    %c0_2 = arith.constant 0 : index
    %0 = vector.load %arg1[%c0, %c0_0, %c0_1, %c0_2] : memref<1x16x16x128xbf16, #tpu.memory_space<vmem>>, vector<1x16x16x128xbf16>
    %1 = vector.shape_cast %0 : vector<1x16x16x128xbf16> to vector<16x16x128xbf16>
    %2 = arith.extf %1 : vector<16x16x128xbf16> to vector<16x16x128xf32>
    %cst = arith.constant 0.000000e+00 : f32
    %3 = vector.broadcast %cst : f32 to vector<1x18x128xf32>
    %c0_3 = arith.constant 0 : index
    %c0_4 = arith.constant 0 : index
    %c0_5 = arith.constant 0 : index
    %4 = vector.load %arg7[%c0_3, %c0_4, %c0_5] : memref<18x18x128xf32, #tpu.memory_space<vmem>>, vector<1x18x128xf32>
    tpu.vector_store %arg7[%c0_3, %c0_4, %c0_5], %3 {strides = array<i32>} : memref<18x18x128xf32, #tpu.memory_space<vmem>>, vector<1x18x128xf32>,
    %cst_6 = arith.constant 0.000000e+00 : f32
    %5 = vector.broadcast %cst_6 : f32 to vector<1x18x128xf32>
    %c17 = arith.constant 17 : index
    %c0_7 = arith.constant 0 : index
    %c0_8 = arith.constant 0 : index
    %6 = vector.load %arg7[%c17, %c0_7, %c0_8] : memref<18x18x128xf32, #tpu.memory_space<vmem>>, vector<1x18x128xf32>
    tpu.vector_store %arg7[%c17, %c0_7, %c0_8], %5 {strides = array<i32>} : memref<18x18x128xf32, #tpu.memory_space<vmem>>, vector<1x18x128xf32>,
    %cst_9 = arith.constant 0.000000e+00 : f32
    %7 = vector.broadcast %cst_9 : f32 to vector<18x1x128xf32>
    %c0_10 = arith.constant 0 : index
    %c0_11 = arith.constant 0 : index
    %c0_12 = arith.constant 0 : index
    %8 = vector.load %arg7[%c0_10, %c0_11, %c0_12] : memref<18x18x128xf32, #tpu.memory_space<vmem>>, vector<18x1x128xf32>
    tpu.vector_store %arg7[%c0_10, %c0_11, %c0_12], %7 {strides = array<i32>} : memref<18x18x128xf32, #tpu.memory_space<vmem>>, vector<18x1x128xf32>,
    %cst_13 = arith.constant 0.000000e+00 : f32
    %9 = vector.broadcast %cst_13 : f32 to vector<18x1x128xf32>
    %c0_14 = arith.constant 0 : index
    %c17_15 = arith.constant 17 : index
    %c0_16 = arith.constant 0 : index
    %10 = vector.load %arg7[%c0_14, %c17_15, %c0_16] : memref<18x18x128xf32, #tpu.memory_space<vmem>>, vector<18x1x128xf32>
    tpu.vector_store %arg7[%c0_14, %c17_15, %c0_16], %9 {strides = array<i32>} : memref<18x18x128xf32, #tpu.memory_space<vmem>>, vector<18x1x128xf32>,
    %c1 = arith.constant 1 : index
    %c1_17 = arith.constant 1 : index
    %c0_18 = arith.constant 0 : index
    %11 = vector.load %arg7[%c1, %c1_17, %c0_18] : memref<18x18x128xf32, #tpu.memory_space<vmem>>, vector<16x16x128xf32>
    tpu.vector_store %arg7[%c1, %c1_17, %c0_18], %2 {strides = array<i32>} : memref<18x18x128xf32, #tpu.memory_space<vmem>>, vector<16x16x128xf32>,
    %c0_19 = arith.constant 0 : index
    %c0_20 = arith.constant 0 : index
    %c0_21 = arith.constant 0 : index
    %12 = vector.load %arg7[%c0_19, %c0_20, %c0_21] : memref<18x18x128xf32, #tpu.memory_space<vmem>>, vector<18x18x128xf32>
    %cst_22 = arith.constant 0.000000e+00 : f32
    %13 = vector.broadcast %cst_22 : f32 to vector<256x128xf32>
    %14 = vector.extract_strided_slice %12 {offsets = [0, 0, 0], sizes = [16, 16, 128], strides = [1, 1, 1]} : vector<18x18x128xf32> to vector<16x16x128xf32>
    %15 = vector.shape_cast %14 : vector<16x16x128xf32> to vector<256x128xf32>
    %16 = arith.truncf %15 : vector<256x128xf32> to vector<256x128xbf16>
    %c0_23 = arith.constant 0 : index
    %c0_24 = arith.constant 0 : index
    %c0_25 = arith.constant 0 : index
    %17 = vector.load %arg2[%c0_23, %c0_24, %c0_25] : memref<9x128x128xbf16, #tpu.memory_space<vmem>>, vector<1x128x128xbf16>
    %18 = vector.shape_cast %17 : vector<1x128x128xbf16> to vector<128x128xbf16>
    %cst_26 = arith.constant dense<0.000000e+00> : vector<256x128xf32>
    %19 = tpu.matmul %16, %18, %cst_26 {dimension_numbers = #tpu.dot_dimension_numbers<[1], [0], [0], [1], [0, 0, 1, 1], [], []>} : vector<256x128xbf16>, vector<128x128xbf16>, vector<256x128xf32> -> vector<256x128xf32>
    %20 = arith.addf %13, %19 : vector<256x128xf32>
    %21 = vector.extract_strided_slice %12 {offsets = [0, 1, 0], sizes = [16, 16, 128], strides = [1, 1, 1]} : vector<18x18x128xf32> to vector<16x16x128xf32>
    %22 = vector.shape_cast %21 : vector<16x16x128xf32> to vector<256x128xf32>
    %23 = arith.truncf %22 : vector<256x128xf32> to vector<256x128xbf16>
    %c1_27 = arith.constant 1 : index
    %c0_28 = arith.constant 0 : index
    %c0_29 = arith.constant 0 : index
    %24 = vector.load %arg2[%c1_27, %c0_28, %c0_29] : memref<9x128x128xbf16, #tpu.memory_space<vmem>>, vector<1x128x128xbf16>
    %25 = vector.shape_cast %24 : vector<1x128x128xbf16> to vector<128x128xbf16>
    %cst_30 = arith.constant dense<0.000000e+00> : vector<256x128xf32>
    %26 = tpu.matmul %23, %25, %cst_30 {dimension_numbers = #tpu.dot_dimension_numbers<[1], [0], [0], [1], [0, 0, 1, 1], [], []>} : vector<256x128xbf16>, vector<128x128xbf16>, vector<256x128xf32> -> vector<256x128xf32>
    %27 = arith.addf %20, %26 : vector<256x128xf32>
    %28 = vector.extract_strided_slice %12 {offsets = [0, 2, 0], sizes = [16, 16, 128], strides = [1, 1, 1]} : vector<18x18x128xf32> to vector<16x16x128xf32>
    %29 = vector.shape_cast %28 : vector<16x16x128xf32> to vector<256x128xf32>
    %30 = arith.truncf %29 : vector<256x128xf32> to vector<256x128xbf16>
    %c2 = arith.constant 2 : index
    %c0_31 = arith.constant 0 : index
    %c0_32 = arith.constant 0 : index
    %31 = vector.load %arg2[%c2, %c0_31, %c0_32] : memref<9x128x128xbf16, #tpu.memory_space<vmem>>, vector<1x128x128xbf16>
    %32 = vector.shape_cast %31 : vector<1x128x128xbf16> to vector<128x128xbf16>
    %cst_33 = arith.constant dense<0.000000e+00> : vector<256x128xf32>
    %33 = tpu.matmul %30, %32, %cst_33 {dimension_numbers = #tpu.dot_dimension_numbers<[1], [0], [0], [1], [0, 0, 1, 1], [], []>} : vector<256x128xbf16>, vector<128x128xbf16>, vector<256x128xf32> -> vector<256x128xf32>
    %34 = arith.addf %27, %33 : vector<256x128xf32>
    %35 = vector.extract_strided_slice %12 {offsets = [1, 0, 0], sizes = [16, 16, 128], strides = [1, 1, 1]} : vector<18x18x128xf32> to vector<16x16x128xf32>
    %36 = vector.shape_cast %35 : vector<16x16x128xf32> to vector<256x128xf32>
    %37 = arith.truncf %36 : vector<256x128xf32> to vector<256x128xbf16>
    %c3 = arith.constant 3 : index
    %c0_34 = arith.constant 0 : index
    %c0_35 = arith.constant 0 : index
    %38 = vector.load %arg2[%c3, %c0_34, %c0_35] : memref<9x128x128xbf16, #tpu.memory_space<vmem>>, vector<1x128x128xbf16>
    %39 = vector.shape_cast %38 : vector<1x128x128xbf16> to vector<128x128xbf16>
    %cst_36 = arith.constant dense<0.000000e+00> : vector<256x128xf32>
    %40 = tpu.matmul %37, %39, %cst_36 {dimension_numbers = #tpu.dot_dimension_numbers<[1], [0], [0], [1], [0, 0, 1, 1], [], []>} : vector<256x128xbf16>, vector<128x128xbf16>, vector<256x128xf32> -> vector<256x128xf32>
    %41 = arith.addf %34, %40 : vector<256x128xf32>
    %42 = vector.extract_strided_slice %12 {offsets = [1, 1, 0], sizes = [16, 16, 128], strides = [1, 1, 1]} : vector<18x18x128xf32> to vector<16x16x128xf32>
    %43 = vector.shape_cast %42 : vector<16x16x128xf32> to vector<256x128xf32>
    %44 = arith.truncf %43 : vector<256x128xf32> to vector<256x128xbf16>
    %c4 = arith.constant 4 : index
    %c0_37 = arith.constant 0 : index
    %c0_38 = arith.constant 0 : index
    %45 = vector.load %arg2[%c4, %c0_37, %c0_38] : memref<9x128x128xbf16, #tpu.memory_space<vmem>>, vector<1x128x128xbf16>
    %46 = vector.shape_cast %45 : vector<1x128x128xbf16> to vector<128x128xbf16>
    %cst_39 = arith.constant dense<0.000000e+00> : vector<256x128xf32>
    %47 = tpu.matmul %44, %46, %cst_39 {dimension_numbers = #tpu.dot_dimension_numbers<[1], [0], [0], [1], [0, 0, 1, 1], [], []>} : vector<256x128xbf16>, vector<128x128xbf16>, vector<256x128xf32> -> vector<256x128xf32>
    %48 = arith.addf %41, %47 : vector<256x128xf32>
    %49 = vector.extract_strided_slice %12 {offsets = [1, 2, 0], sizes = [16, 16, 128], strides = [1, 1, 1]} : vector<18x18x128xf32> to vector<16x16x128xf32>
    %50 = vector.shape_cast %49 : vector<16x16x128xf32> to vector<256x128xf32>
    %51 = arith.truncf %50 : vector<256x128xf32> to vector<256x128xbf16>
    %c5 = arith.constant 5 : index
    %c0_40 = arith.constant 0 : index
    %c0_41 = arith.constant 0 : index
    %52 = vector.load %arg2[%c5, %c0_40, %c0_41] : memref<9x128x128xbf16, #tpu.memory_space<vmem>>, vector<1x128x128xbf16>
    %53 = vector.shape_cast %52 : vector<1x128x128xbf16> to vector<128x128xbf16>
    %cst_42 = arith.constant dense<0.000000e+00> : vector<256x128xf32>
    %54 = tpu.matmul %51, %53, %cst_42 {dimension_numbers = #tpu.dot_dimension_numbers<[1], [0], [0], [1], [0, 0, 1, 1], [], []>} : vector<256x128xbf16>, vector<128x128xbf16>, vector<256x128xf32> -> vector<256x128xf32>
    %55 = arith.addf %48, %54 : vector<256x128xf32>
    %56 = vector.extract_strided_slice %12 {offsets = [2, 0, 0], sizes = [16, 16, 128], strides = [1, 1, 1]} : vector<18x18x128xf32> to vector<16x16x128xf32>
    %57 = vector.shape_cast %56 : vector<16x16x128xf32> to vector<256x128xf32>
    %58 = arith.truncf %57 : vector<256x128xf32> to vector<256x128xbf16>
    %c6 = arith.constant 6 : index
    %c0_43 = arith.constant 0 : index
    %c0_44 = arith.constant 0 : index
    %59 = vector.load %arg2[%c6, %c0_43, %c0_44] : memref<9x128x128xbf16, #tpu.memory_space<vmem>>, vector<1x128x128xbf16>
    %60 = vector.shape_cast %59 : vector<1x128x128xbf16> to vector<128x128xbf16>
    %cst_45 = arith.constant dense<0.000000e+00> : vector<256x128xf32>
    %61 = tpu.matmul %58, %60, %cst_45 {dimension_numbers = #tpu.dot_dimension_numbers<[1], [0], [0], [1], [0, 0, 1, 1], [], []>} : vector<256x128xbf16>, vector<128x128xbf16>, vector<256x128xf32> -> vector<256x128xf32>
    %62 = arith.addf %55, %61 : vector<256x128xf32>
    %63 = vector.extract_strided_slice %12 {offsets = [2, 1, 0], sizes = [16, 16, 128], strides = [1, 1, 1]} : vector<18x18x128xf32> to vector<16x16x128xf32>
    %64 = vector.shape_cast %63 : vector<16x16x128xf32> to vector<256x128xf32>
    %65 = arith.truncf %64 : vector<256x128xf32> to vector<256x128xbf16>
    %c7 = arith.constant 7 : index
    %c0_46 = arith.constant 0 : index
    %c0_47 = arith.constant 0 : index
    %66 = vector.load %arg2[%c7, %c0_46, %c0_47] : memref<9x128x128xbf16, #tpu.memory_space<vmem>>, vector<1x128x128xbf16>
    %67 = vector.shape_cast %66 : vector<1x128x128xbf16> to vector<128x128xbf16>
    %cst_48 = arith.constant dense<0.000000e+00> : vector<256x128xf32>
    %68 = tpu.matmul %65, %67, %cst_48 {dimension_numbers = #tpu.dot_dimension_numbers<[1], [0], [0], [1], [0, 0, 1, 1], [], []>} : vector<256x128xbf16>, vector<128x128xbf16>, vector<256x128xf32> -> vector<256x128xf32>
    %69 = arith.addf %62, %68 : vector<256x128xf32>
    %70 = vector.extract_strided_slice %12 {offsets = [2, 2, 0], sizes = [16, 16, 128], strides = [1, 1, 1]} : vector<18x18x128xf32> to vector<16x16x128xf32>
    %71 = vector.shape_cast %70 : vector<16x16x128xf32> to vector<256x128xf32>
    %72 = arith.truncf %71 : vector<256x128xf32> to vector<256x128xbf16>
    %c8 = arith.constant 8 : index
    %c0_49 = arith.constant 0 : index
    %c0_50 = arith.constant 0 : index
    %73 = vector.load %arg2[%c8, %c0_49, %c0_50] : memref<9x128x128xbf16, #tpu.memory_space<vmem>>, vector<1x128x128xbf16>
    %74 = vector.shape_cast %73 : vector<1x128x128xbf16> to vector<128x128xbf16>
    %cst_51 = arith.constant dense<0.000000e+00> : vector<256x128xf32>
    %75 = tpu.matmul %72, %74, %cst_51 {dimension_numbers = #tpu.dot_dimension_numbers<[1], [0], [0], [1], [0, 0, 1, 1], [], []>} : vector<256x128xbf16>, vector<128x128xbf16>, vector<256x128xf32> -> vector<256x128xf32>
    %76 = arith.addf %69, %75 : vector<256x128xf32>
    %77 = vector.shape_cast %76 : vector<256x128xf32> to vector<16x16x128xf32>
    %78 = arith.truncf %77 : vector<16x16x128xf32> to vector<16x16x128xbf16>
    %c0_52 = arith.constant 0 : index
    %c0_53 = arith.constant 0 : index
    %c0_54 = arith.constant 0 : index
    %c0_55 = arith.constant 0 : index
    %79 = vector.load %arg5[%c0_52, %c0_53, %c0_54, %c0_55] : memref<1x16x16x128xbf16, #tpu.memory_space<vmem>>, vector<1x16x16x128xbf16>
    %80 = vector.shape_cast %79 : vector<1x16x16x128xbf16> to vector<16x16x128xbf16>
    %81 = vector.shape_cast %78 : vector<16x16x128xbf16> to vector<1x16x16x128xbf16>
    tpu.vector_store %arg5[%c0_52, %c0_53, %c0_54, %c0_55], %81 {strides = array<i32>} : memref<1x16x16x128xbf16, #tpu.memory_space<vmem>>, vector<1x16x16x128xbf16>,
    %cst_56 = arith.constant dense<0.000000e+00> : vector<128xf32>
    %82 = vector.multi_reduction <add>, %76, %cst_56 [0] : vector<256x128xf32> to vector<128xf32>
    %83 = vector.shape_cast %82 : vector<128xf32> to vector<1x128xf32>
    %84 = arith.mulf %76, %76 : vector<256x128xf32>
    %cst_57 = arith.constant dense<0.000000e+00> : vector<128xf32>
    %85 = vector.multi_reduction <add>, %84, %cst_57 [0] : vector<256x128xf32> to vector<128xf32>
    %86 = vector.shape_cast %85 : vector<128xf32> to vector<1x128xf32>
    %87 = tpu.concatenate %83, %86 in 0 : vector<1x128xf32>, vector<1x128xf32> -> vector<2x128xf32>
    %c0_58 = arith.constant 0 : index
    %c0_59 = arith.constant 0 : index
    %c0_60 = arith.constant 0 : index
    %88 = vector.load %arg6[%c0_58, %c0_59, %c0_60] : memref<1x2x128xf32, #tpu.memory_space<vmem>>, vector<1x2x128xf32>
    %89 = vector.shape_cast %88 : vector<1x2x128xf32> to vector<2x128xf32>
    %90 = vector.shape_cast %87 : vector<2x128xf32> to vector<1x2x128xf32>
    tpu.vector_store %arg6[%c0_58, %c0_59, %c0_60], %90 {strides = array<i32>} : memref<1x2x128xf32, #tpu.memory_space<vmem>>, vector<1x2x128xf32>,
    return
  }
  func.func @transform_0(%arg0: i32) -> (i32, i32, i32, i32) {
    %c0_i32 = arith.constant 0 : i32
    %c0_i32_0 = arith.constant 0 : i32
    %c0_i32_1 = arith.constant 0 : i32
    %c0_i32_2 = arith.constant 0 : i32
    return %arg0, %c0_i32, %c0_i32_0, %c0_i32_1 : i32, i32, i32, i32
  }
  func.func @transform_1(%arg0: i32) -> (i32, i32, i32) {
    %c0_i32 = arith.constant 0 : i32
    %c0_i32_0 = arith.constant 0 : i32
    %c0_i32_1 = arith.constant 0 : i32
    %c0_i32_2 = arith.constant 0 : i32
    return %c0_i32, %c0_i32_0, %c0_i32_1 : i32, i32, i32
  }
  func.func @transform_2(%arg0: i32) -> (i32, i32) {
    %c0_i32 = arith.constant 0 : i32
    %c0_i32_0 = arith.constant 0 : i32
    %c0_i32_1 = arith.constant 0 : i32
    return %c0_i32, %c0_i32_0 : i32, i32
  }
  func.func @transform_3(%arg0: i32) -> (i32, i32) {
    %c0_i32 = arith.constant 0 : i32
    %c0_i32_0 = arith.constant 0 : i32
    %c0_i32_1 = arith.constant 0 : i32
    return %c0_i32, %c0_i32_0 : i32, i32
  }
  func.func @transform_4(%arg0: i32) -> (i32, i32, i32, i32) {
    %c0_i32 = arith.constant 0 : i32
    %c0_i32_0 = arith.constant 0 : i32
    %c0_i32_1 = arith.constant 0 : i32
    %c0_i32_2 = arith.constant 0 : i32
    return %arg0, %c0_i32, %c0_i32_0, %c0_i32_1 : i32, i32, i32, i32
  }
  func.func @transform_5(%arg0: i32) -> (i32, i32, i32) {
    %c0_i32 = arith.constant 0 : i32
    %c0_i32_0 = arith.constant 0 : i32
    %c0_i32_1 = arith.constant 0 : i32
    return %arg0, %c0_i32, %c0_i32_0 : i32, i32, i32
  }
}

module attributes {stable_mosaic.version = 11 : i64} {
  func.func @_bn_relu_kernel(%arg0: i32, %arg1: memref<1x16x16x128xbf16, #tpu.memory_space<vmem>>, %arg2: memref<1x128xf32, #tpu.memory_space<vmem>>, %arg3: memref<1x128xf32, #tpu.memory_space<vmem>>, %arg4: memref<1x16x16x128xbf16, #tpu.memory_space<vmem>>) attributes {dimension_semantics = [#tpu.dimension_semantics<parallel>], iteration_bounds = array<i64: 2>, scalar_prefetch = 0 : i64, scratch_operands = 0 : i64, tpu.core_type = #tpu.core_type<tc>, window_params = [{transform_indices = @transform_0, window_bounds = array<i64: 1, 16, 16, 128>}, {pipeline_mode = #tpu.pipeline_mode<synchronous>, transform_indices = @transform_1, window_bounds = array<i64: 1, 128>}, {pipeline_mode = #tpu.pipeline_mode<synchronous>, transform_indices = @transform_2, window_bounds = array<i64: 1, 128>}, {transform_indices = @transform_3, window_bounds = array<i64: 1, 16, 16, 128>}]} {
    %c0 = arith.constant 0 : index
    %c0_0 = arith.constant 0 : index
    %0 = vector.load %arg2[%c0, %c0_0] : memref<1x128xf32, #tpu.memory_space<vmem>>, vector<1x128xf32>
    %1 = vector.shape_cast %0 : vector<1x128xf32> to vector<1x1x128xf32>
    %c0_1 = arith.constant 0 : index
    %c0_2 = arith.constant 0 : index
    %2 = vector.load %arg3[%c0_1, %c0_2] : memref<1x128xf32, #tpu.memory_space<vmem>>, vector<1x128xf32>
    %3 = vector.shape_cast %2 : vector<1x128xf32> to vector<1x1x128xf32>
    %c0_3 = arith.constant 0 : index
    %c0_4 = arith.constant 0 : index
    %c0_5 = arith.constant 0 : index
    %c0_6 = arith.constant 0 : index
    %4 = vector.load %arg1[%c0_3, %c0_4, %c0_5, %c0_6] : memref<1x16x16x128xbf16, #tpu.memory_space<vmem>>, vector<1x16x16x128xbf16>
    %5 = vector.shape_cast %4 : vector<1x16x16x128xbf16> to vector<16x16x128xbf16>
    %6 = arith.extf %5 : vector<16x16x128xbf16> to vector<16x16x128xf32>
    %7 = vector.broadcast %1 : vector<1x1x128xf32> to vector<16x16x128xf32>
    %8 = arith.mulf %6, %7 : vector<16x16x128xf32>
    %9 = vector.broadcast %3 : vector<1x1x128xf32> to vector<16x16x128xf32>
    %10 = arith.addf %8, %9 : vector<16x16x128xf32>
    %cst = arith.constant 0.000000e+00 : f32
    %11 = vector.broadcast %cst : f32 to vector<16x16x128xf32>
    %12 = arith.maximumf %10, %11 : vector<16x16x128xf32>
    %13 = arith.truncf %12 : vector<16x16x128xf32> to vector<16x16x128xbf16>
    %c0_7 = arith.constant 0 : index
    %c0_8 = arith.constant 0 : index
    %c0_9 = arith.constant 0 : index
    %c0_10 = arith.constant 0 : index
    %14 = vector.load %arg4[%c0_7, %c0_8, %c0_9, %c0_10] : memref<1x16x16x128xbf16, #tpu.memory_space<vmem>>, vector<1x16x16x128xbf16>
    %15 = vector.shape_cast %14 : vector<1x16x16x128xbf16> to vector<16x16x128xbf16>
    %16 = vector.shape_cast %13 : vector<16x16x128xbf16> to vector<1x16x16x128xbf16>
    tpu.vector_store %arg4[%c0_7, %c0_8, %c0_9, %c0_10], %16 {strides = array<i32>} : memref<1x16x16x128xbf16, #tpu.memory_space<vmem>>, vector<1x16x16x128xbf16>,
    return
  }
  func.func @transform_0(%arg0: i32) -> (i32, i32, i32, i32) {
    %c0_i32 = arith.constant 0 : i32
    %c0_i32_0 = arith.constant 0 : i32
    %c0_i32_1 = arith.constant 0 : i32
    %c0_i32_2 = arith.constant 0 : i32
    return %arg0, %c0_i32, %c0_i32_0, %c0_i32_1 : i32, i32, i32, i32
  }
  func.func @transform_1(%arg0: i32) -> (i32, i32) {
    %c0_i32 = arith.constant 0 : i32
    %c0_i32_0 = arith.constant 0 : i32
    %c0_i32_1 = arith.constant 0 : i32
    return %c0_i32, %c0_i32_0 : i32, i32
  }
  func.func @transform_2(%arg0: i32) -> (i32, i32) {
    %c0_i32 = arith.constant 0 : i32
    %c0_i32_0 = arith.constant 0 : i32
    %c0_i32_1 = arith.constant 0 : i32
    return %c0_i32, %c0_i32_0 : i32, i32
  }
  func.func @transform_3(%arg0: i32) -> (i32, i32, i32, i32) {
    %c0_i32 = arith.constant 0 : i32
    %c0_i32_0 = arith.constant 0 : i32
    %c0_i32_1 = arith.constant 0 : i32
    %c0_i32_2 = arith.constant 0 : i32
    return %arg0, %c0_i32, %c0_i32_0, %c0_i32_1 : i32, i32, i32, i32
  }
}

module attributes {stable_mosaic.version = 11 : i64} {
  func.func @_conv3x3_bn_kernel(%arg0: i32, %arg1: memref<1x16x16x128xbf16, #tpu.memory_space<vmem>>, %arg2: memref<9x128x128xbf16, #tpu.memory_space<vmem>>, %arg3: memref<1x128xf32, #tpu.memory_space<vmem>>, %arg4: memref<1x128xf32, #tpu.memory_space<vmem>>, %arg5: memref<1x16x16x128xbf16, #tpu.memory_space<vmem>>, %arg6: memref<1x2x128xf32, #tpu.memory_space<vmem>>, %arg7: memref<18x18x128xf32, #tpu.memory_space<vmem>>) attributes {dimension_semantics = [#tpu.dimension_semantics<parallel>], iteration_bounds = array<i64: 2>, scalar_prefetch = 0 : i64, scratch_operands = 1 : i64, tpu.core_type = #tpu.core_type<tc>, window_params = [{transform_indices = @transform_0, window_bounds = array<i64: 1, 16, 16, 128>}, {pipeline_mode = #tpu.pipeline_mode<synchronous>, transform_indices = @transform_1, window_bounds = array<i64: 9, 128, 128>}, {pipeline_mode = #tpu.pipeline_mode<synchronous>, transform_indices = @transform_2, window_bounds = array<i64: 1, 128>}, {pipeline_mode = #tpu.pipeline_mode<synchronous>, transform_indices = @transform_3, window_bounds = array<i64: 1, 128>}, {transform_indices = @transform_4, window_bounds = array<i64: 1, 16, 16, 128>}, {transform_indices = @transform_5, window_bounds = array<i64: 1, 2, 128>}]} {
    %c0 = arith.constant 0 : index
    %c0_0 = arith.constant 0 : index
    %c0_1 = arith.constant 0 : index
    %c0_2 = arith.constant 0 : index
    %0 = vector.load %arg1[%c0, %c0_0, %c0_1, %c0_2] : memref<1x16x16x128xbf16, #tpu.memory_space<vmem>>, vector<1x16x16x128xbf16>
    %1 = vector.shape_cast %0 : vector<1x16x16x128xbf16> to vector<16x16x128xbf16>
    %2 = arith.extf %1 : vector<16x16x128xbf16> to vector<16x16x128xf32>
    %c0_3 = arith.constant 0 : index
    %c0_4 = arith.constant 0 : index
    %3 = vector.load %arg3[%c0_3, %c0_4] : memref<1x128xf32, #tpu.memory_space<vmem>>, vector<1x128xf32>
    %4 = vector.shape_cast %3 : vector<1x128xf32> to vector<1x1x128xf32>
    %c0_5 = arith.constant 0 : index
    %c0_6 = arith.constant 0 : index
    %5 = vector.load %arg4[%c0_5, %c0_6] : memref<1x128xf32, #tpu.memory_space<vmem>>, vector<1x128xf32>
    %6 = vector.shape_cast %5 : vector<1x128xf32> to vector<1x1x128xf32>
    %7 = vector.broadcast %4 : vector<1x1x128xf32> to vector<16x16x128xf32>
    %8 = arith.mulf %2, %7 : vector<16x16x128xf32>
    %9 = vector.broadcast %6 : vector<1x1x128xf32> to vector<16x16x128xf32>
    %10 = arith.addf %8, %9 : vector<16x16x128xf32>
    %cst = arith.constant 0.000000e+00 : f32
    %11 = vector.broadcast %cst : f32 to vector<16x16x128xf32>
    %12 = arith.maximumf %10, %11 : vector<16x16x128xf32>
    %cst_7 = arith.constant 0.000000e+00 : f32
    %13 = vector.broadcast %cst_7 : f32 to vector<1x18x128xf32>
    %c0_8 = arith.constant 0 : index
    %c0_9 = arith.constant 0 : index
    %c0_10 = arith.constant 0 : index
    %14 = vector.load %arg7[%c0_8, %c0_9, %c0_10] : memref<18x18x128xf32, #tpu.memory_space<vmem>>, vector<1x18x128xf32>
    tpu.vector_store %arg7[%c0_8, %c0_9, %c0_10], %13 {strides = array<i32>} : memref<18x18x128xf32, #tpu.memory_space<vmem>>, vector<1x18x128xf32>,
    %cst_11 = arith.constant 0.000000e+00 : f32
    %15 = vector.broadcast %cst_11 : f32 to vector<1x18x128xf32>
    %c17 = arith.constant 17 : index
    %c0_12 = arith.constant 0 : index
    %c0_13 = arith.constant 0 : index
    %16 = vector.load %arg7[%c17, %c0_12, %c0_13] : memref<18x18x128xf32, #tpu.memory_space<vmem>>, vector<1x18x128xf32>
    tpu.vector_store %arg7[%c17, %c0_12, %c0_13], %15 {strides = array<i32>} : memref<18x18x128xf32, #tpu.memory_space<vmem>>, vector<1x18x128xf32>,
    %cst_14 = arith.constant 0.000000e+00 : f32
    %17 = vector.broadcast %cst_14 : f32 to vector<18x1x128xf32>
    %c0_15 = arith.constant 0 : index
    %c0_16 = arith.constant 0 : index
    %c0_17 = arith.constant 0 : index
    %18 = vector.load %arg7[%c0_15, %c0_16, %c0_17] : memref<18x18x128xf32, #tpu.memory_space<vmem>>, vector<18x1x128xf32>
    tpu.vector_store %arg7[%c0_15, %c0_16, %c0_17], %17 {strides = array<i32>} : memref<18x18x128xf32, #tpu.memory_space<vmem>>, vector<18x1x128xf32>,
    %cst_18 = arith.constant 0.000000e+00 : f32
    %19 = vector.broadcast %cst_18 : f32 to vector<18x1x128xf32>
    %c0_19 = arith.constant 0 : index
    %c17_20 = arith.constant 17 : index
    %c0_21 = arith.constant 0 : index
    %20 = vector.load %arg7[%c0_19, %c17_20, %c0_21] : memref<18x18x128xf32, #tpu.memory_space<vmem>>, vector<18x1x128xf32>
    tpu.vector_store %arg7[%c0_19, %c17_20, %c0_21], %19 {strides = array<i32>} : memref<18x18x128xf32, #tpu.memory_space<vmem>>, vector<18x1x128xf32>,
    %c1 = arith.constant 1 : index
    %c1_22 = arith.constant 1 : index
    %c0_23 = arith.constant 0 : index
    %21 = vector.load %arg7[%c1, %c1_22, %c0_23] : memref<18x18x128xf32, #tpu.memory_space<vmem>>, vector<16x16x128xf32>
    tpu.vector_store %arg7[%c1, %c1_22, %c0_23], %12 {strides = array<i32>} : memref<18x18x128xf32, #tpu.memory_space<vmem>>, vector<16x16x128xf32>,
    %c0_24 = arith.constant 0 : index
    %c0_25 = arith.constant 0 : index
    %c0_26 = arith.constant 0 : index
    %22 = vector.load %arg7[%c0_24, %c0_25, %c0_26] : memref<18x18x128xf32, #tpu.memory_space<vmem>>, vector<18x18x128xf32>
    %cst_27 = arith.constant 0.000000e+00 : f32
    %23 = vector.broadcast %cst_27 : f32 to vector<256x128xf32>
    %24 = vector.extract_strided_slice %22 {offsets = [0, 0, 0], sizes = [16, 16, 128], strides = [1, 1, 1]} : vector<18x18x128xf32> to vector<16x16x128xf32>
    %25 = vector.shape_cast %24 : vector<16x16x128xf32> to vector<256x128xf32>
    %26 = arith.truncf %25 : vector<256x128xf32> to vector<256x128xbf16>
    %c0_28 = arith.constant 0 : index
    %c0_29 = arith.constant 0 : index
    %c0_30 = arith.constant 0 : index
    %27 = vector.load %arg2[%c0_28, %c0_29, %c0_30] : memref<9x128x128xbf16, #tpu.memory_space<vmem>>, vector<1x128x128xbf16>
    %28 = vector.shape_cast %27 : vector<1x128x128xbf16> to vector<128x128xbf16>
    %cst_31 = arith.constant dense<0.000000e+00> : vector<256x128xf32>
    %29 = tpu.matmul %26, %28, %cst_31 {dimension_numbers = #tpu.dot_dimension_numbers<[1], [0], [0], [1], [0, 0, 1, 1], [], []>} : vector<256x128xbf16>, vector<128x128xbf16>, vector<256x128xf32> -> vector<256x128xf32>
    %30 = arith.addf %23, %29 : vector<256x128xf32>
    %31 = vector.extract_strided_slice %22 {offsets = [0, 1, 0], sizes = [16, 16, 128], strides = [1, 1, 1]} : vector<18x18x128xf32> to vector<16x16x128xf32>
    %32 = vector.shape_cast %31 : vector<16x16x128xf32> to vector<256x128xf32>
    %33 = arith.truncf %32 : vector<256x128xf32> to vector<256x128xbf16>
    %c1_32 = arith.constant 1 : index
    %c0_33 = arith.constant 0 : index
    %c0_34 = arith.constant 0 : index
    %34 = vector.load %arg2[%c1_32, %c0_33, %c0_34] : memref<9x128x128xbf16, #tpu.memory_space<vmem>>, vector<1x128x128xbf16>
    %35 = vector.shape_cast %34 : vector<1x128x128xbf16> to vector<128x128xbf16>
    %cst_35 = arith.constant dense<0.000000e+00> : vector<256x128xf32>
    %36 = tpu.matmul %33, %35, %cst_35 {dimension_numbers = #tpu.dot_dimension_numbers<[1], [0], [0], [1], [0, 0, 1, 1], [], []>} : vector<256x128xbf16>, vector<128x128xbf16>, vector<256x128xf32> -> vector<256x128xf32>
    %37 = arith.addf %30, %36 : vector<256x128xf32>
    %38 = vector.extract_strided_slice %22 {offsets = [0, 2, 0], sizes = [16, 16, 128], strides = [1, 1, 1]} : vector<18x18x128xf32> to vector<16x16x128xf32>
    %39 = vector.shape_cast %38 : vector<16x16x128xf32> to vector<256x128xf32>
    %40 = arith.truncf %39 : vector<256x128xf32> to vector<256x128xbf16>
    %c2 = arith.constant 2 : index
    %c0_36 = arith.constant 0 : index
    %c0_37 = arith.constant 0 : index
    %41 = vector.load %arg2[%c2, %c0_36, %c0_37] : memref<9x128x128xbf16, #tpu.memory_space<vmem>>, vector<1x128x128xbf16>
    %42 = vector.shape_cast %41 : vector<1x128x128xbf16> to vector<128x128xbf16>
    %cst_38 = arith.constant dense<0.000000e+00> : vector<256x128xf32>
    %43 = tpu.matmul %40, %42, %cst_38 {dimension_numbers = #tpu.dot_dimension_numbers<[1], [0], [0], [1], [0, 0, 1, 1], [], []>} : vector<256x128xbf16>, vector<128x128xbf16>, vector<256x128xf32> -> vector<256x128xf32>
    %44 = arith.addf %37, %43 : vector<256x128xf32>
    %45 = vector.extract_strided_slice %22 {offsets = [1, 0, 0], sizes = [16, 16, 128], strides = [1, 1, 1]} : vector<18x18x128xf32> to vector<16x16x128xf32>
    %46 = vector.shape_cast %45 : vector<16x16x128xf32> to vector<256x128xf32>
    %47 = arith.truncf %46 : vector<256x128xf32> to vector<256x128xbf16>
    %c3 = arith.constant 3 : index
    %c0_39 = arith.constant 0 : index
    %c0_40 = arith.constant 0 : index
    %48 = vector.load %arg2[%c3, %c0_39, %c0_40] : memref<9x128x128xbf16, #tpu.memory_space<vmem>>, vector<1x128x128xbf16>
    %49 = vector.shape_cast %48 : vector<1x128x128xbf16> to vector<128x128xbf16>
    %cst_41 = arith.constant dense<0.000000e+00> : vector<256x128xf32>
    %50 = tpu.matmul %47, %49, %cst_41 {dimension_numbers = #tpu.dot_dimension_numbers<[1], [0], [0], [1], [0, 0, 1, 1], [], []>} : vector<256x128xbf16>, vector<128x128xbf16>, vector<256x128xf32> -> vector<256x128xf32>
    %51 = arith.addf %44, %50 : vector<256x128xf32>
    %52 = vector.extract_strided_slice %22 {offsets = [1, 1, 0], sizes = [16, 16, 128], strides = [1, 1, 1]} : vector<18x18x128xf32> to vector<16x16x128xf32>
    %53 = vector.shape_cast %52 : vector<16x16x128xf32> to vector<256x128xf32>
    %54 = arith.truncf %53 : vector<256x128xf32> to vector<256x128xbf16>
    %c4 = arith.constant 4 : index
    %c0_42 = arith.constant 0 : index
    %c0_43 = arith.constant 0 : index
    %55 = vector.load %arg2[%c4, %c0_42, %c0_43] : memref<9x128x128xbf16, #tpu.memory_space<vmem>>, vector<1x128x128xbf16>
    %56 = vector.shape_cast %55 : vector<1x128x128xbf16> to vector<128x128xbf16>
    %cst_44 = arith.constant dense<0.000000e+00> : vector<256x128xf32>
    %57 = tpu.matmul %54, %56, %cst_44 {dimension_numbers = #tpu.dot_dimension_numbers<[1], [0], [0], [1], [0, 0, 1, 1], [], []>} : vector<256x128xbf16>, vector<128x128xbf16>, vector<256x128xf32> -> vector<256x128xf32>
    %58 = arith.addf %51, %57 : vector<256x128xf32>
    %59 = vector.extract_strided_slice %22 {offsets = [1, 2, 0], sizes = [16, 16, 128], strides = [1, 1, 1]} : vector<18x18x128xf32> to vector<16x16x128xf32>
    %60 = vector.shape_cast %59 : vector<16x16x128xf32> to vector<256x128xf32>
    %61 = arith.truncf %60 : vector<256x128xf32> to vector<256x128xbf16>
    %c5 = arith.constant 5 : index
    %c0_45 = arith.constant 0 : index
    %c0_46 = arith.constant 0 : index
    %62 = vector.load %arg2[%c5, %c0_45, %c0_46] : memref<9x128x128xbf16, #tpu.memory_space<vmem>>, vector<1x128x128xbf16>
    %63 = vector.shape_cast %62 : vector<1x128x128xbf16> to vector<128x128xbf16>
    %cst_47 = arith.constant dense<0.000000e+00> : vector<256x128xf32>
    %64 = tpu.matmul %61, %63, %cst_47 {dimension_numbers = #tpu.dot_dimension_numbers<[1], [0], [0], [1], [0, 0, 1, 1], [], []>} : vector<256x128xbf16>, vector<128x128xbf16>, vector<256x128xf32> -> vector<256x128xf32>
    %65 = arith.addf %58, %64 : vector<256x128xf32>
    %66 = vector.extract_strided_slice %22 {offsets = [2, 0, 0], sizes = [16, 16, 128], strides = [1, 1, 1]} : vector<18x18x128xf32> to vector<16x16x128xf32>
    %67 = vector.shape_cast %66 : vector<16x16x128xf32> to vector<256x128xf32>
    %68 = arith.truncf %67 : vector<256x128xf32> to vector<256x128xbf16>
    %c6 = arith.constant 6 : index
    %c0_48 = arith.constant 0 : index
    %c0_49 = arith.constant 0 : index
    %69 = vector.load %arg2[%c6, %c0_48, %c0_49] : memref<9x128x128xbf16, #tpu.memory_space<vmem>>, vector<1x128x128xbf16>
    %70 = vector.shape_cast %69 : vector<1x128x128xbf16> to vector<128x128xbf16>
    %cst_50 = arith.constant dense<0.000000e+00> : vector<256x128xf32>
    %71 = tpu.matmul %68, %70, %cst_50 {dimension_numbers = #tpu.dot_dimension_numbers<[1], [0], [0], [1], [0, 0, 1, 1], [], []>} : vector<256x128xbf16>, vector<128x128xbf16>, vector<256x128xf32> -> vector<256x128xf32>
    %72 = arith.addf %65, %71 : vector<256x128xf32>
    %73 = vector.extract_strided_slice %22 {offsets = [2, 1, 0], sizes = [16, 16, 128], strides = [1, 1, 1]} : vector<18x18x128xf32> to vector<16x16x128xf32>
    %74 = vector.shape_cast %73 : vector<16x16x128xf32> to vector<256x128xf32>
    %75 = arith.truncf %74 : vector<256x128xf32> to vector<256x128xbf16>
    %c7 = arith.constant 7 : index
    %c0_51 = arith.constant 0 : index
    %c0_52 = arith.constant 0 : index
    %76 = vector.load %arg2[%c7, %c0_51, %c0_52] : memref<9x128x128xbf16, #tpu.memory_space<vmem>>, vector<1x128x128xbf16>
    %77 = vector.shape_cast %76 : vector<1x128x128xbf16> to vector<128x128xbf16>
    %cst_53 = arith.constant dense<0.000000e+00> : vector<256x128xf32>
    %78 = tpu.matmul %75, %77, %cst_53 {dimension_numbers = #tpu.dot_dimension_numbers<[1], [0], [0], [1], [0, 0, 1, 1], [], []>} : vector<256x128xbf16>, vector<128x128xbf16>, vector<256x128xf32> -> vector<256x128xf32>
    %79 = arith.addf %72, %78 : vector<256x128xf32>
    %80 = vector.extract_strided_slice %22 {offsets = [2, 2, 0], sizes = [16, 16, 128], strides = [1, 1, 1]} : vector<18x18x128xf32> to vector<16x16x128xf32>
    %81 = vector.shape_cast %80 : vector<16x16x128xf32> to vector<256x128xf32>
    %82 = arith.truncf %81 : vector<256x128xf32> to vector<256x128xbf16>
    %c8 = arith.constant 8 : index
    %c0_54 = arith.constant 0 : index
    %c0_55 = arith.constant 0 : index
    %83 = vector.load %arg2[%c8, %c0_54, %c0_55] : memref<9x128x128xbf16, #tpu.memory_space<vmem>>, vector<1x128x128xbf16>
    %84 = vector.shape_cast %83 : vector<1x128x128xbf16> to vector<128x128xbf16>
    %cst_56 = arith.constant dense<0.000000e+00> : vector<256x128xf32>
    %85 = tpu.matmul %82, %84, %cst_56 {dimension_numbers = #tpu.dot_dimension_numbers<[1], [0], [0], [1], [0, 0, 1, 1], [], []>} : vector<256x128xbf16>, vector<128x128xbf16>, vector<256x128xf32> -> vector<256x128xf32>
    %86 = arith.addf %79, %85 : vector<256x128xf32>
    %87 = vector.shape_cast %86 : vector<256x128xf32> to vector<16x16x128xf32>
    %88 = arith.truncf %87 : vector<16x16x128xf32> to vector<16x16x128xbf16>
    %c0_57 = arith.constant 0 : index
    %c0_58 = arith.constant 0 : index
    %c0_59 = arith.constant 0 : index
    %c0_60 = arith.constant 0 : index
    %89 = vector.load %arg5[%c0_57, %c0_58, %c0_59, %c0_60] : memref<1x16x16x128xbf16, #tpu.memory_space<vmem>>, vector<1x16x16x128xbf16>
    %90 = vector.shape_cast %89 : vector<1x16x16x128xbf16> to vector<16x16x128xbf16>
    %91 = vector.shape_cast %88 : vector<16x16x128xbf16> to vector<1x16x16x128xbf16>
    tpu.vector_store %arg5[%c0_57, %c0_58, %c0_59, %c0_60], %91 {strides = array<i32>} : memref<1x16x16x128xbf16, #tpu.memory_space<vmem>>, vector<1x16x16x128xbf16>,
    %cst_61 = arith.constant dense<0.000000e+00> : vector<128xf32>
    %92 = vector.multi_reduction <add>, %86, %cst_61 [0] : vector<256x128xf32> to vector<128xf32>
    %93 = vector.shape_cast %92 : vector<128xf32> to vector<1x128xf32>
    %94 = arith.mulf %86, %86 : vector<256x128xf32>
    %cst_62 = arith.constant dense<0.000000e+00> : vector<128xf32>
    %95 = vector.multi_reduction <add>, %94, %cst_62 [0] : vector<256x128xf32> to vector<128xf32>
    %96 = vector.shape_cast %95 : vector<128xf32> to vector<1x128xf32>
    %97 = tpu.concatenate %93, %96 in 0 : vector<1x128xf32>, vector<1x128xf32> -> vector<2x128xf32>
    %c0_63 = arith.constant 0 : index
    %c0_64 = arith.constant 0 : index
    %c0_65 = arith.constant 0 : index
    %98 = vector.load %arg6[%c0_63, %c0_64, %c0_65] : memref<1x2x128xf32, #tpu.memory_space<vmem>>, vector<1x2x128xf32>
    %99 = vector.shape_cast %98 : vector<1x2x128xf32> to vector<2x128xf32>
    %100 = vector.shape_cast %97 : vector<2x128xf32> to vector<1x2x128xf32>
    tpu.vector_store %arg6[%c0_63, %c0_64, %c0_65], %100 {strides = array<i32>} : memref<1x2x128xf32, #tpu.memory_space<vmem>>, vector<1x2x128xf32>,
    return
  }
  func.func @transform_0(%arg0: i32) -> (i32, i32, i32, i32) {
    %c0_i32 = arith.constant 0 : i32
    %c0_i32_0 = arith.constant 0 : i32
    %c0_i32_1 = arith.constant 0 : i32
    %c0_i32_2 = arith.constant 0 : i32
    return %arg0, %c0_i32, %c0_i32_0, %c0_i32_1 : i32, i32, i32, i32
  }
  func.func @transform_1(%arg0: i32) -> (i32, i32, i32) {
    %c0_i32 = arith.constant 0 : i32
    %c0_i32_0 = arith.constant 0 : i32
    %c0_i32_1 = arith.constant 0 : i32
    %c0_i32_2 = arith.constant 0 : i32
    return %c0_i32, %c0_i32_0, %c0_i32_1 : i32, i32, i32
  }
  func.func @transform_2(%arg0: i32) -> (i32, i32) {
    %c0_i32 = arith.constant 0 : i32
    %c0_i32_0 = arith.constant 0 : i32
    %c0_i32_1 = arith.constant 0 : i32
    return %c0_i32, %c0_i32_0 : i32, i32
  }
  func.func @transform_3(%arg0: i32) -> (i32, i32) {
    %c0_i32 = arith.constant 0 : i32
    %c0_i32_0 = arith.constant 0 : i32
    %c0_i32_1 = arith.constant 0 : i32
    return %c0_i32, %c0_i32_0 : i32, i32
  }
  func.func @transform_4(%arg0: i32) -> (i32, i32, i32, i32) {
    %c0_i32 = arith.constant 0 : i32
    %c0_i32_0 = arith.constant 0 : i32
    %c0_i32_1 = arith.constant 0 : i32
    %c0_i32_2 = arith.constant 0 : i32
    return %arg0, %c0_i32, %c0_i32_0, %c0_i32_1 : i32, i32, i32, i32
  }
  func.func @transform_5(%arg0: i32) -> (i32, i32, i32) {
    %c0_i32 = arith.constant 0 : i32
    %c0_i32_0 = arith.constant 0 : i32
    %c0_i32_1 = arith.constant 0 : i32
    return %arg0, %c0_i32, %c0_i32_0 : i32, i32, i32
  }
}

</mosaic_0001>

<bundles_post_ra>
// kernel: conv_block_forward.5
= control target key start
LH: loop header
LB: loop body
LE: loop exit
PB: predicated region body
PF: predicated region fallthrough
CT: control target
= control target key end

     0   :  { %s683_s12 = smov 0   ;;  %s825_s0 = inlined_call_operand.vmem [shape: bf16[2,16,16,128], index: 0, kind: input, shape index: {}, may-alias: {0,3}]   ;;  %s826_s1 = inlined_call_operand.vmem [shape: f32[1,128], index: 1, kind: input, shape index: {}]   ;;  %s827_s2 = inlined_call_operand.vmem [shape: f32[1,128], index: 2, kind: input, shape index: {}]   ;;  %s828_s3 = inlined_call_operand.vmem [shape: bf16[2,16,16,128], index: 3, kind: output, shape index: {}, may-alias: {0,3}]  }
   0x1 LB: > { %s458_s13 = sadd.s32 4294967295, %s661_s12   ;;  %p462_p0 = scmp.ge.s32.totalorder %s661_s12, 1  ;;  %s661_s12 = sphi %s683_s12, %s13_s12  }
   0x2   : > { %p137_p1 = scmp.lt.s32.totalorder %s661_s12, 3 }
   0x4   : > { %p138_p2 = pnand %p462_p0, %p137_p1 }
   0x5   : > { %p161_p3 = scmp.lt.s32.totalorder (!%p138_p2), %s458_s13, 1 }
   0x6   : > { %141 = sbr.rel (%p138_p2) target bundleno = 55 (0x37), region = 32 }
   0xb   : > { %s830_s13 = smov (!%p161_p3, %s458_s13), 1  ;;  %v653_v36 = vld [vmem:[%s826_s1] ss:$0 sm:$0xff] }
   0xc   : > { %s469_s14 = sshll.u32 %s830_s13, 7 }
   0xd   : > { %s699_s17 = scalar_lea.vmem %s825_s0, %s469_s14  ;;  %s766_s24 = scalar_lea.vmem %s828_s3, %s469_s14 }
   0xe   : > { %v472_v0 = vld [vmem:[%s699_s17] sm:$0xff]   ;;  %v615_v1 = vld [vmem:[%s699_s17 + $0x8] sm:$0xff]   ;;  %v616_v2 = vld [vmem:[%s699_s17 + $0x10] sm:$0xff]  }
   0xf   : > { %v473_v3 = vunpack.c.l.bf16 %v472_v0  ;;  %v474_v4 = vunpack.c.h.bf16 %v472_v0  ;;  %v477_v5 = vunpack.c.l.bf16 %v615_v1  ;;  %v478_v6 = vunpack.c.h.bf16 %v615_v1  ;;  %v617_v7 = vld [vmem:[%s699_s17 + $0x18] sm:$0xff]   ;;  %v618_v8 = vld [vmem:[%s699_s17 + $0x20] sm:$0xff]   ;;  %v619_v9 = vld [vmem:[%s699_s17 + $0x28] sm:$0xff]  }
  0x10   : > { %v481_v10 = vunpack.c.l.bf16 %v616_v2  ;;  %v482_v11 = vunpack.c.h.bf16 %v616_v2  ;;  %v485_v12 = vunpack.c.l.bf16 %v617_v7  ;;  %v486_v13 = vunpack.c.h.bf16 %v617_v7  ;;  %v620_v14 = vld [vmem:[%s699_s17 + $0x30] sm:$0xff]   ;;  %v621_v15 = vld [vmem:[%s699_s17 + $0x38] sm:$0xff]   ;;  %v622_v16 = vld [vmem:[%s699_s17 + $0x40] sm:$0xff]  }
  0x11   : > { %v489_v17 = vunpack.c.l.bf16 %v618_v8  ;;  %v490_v18 = vunpack.c.h.bf16 %v618_v8  ;;  %v493_v19 = vunpack.c.l.bf16 %v619_v9  ;;  %v494_v20 = vunpack.c.h.bf16 %v619_v9  ;;  %v623_v21 = vld [vmem:[%s699_s17 + $0x48] sm:$0xff]   ;;  %v624_v22 = vld [vmem:[%s699_s17 + $0x50] sm:$0xff]   ;;  %v625_v23 = vld [vmem:[%s699_s17 + $0x58] sm:$0xff]  }
  0x12   : > { %v497_v24 = vunpack.c.l.bf16 %v620_v14  ;;  %v498_v25 = vunpack.c.h.bf16 %v620_v14  ;;  %v501_v26 = vunpack.c.l.bf16 %v621_v15  ;;  %v502_v27 = vunpack.c.h.bf16 %v621_v15  ;;  %v626_v28 = vld [vmem:[%s699_s17 + $0x60] sm:$0xff]   ;;  %v627_v29 = vld [vmem:[%s699_s17 + $0x68] sm:$0xff]   ;;  %v628_v34 = vld [vmem:[%s699_s17 + $0x70] sm:$0xff]  }
  0x13   : > { %v505_v30 = vunpack.c.l.bf16 %v622_v16  ;;  %v506_v31 = vunpack.c.h.bf16 %v622_v16  ;;  %v509_v32 = vunpack.c.l.bf16 %v623_v21  ;;  %v510_v33 = vunpack.c.h.bf16 %v623_v21  ;;  %v629_v35 = vld [vmem:[%s699_s17 + $0x78] sm:$0xff]  }
  0x14   : > { %v513_v37 = vunpack.c.l.bf16 %v624_v22  ;;  %v514_v38 = vunpack.c.h.bf16 %v624_v22  ;;  %v517_v39 = vunpack.c.l.bf16 %v625_v23  ;;  %v518_v40 = vunpack.c.h.bf16 %v625_v23 }
  0x15   : > { %v521_v41 = vunpack.c.l.bf16 %v626_v28  ;;  %v522_v42 = vunpack.c.h.bf16 %v626_v28  ;;  %v525_v43 = vunpack.c.l.bf16 %v627_v29  ;;  %v526_v44 = vunpack.c.h.bf16 %v627_v29 }
  0x16   : > { %v529_v45 = vunpack.c.l.bf16 %v628_v34  ;;  %v530_v46 = vunpack.c.h.bf16 %v628_v34  ;;  %v533_v47 = vunpack.c.l.bf16 %v629_v35  ;;  %v534_v48 = vunpack.c.h.bf16 %v629_v35 }
  0x17   : > { %v240_v49 = vmul.f32 %v653_v36, %v473_v3  ;;  %v241_v50 = vmul.f32 %v653_v36, %v474_v4  ;;  %v242_v51 = vmul.f32 %v653_v36, %v477_v5  ;;  %v243_v52 = vmul.f32 %v653_v36, %v478_v6  ;;  %v727_v4 = vld [vmem:[%s827_s2] ss:$0 sm:$0xff] }
  0x18   : > { %v244_v53 = vmul.f32 %v653_v36, %v481_v10  ;;  %v245_v54 = vmul.f32 %v653_v36, %v482_v11  ;;  %v246_v55 = vmul.f32 %v653_v36, %v485_v12  ;;  %v247_v56 = vmul.f32 %v653_v36, %v486_v13 }
  0x19   : > { %v248_v57 = vmul.f32 %v653_v36, %v489_v17  ;;  %v249_v58 = vmul.f32 %v653_v36, %v490_v18  ;;  %v250_v59 = vmul.f32 %v653_v36, %v493_v19  ;;  %v251_v60 = vmul.f32 %v653_v36, %v494_v20 }
  0x1a   : > { %v252_v61 = vmul.f32 %v653_v36, %v497_v24  ;;  %v253_v62 = vmul.f32 %v653_v36, %v498_v25  ;;  %v254_v63 = vmul.f32 %v653_v36, %v501_v26  ;;  %v255_v0 = vmul.f32 %v653_v36, %v502_v27 }
  0x1b   : > { %v256_v1 = vmul.f32 %v653_v36, %v505_v30  ;;  %v257_v2 = vmul.f32 %v653_v36, %v506_v31  ;;  %v720_v7 = vmul.f32 %v653_v36, %v509_v32  ;;  %v722_v3 = vmul.f32 %v653_v36, %v510_v33 }
  0x1c   : > { %v729_v5 = vmul.f32 %v653_v36, %v513_v37  ;;  %v731_v6 = vmul.f32 %v653_v36, %v514_v38  ;;  %v733_v8 = vmul.f32 %v653_v36, %v517_v39  ;;  %v735_v9 = vmul.f32 %v653_v36, %v518_v40 }
  0x1d   : > { %v737_v10 = vmul.f32 %v653_v36, %v521_v41  ;;  %v739_v11 = vmul.f32 %v653_v36, %v522_v42  ;;  %v741_v12 = vmul.f32 %v653_v36, %v525_v43  ;;  %v743_v13 = vmul.f32 %v653_v36, %v526_v44 }
  0x1e   : > { %v745_v14 = vmul.f32 %v653_v36, %v529_v45  ;;  %v747_v15 = vmul.f32 %v653_v36, %v530_v46  ;;  %v749_v16 = vmul.f32 %v653_v36, %v533_v47  ;;  %v751_v17 = vmul.f32 %v653_v36, %v534_v48 }
  0x1f   : > { %v275_v18 = vadd.f32 %v727_v4, %v240_v49  ;;  %v276_v19 = vadd.f32 %v727_v4, %v241_v50  ;;  %v277_v20 = vadd.f32 %v727_v4, %v242_v51  ;;  %v278_v21 = vadd.f32 %v727_v4, %v243_v52 }
  0x20   : > { %v279_v22 = vadd.f32 %v727_v4, %v244_v53  ;;  %v280_v23 = vadd.f32 %v727_v4, %v245_v54  ;;  %v281_v24 = vadd.f32 %v727_v4, %v246_v55  ;;  %v282_v25 = vadd.f32 %v727_v4, %v247_v56 }
  0x21   : > { %v307_v26 = vmax.f32 %v275_v18, 0.0  ;;  %v308_v27 = vmax.f32 %v276_v19, 0.0  ;;  %v309_v28 = vmax.f32 %v277_v20, 0.0  ;;  %v310_v29 = vmax.f32 %v278_v21, 0.0 }
  0x22   : > { %v311_v30 = vmax.f32 %v279_v22, 0.0  ;;  %v312_v31 = vmax.f32 %v280_v23, 0.0  ;;  %v313_v32 = vmax.f32 %v281_v24, 0.0  ;;  %v314_v33 = vmax.f32 %v282_v25, 0.0 }
  0x23   : > { %v538_v34 = vpack.c.bf16 %v308_v27, %v307_v26  ;;  %v543_v35 = vpack.c.bf16 %v310_v29, %v309_v28  ;;  %v283_v36 = vadd.f32 %v727_v4, %v248_v57  ;;  %v284_v37 = vadd.f32 %v727_v4, %v249_v58 }
  0x24   : > { %v548_v38 = vpack.c.bf16 %v312_v31, %v311_v30  ;;  %v553_v39 = vpack.c.bf16 %v314_v33, %v313_v32  ;;  %v285_v40 = vadd.f32 %v727_v4, %v250_v59  ;;  %v286_v41 = vadd.f32 %v727_v4, %v251_v60 }
  0x25   : > { %539 = vst [vmem:[%s766_s24] sm:$0xff] %v538_v34   ;;  %v315_v42 = vmax.f32 %v283_v36, 0.0  ;;  %v316_v43 = vmax.f32 %v284_v37, 0.0  ;;  %v287_v44 = vadd.f32 %v727_v4, %v252_v61  ;;  %v288_v45 = vadd.f32 %v727_v4, %v253_v62 }
  0x26   : > { %630 = vst [vmem:[%s766_s24 + $0x8] sm:$0xff] %v543_v35   ;;  %v317_v46 = vmax.f32 %v285_v40, 0.0  ;;  %v318_v47 = vmax.f32 %v286_v41, 0.0  ;;  %v289_v48 = vadd.f32 %v727_v4, %v254_v63  ;;  %v290_v49 = vadd.f32 %v727_v4, %v255_v0 }
  0x27   : > { %631 = vst [vmem:[%s766_s24 + $0x10] sm:$0xff] %v548_v38   ;;  %v558_v50 = vpack.c.bf16 %v316_v43, %v315_v42  ;;  %v319_v51 = vmax.f32 %v287_v44, 0.0  ;;  %v320_v52 = vmax.f32 %v288_v45, 0.0  ;;  %v291_v53 = vadd.f32 %v727_v4, %v256_v1 }
  0x28   : > { %632 = vst [vmem:[%s766_s24 + $0x18] sm:$0xff] %v553_v39   ;;  %v563_v54 = vpack.c.bf16 %v318_v47, %v317_v46  ;;  %v321_v55 = vmax.f32 %v289_v48, 0.0  ;;  %v322_v56 = vmax.f32 %v290_v49, 0.0  ;;  %v292_v57 = vadd.f32 %v727_v4, %v257_v2 }
  0x29   : > { %633 = vst [vmem:[%s766_s24 + $0x20] sm:$0xff] %v558_v50   ;;  %v568_v58 = vpack.c.bf16 %v320_v52, %v319_v51  ;;  %v323_v59 = vmax.f32 %v291_v53, 0.0  ;;  %v293_v60 = vadd.f32 %v727_v4, %v720_v7  ;;  %v294_v61 = vadd.f32 %v727_v4, %v722_v3 }
  0x2a   : > { %634 = vst [vmem:[%s766_s24 + $0x28] sm:$0xff] %v563_v54   ;;  %v573_v62 = vpack.c.bf16 %v322_v56, %v321_v55  ;;  %v324_v63 = vmax.f32 %v292_v57, 0.0  ;;  %v295_v0 = vadd.f32 %v727_v4, %v729_v5  ;;  %v296_v1 = vadd.f32 %v727_v4, %v731_v6 }
  0x2b   : > { %635 = vst [vmem:[%s766_s24 + $0x30] sm:$0xff] %v568_v58   ;;  %v325_v2 = vmax.f32 %v293_v60, 0.0  ;;  %v326_v18 = vmax.f32 %v294_v61, 0.0  ;;  %v297_v19 = vadd.f32 %v727_v4, %v733_v8  ;;  %v298_v7 = vadd.f32 %v727_v4, %v735_v9 }
  0x2c   : > { %636 = vst [vmem:[%s766_s24 + $0x38] sm:$0xff] %v573_v62   ;;  %v578_v3 = vpack.c.bf16 %v324_v63, %v323_v59  ;;  %v327_v20 = vmax.f32 %v295_v0, 0.0  ;;  %v328_v21 = vmax.f32 %v296_v1, 0.0  ;;  %v299_v5 = vadd.f32 %v727_v4, %v737_v10 }
  0x2d   : > { %v583_v22 = vpack.c.bf16 %v326_v18, %v325_v2  ;;  %v329_v6 = vmax.f32 %v297_v19, 0.0  ;;  %v330_v23 = vmax.f32 %v298_v7, 0.0  ;;  %v300_v24 = vadd.f32 %v727_v4, %v739_v11 }
  0x2e   : > { %637 = vst [vmem:[%s766_s24 + $0x40] sm:$0xff] %v578_v3   ;;  %v588_v8 = vpack.c.bf16 %v328_v21, %v327_v20  ;;  %v331_v25 = vmax.f32 %v299_v5, 0.0  ;;  %v301_v9 = vadd.f32 %v727_v4, %v741_v12  ;;  %v302_v26 = vadd.f32 %v727_v4, %v743_v13 }
  0x2f   : > { %638 = vst [vmem:[%s766_s24 + $0x48] sm:$0xff] %v583_v22   ;;  %v593_v27 = vpack.c.bf16 %v330_v23, %v329_v6  ;;  %v332_v10 = vmax.f32 %v300_v24, 0.0  ;;  %v303_v28 = vadd.f32 %v727_v4, %v745_v14  ;;  %v304_v11 = vadd.f32 %v727_v4, %v747_v15 }
  0x30   : > { %639 = vst [vmem:[%s766_s24 + $0x50] sm:$0xff] %v588_v8   ;;  %v333_v29 = vmax.f32 %v301_v9, 0.0  ;;  %v334_v30 = vmax.f32 %v302_v26, 0.0  ;;  %v305_v12 = vadd.f32 %v727_v4, %v749_v16  ;;  %v306_v13 = vadd.f32 %v727_v4, %v751_v17 }
  0x31   : > { %640 = vst [vmem:[%s766_s24 + $0x58] sm:$0xff] %v593_v27   ;;  %v598_v31 = vpack.c.bf16 %v332_v10, %v331_v25  ;;  %v335_v32 = vmax.f32 %v303_v28, 0.0  ;;  %v336_v33 = vmax.f32 %v304_v11, 0.0 }
  0x32   : > { %v603_v14 = vpack.c.bf16 %v334_v30, %v333_v29  ;;  %v337_v34 = vmax.f32 %v305_v12, 0.0  ;;  %v338_v35 = vmax.f32 %v306_v13, 0.0 }
  0x33   : > { %641 = vst [vmem:[%s766_s24 + $0x60] sm:$0xff] %v598_v31   ;;  %v608_v15 = vpack.c.bf16 %v336_v33, %v335_v32 }
  0x34   : > { %642 = vst [vmem:[%s766_s24 + $0x68] sm:$0xff] %v603_v14   ;;  %v613_v36 = vpack.c.bf16 %v338_v35, %v337_v34 }
  0x35   : > { %643 = vst [vmem:[%s766_s24 + $0x70] sm:$0xff] %v608_v15  }
  0x36   : > { %644 = vst [vmem:[%s766_s24 + $0x78] sm:$0xff] %v613_v36  }
  0x37 PF: > { %s13_s12 = sadd.s32 1, %s661_s12  }
  0x38   : > { %p10_p4 = scmp.ge.s32.totalorder %s13_s12, 4  }
  0x3a   :  { %12 = sbr.rel (!%p10_p4) target bundleno = 1 (0x1), region = 62 }

// kernel: conv_block_forward.3
= control target key start
LH: loop header
LB: loop body
LE: loop exit
PB: predicated region body
PF: predicated region fallthrough
CT: control target
= control target key end

     0   :  { %s3409_s18 = smov 0   ;;  %s4455_s0 = inlined_call_operand.vmem [shape: bf16[2,16,16,128], index: 0, kind: input, shape index: {}]   ;;  %s4456_s1 = inlined_call_operand.vmem [shape: bf16[9,128,128], index: 1, kind: input, shape index: {}]   ;;  %s4457_s2 = inlined_call_operand.vmem [shape: f32[1,128], index: 2, kind: input, shape index: {}]   ;;  %s4458_s3 = inlined_call_operand.vmem [shape: f32[1,128], index: 3, kind: input, shape index: {}]   ;;  %s4459_s4 = inlined_call_operand.vmem [shape: bf16[2,16,16,128], index: 4, kind: output, shape index: {0}]   ;;  %s4460_s5 = inlined_call_operand.vmem [shape: f32[2,2,128], index: 5, kind: output, shape index: {1}]  }
   0x1 LB: > { %s2660_s2 = sadd.s32 4294967295, %s3376_s18   ;;  %p2664_p0 = scmp.ge.s32.totalorder %s3376_s18, 1  ;;  %s3376_s18 = sphi %s3409_s18, %s16_s18  }
   0x2   : > { %p190_p1 = scmp.lt.s32.totalorder %s3376_s18, 3 }
   0x4   : > { %p191_p2 = pnand %p2664_p0, %p190_p1 }
   0x6   : > { %194 = sbr.rel (%p191_p2) target bundleno = 793 (0x319), region = 36 }
   0xb   : > { %v3105_v0 = vld [vmem:[%s4456_s1 + $0x78] sm:$0xff]  ;;  %p222_p3 = scmp.lt.s32.totalorder %s2660_s2, 1  ;;  %v4461_v1 = vmov 0.0   ;;  %v3104_v2 = vld [vmem:[%s4456_s1 + $0x70] sm:$0xff]  ;;  %v3103_v3 = vld [vmem:[%s4456_s1 + $0x68] sm:$0xff]  ;;  %vm510_vm0 = vcmask 1046528  }
   0xc   : > { %311 = vst [vmem:[#allocation2 + $0x60] sm:$0x1] %v4461_v1  ;;  %3336 = vmatpush.bf16.msra.mxu1 %v3105_v0  ;;  %3337 = vmatpush.bf16.msra.mxu2 %v3105_v0  ;;  %v3102_v7 = vld [vmem:[%s4456_s1 + $0x60] sm:$0xff]  ;;  %v3101_v8 = vld [vmem:[%s4456_s1 + $0x58] sm:$0xff]  ;;  %v3100_v9 = vld [vmem:[%s4456_s1 + $0x50] sm:$0xff]  ;;  %v512_v54 = vrot.slane %v4461_v1, 1 }
   0xd   : > { %s4596_s2 = smov (!%p222_p3, %s2660_s2), 1  ;;  %329 = vst [vmem:[#allocation2 + $0x71] sm:$0x1] %v4461_v1  ;;  %3338 = vmatpush.bf16.msra.mxu3 %v3105_v0  ;;  %704 = vmatpush.bf16.msra.mxu0 %v3105_v0  ;;  %v3099_v13 = vld [vmem:[%s4456_s1 + $0x48] sm:$0xff]  ;;  %v3098_v17 = vld [vmem:[%s4456_s1 + $0x40] sm:$0xff]  ;;  %v3113_v21 = vld [vmem:[%s4456_s1 + $0xb8] sm:$0xff] }
   0xe   : > { %300 = vst [vmem:[#allocation2] sm:$0xff] %v4461_v1  ;;  %s3088_s22 = sshll.u32 %s4596_s2, 7  ;;  %v3121_v22 = vld [vmem:[%s4456_s1 + $0xf8] sm:$0xff]  ;;  %v3112_v25 = vld [vmem:[%s4456_s1 + $0xb0] sm:$0xff]  ;;  %v3111_v37 = vld [vmem:[%s4456_s1 + $0xa8] sm:$0xff]  ;;  %vm930_vm1 = vcmask 1045504  }
   0xf   : > { %301 = vst [vmem:[#allocation2 + $0x8] sm:$0xff] %v4461_v1  ;;  %s3435_s25 = scalar_lea.vmem %s4455_s0, %s3088_s22  ;;  %v3097_v23 = vld [vmem:[%s4456_s1 + $0x38] sm:$0xff]  ;;  %v3120_v26 = vld [vmem:[%s4456_s1 + $0xf0] sm:$0xff]  ;;  %v3119_v38 = vld [vmem:[%s4456_s1 + $0xe8] sm:$0xff]  ;;  %s4372_s29 = scalar_lea.vmem %s4459_s4, %s3088_s22  ;;  %vm2571_vm2 = vcmask 1040384  }
  0x10   : > { %302 = vst [vmem:[#allocation2 + $0x10] sm:$0x3] %v4461_v1  ;;  %3339 = vmatpush.bf16.msra.mxu1 %v3104_v2  ;;  %3340 = vmatpush.bf16.msra.mxu2 %v3104_v2  ;;  %v3308_v4 = vld [vmem:[%s3435_s25 + $0x18] sm:$0xff]   ;;  %v3096_v28 = vld [vmem:[%s4456_s1 + $0x30] sm:$0xff]  ;;  %v3309_v32 = vld [vmem:[%s3435_s25 + $0x20] sm:$0xff]   ;;  %s2669_s22 = sshll.u32 %s4596_s2, 1 }
  0x11   : > { %304 = vst [vmem:[#allocation2 + $0x198] sm:$0xff] %v4461_v1  ;;  %3341 = vmatpush.bf16.msra.mxu3 %v3104_v2  ;;  %705 = vmatpush.bf16.msra.mxu0 %v3104_v2  ;;  %v3176_v5 = vunpack.c.l.bf16 %v3308_v4  ;;  %v3177_v6 = vunpack.c.h.bf16 %v3308_v4  ;;  %v3129_v24 = vld [vmem:[%s4456_s1 + $0x138] sm:$0xff]  ;;  %v3313_v35 = vld [vmem:[%s3435_s25 + $0x40] sm:$0xff]   ;;  %v3180_v36 = vunpack.c.l.bf16 %v3309_v32  ;;  %v3128_v39 = vld [vmem:[%s4456_s1 + $0x130] sm:$0xff]  ;;  %v3181_v40 = vunpack.c.h.bf16 %v3309_v32  ;;  %s235_s7 = scalar_lea.vmem %s4460_s5, %s2669_s22 }
  0x12   : > { %306 = vst [vmem:[#allocation2 + $0x1a8] sm:$0x3] %v4461_v1  ;;  %v3312_v27 = vld [vmem:[%s3435_s25 + $0x38] sm:$0xff]   ;;  %v3317_v41 = vld [vmem:[%s3435_s25 + $0x60] sm:$0xff]   ;;  %v3095_v42 = vld [vmem:[%s4456_s1 + $0x28] sm:$0xff]  ;;  %v3196_v43 = vunpack.c.l.bf16 %v3313_v35  ;;  %v3197_v48 = vunpack.c.h.bf16 %v3313_v35 }
  0x13   : > { %350 = vst [vmem:[#allocation2 + $0x61] sm:$0xff] %v3176_v5  ;;  %v3192_v29 = vunpack.c.l.bf16 %v3312_v27  ;;  %v3193_v30 = vunpack.c.h.bf16 %v3312_v27  ;;  %v3316_v31 = vld [vmem:[%s3435_s25 + $0x58] sm:$0xff]   ;;  %v3163_v44 = vld [vmem:[%s3435_s25] sm:$0xff]   ;;  %v3127_v49 = vld [vmem:[%s4456_s1 + $0x128] sm:$0xff]  ;;  %v3212_v55 = vunpack.c.l.bf16 %v3317_v41  ;;  %v3213_v59 = vunpack.c.h.bf16 %v3317_v41 }
  0x14   : > { %3342 = vmatpush.bf16.msra.mxu1 %v3103_v3  ;;  %3343 = vmatpush.bf16.msra.mxu2 %v3103_v3  ;;  %351 = vst [vmem:[#allocation2 + $0x69] sm:$0xff] %v3177_v6  ;;  %v3208_v33 = vunpack.c.l.bf16 %v3316_v31  ;;  %v3209_v34 = vunpack.c.h.bf16 %v3316_v31  ;;  %v3110_v45 = vld [vmem:[%s4456_s1 + $0xa0] sm:$0xff]  ;;  %v3310_v60 = vld [vmem:[%s3435_s25 + $0x28] sm:$0xff]   ;;  %v3164_v62 = vunpack.c.l.bf16 %v3163_v44 }
  0x15   : > { %3344 = vmatpush.bf16.msra.mxu3 %v3103_v3  ;;  %706 = vmatpush.bf16.msra.mxu0 %v3103_v3  ;;  %308 = vst [vmem:[#allocation2 + $0x18] sm:$0x1] %v4461_v1  ;;  %v3118_v46 = vld [vmem:[%s4456_s1 + $0xe0] sm:$0xff]  ;;  %v3165_v3 = vunpack.c.h.bf16 %v3163_v44  ;;  %v3314_v4 = vld [vmem:[%s3435_s25 + $0x48] sm:$0xff]  }
  0x16   : > { %309 = vst [vmem:[#allocation2 + $0x30] sm:$0x1] %v4461_v1  ;;  %v3094_v50 = vld [vmem:[%s4456_s1 + $0x20] sm:$0xff] }
  0x17   : > { %310 = vst [vmem:[#allocation2 + $0x48] sm:$0x1] %v4461_v1 }
  0x18   : > { %3345 = vmatpush.bf16.msra.mxu1 %v3102_v7  ;;  %3346 = vmatpush.bf16.msra.mxu2 %v3102_v7  ;;  %312 = vst [vmem:[#allocation2 + $0x78] sm:$0x1] %v4461_v1 }
  0x19   : > { %3347 = vmatpush.bf16.msra.mxu3 %v3102_v7  ;;  %707 = vmatpush.bf16.msra.mxu0 %v3102_v7  ;;  %313 = vst [vmem:[#allocation2 + $0x90] sm:$0x1] %v4461_v1 }
  0x1a   : > { %314 = vst [vmem:[#allocation2 + $0xa8] sm:$0x1] %v4461_v1  ;;  %v3461_v10 = vld [vmem:[#allocation2 + $0x60] sm:$0xff] }
  0x1b   : > { %315 = vst [vmem:[#allocation2 + $0xc0] sm:$0x1] %v4461_v1  ;;  %v3463_v11 = vld [vmem:[#allocation2 + $0x68] sm:$0xff]  ;;  %v3465_v12 = vld [vmem:[#allocation2 + $0x70] sm:$0x3]  ;;  %v531_v14 = vrot.slane %v3461_v10, 1 }
  0x1c   : > { %3348 = vmatpush.bf16.msra.mxu1 %v3101_v8  ;;  %3349 = vmatpush.bf16.msra.mxu2 %v3101_v8  ;;  %316 = vst [vmem:[#allocation2 + $0xd8] sm:$0x1] %v4461_v1  ;;  %v532_v15 = vrot.slane %v3463_v11, 1  ;;  %v534_v16 = vrot.slane %v3465_v12, 1 }
  0x1d   : > { %3350 = vmatpush.bf16.msra.mxu3 %v3101_v8  ;;  %708 = vmatpush.bf16.msra.mxu0 %v3101_v8  ;;  %317 = vst [vmem:[#allocation2 + $0xf0] sm:$0x1] %v4461_v1  ;;  %v3184_v8 = vunpack.c.l.bf16 %v3310_v60 }
  0x1e   : > { %318 = vst [vmem:[#allocation2 + $0x108] sm:$0x1] %v4461_v1  ;;  %v533_v18 = vsel %vm510_vm0, %v531_v14, %v532_v15  ;;  %v535_v19 = vsel %vm510_vm0, %v532_v15, %v534_v16  ;;  %v3318_v14 = vld [vmem:[%s3435_s25 + $0x68] sm:$0xff]  }
  0x1f   : > { %319 = vst [vmem:[#allocation2 + $0x120] sm:$0x1] %v4461_v1  ;;  %v3488_v20 = vpack.c.bf16 %v535_v19, %v533_v18  ;;  %v3200_v19 = vunpack.c.l.bf16 %v3314_v4  ;;  %v3217_v31 = vunpack.c.h.bf16 %v3318_v14 }
  0x20   : > { %3351 = vmatpush.bf16.msra.mxu1 %v3100_v9  ;;  %3352 = vmatpush.bf16.msra.mxu2 %v3100_v9  ;;  %320 = vst [vmem:[#allocation2 + $0x138] sm:$0x1] %v4461_v1 }
  0x21   : > { %3353 = vmatpush.bf16.msra.mxu3 %v3100_v9  ;;  %709 = vmatpush.bf16.msra.mxu0 %v3100_v9  ;;  %321 = vst [vmem:[#allocation2 + $0x150] sm:$0x1] %v4461_v1 }
  0x22   : > { %322 = vst [vmem:[#allocation2 + $0x168] sm:$0x1] %v4461_v1 }
  0x23   : > { %323 = vst [vmem:[#allocation2 + $0x180] sm:$0x1] %v4461_v1 }
  0x24   : > { %3354 = vmatpush.bf16.msra.mxu1 %v3099_v13  ;;  %3355 = vmatpush.bf16.msra.mxu2 %v3099_v13  ;;  %326 = vst [vmem:[#allocation2 + $0x29] sm:$0x1] %v4461_v1 }
  0x25   : > { %3356 = vmatpush.bf16.msra.mxu3 %v3099_v13  ;;  %710 = vmatpush.bf16.msra.mxu0 %v3099_v13  ;;  %327 = vst [vmem:[#allocation2 + $0x41] sm:$0x1] %v4461_v1  ;;  %v3185_v13 = vunpack.c.h.bf16 %v3310_v60 }
  0x26   : > { %328 = vst [vmem:[#allocation2 + $0x59] sm:$0x1] %v4461_v1 }
  0x27   : > { %330 = vst [vmem:[#allocation2 + $0x89] sm:$0x1] %v4461_v1 }
  0x28   : > { %3357 = vmatpush.bf16.msra.mxu1 %v3098_v17  ;;  %3358 = vmatpush.bf16.msra.mxu2 %v3098_v17  ;;  %331 = vst [vmem:[#allocation2 + $0xa1] sm:$0x1] %v4461_v1 }
  0x29   : > { %3359 = vmatpush.bf16.msra.mxu3 %v3098_v17  ;;  %711 = vmatpush.bf16.msra.mxu0 %v3098_v17  ;;  %332 = vst [vmem:[#allocation2 + $0xb9] sm:$0x1] %v4461_v1 }
  0x2a   : > { %333 = vst [vmem:[#allocation2 + $0xd1] sm:$0x1] %v4461_v1 }
  0x2b   : > { %732 = vmatmul.bf16.vlgmr.msra.gmra.mxu1 %v3488_v20  ;;  %334 = vst [vmem:[#allocation2 + $0xe9] sm:$0x1] %v4461_v1 }
  0x2c   : > { %1124 = vmatpush.bf16.msrb.mxu2 %v3113_v21  ;;  %335 = vst [vmem:[#allocation2 + $0x101] sm:$0x1] %v4461_v1  ;;  %841 = vmatpush.bf16.msrb.mxu1 %v3097_v23 }
  0x2d   : > { %1311 = vmatpush.bf16.msrb.mxu3 %v3121_v22  ;;  %1508 = vmatpush.bf16.msrb.mxu0 %v3129_v24  ;;  %336 = vst [vmem:[#allocation2 + $0x119] sm:$0x1] %v4461_v1 }
  0x2e   : > { %337 = vst [vmem:[#allocation2 + $0x131] sm:$0x1] %v4461_v1 }
  0x2f   : > { %338 = vst [vmem:[#allocation2 + $0x149] sm:$0x1] %v4461_v1 }
  0x30   : > { %1125 = vmatpush.bf16.msrb.mxu2 %v3112_v25  ;;  %339 = vst [vmem:[#allocation2 + $0x161] sm:$0x1] %v4461_v1  ;;  %842 = vmatpush.bf16.msrb.mxu1 %v3096_v28  ;;  %v3201_v25 = vunpack.c.h.bf16 %v3314_v4 }
  0x31   : > { %1312 = vmatpush.bf16.msrb.mxu3 %v3120_v26  ;;  %340 = vst [vmem:[#allocation2 + $0x179] sm:$0x1] %v4461_v1  ;;  %1509 = vmatpush.bf16.msrb.mxu0 %v3128_v39  ;;  %v3306_v26 = vld [vmem:[%s3435_s25 + $0x8] sm:$0xff]  }
  0x32   : > { %341 = vst [vmem:[#allocation2 + $0x191] sm:$0x1] %v4461_v1  ;;  %v3168_v41 = vunpack.c.l.bf16 %v3306_v26 }
  0x33   : > { %358 = vst [vmem:[#allocation2 + $0xc1] sm:$0xff] %v3192_v29 }
  0x34   : > { %359 = vst [vmem:[#allocation2 + $0xc9] sm:$0xff] %v3193_v30  ;;  %1126 = vmatpush.bf16.msrb.mxu2 %v3111_v37  ;;  %843 = vmatpush.bf16.msrb.mxu1 %v3095_v42  ;;  %v3216_v30 = vunpack.c.l.bf16 %v3318_v14  ;;  %v3169_v42 = vunpack.c.h.bf16 %v3306_v26 }
  0x35   : > { %307 = vst [vmem:[#allocation2] sm:$0x1] %v4461_v1  ;;  %1313 = vmatpush.bf16.msrb.mxu3 %v3119_v38  ;;  %1510 = vmatpush.bf16.msrb.mxu0 %v3127_v49 }
  0x36   : > { %324 = vst [vmem:[#allocation2 + $0x198] sm:$0x1] %v4461_v1 }
  0x37   : > { %325 = vst [vmem:[#allocation2 + $0x11] sm:$0x1] %v4461_v1 }
  0x38   : > { %342 = vst [vmem:[#allocation2 + $0x1a9] sm:$0x1] %v4461_v1  ;;  %1127 = vmatpush.bf16.msrb.mxu2 %v3110_v45  ;;  %844 = vmatpush.bf16.msrb.mxu1 %v3094_v50 }
  0x39   : > { %366 = vst [vmem:[#allocation2 + $0x121] sm:$0xff] %v3208_v33  ;;  %1314 = vmatpush.bf16.msrb.mxu3 %v3118_v46 }
  0x3a   : > { %v3552_v47 = vld [vmem:[#allocation2 + $0xc0] sm:$0xff]  ;;  %367 = vst [vmem:[#allocation2 + $0x129] sm:$0xff] %v3209_v34 }
  0x3b   : > { %v3560_v51 = vld [vmem:[#allocation2 + $0xc8] sm:$0xff]  ;;  %v3562_v52 = vld [vmem:[#allocation2 + $0xd0] sm:$0x3]  ;;  %v551_v53 = vrot.slane %v3552_v47, 1  ;;  %352 = vst [vmem:[#allocation2 + $0x79] sm:$0xff] %v3180_v36 }
  0x3c   : > { %v552_v56 = vrot.slane %v3560_v51, 1  ;;  %v554_v57 = vrot.slane %v3562_v52, 1  ;;  %v3568_v58 = vld [vmem:[#allocation2] sm:$0xff]  ;;  %353 = vst [vmem:[#allocation2 + $0x81] sm:$0xff] %v3181_v40 }
  0x3d   : > { %v511_v61 = vrot.slane %v3568_v58, 1  ;;  %360 = vst [vmem:[#allocation2 + $0xd9] sm:$0xff] %v3196_v43 }
  0x3e   : > { %v553_v63 = vsel %vm510_vm0, %v551_v53, %v552_v56  ;;  %v555_v0 = vsel %vm510_vm0, %v552_v56, %v554_v57  ;;  %v3574_v2 = vld [vmem:[#allocation2 + $0x10] sm:$0x3]  ;;  %361 = vst [vmem:[#allocation2 + $0xe1] sm:$0xff] %v3197_v48  ;;  %v3117_v56 = vld [vmem:[%s4456_s1 + $0xd8] sm:$0xff]  ;;  %v3126_v57 = vld [vmem:[%s4456_s1 + $0x120] sm:$0xff] }
  0x3f   : > { %v3577_v5 = vpack.c.bf16 %v555_v0, %v553_v63  ;;  %v513_v6 = vsel %vm510_vm0, %v511_v61, %v512_v54  ;;  %v514_v7 = vrot.slane %v3574_v2, 1  ;;  %368 = vst [vmem:[#allocation2 + $0x139] sm:$0xff] %v3212_v55  ;;  %v3093_v0 = vld [vmem:[%s4456_s1 + $0x18] sm:$0xff]  ;;  %1315 = vmatpush.bf16.msrb.mxu3 %v3117_v56  ;;  %1511 = vmatpush.bf16.msrb.mxu0 %v3126_v57 }
  0x40   : > { %v3581_v9 = vld [vmem:[#allocation2 + $0x120] sm:$0xff]  ;;  %369 = vst [vmem:[#allocation2 + $0x141] sm:$0xff] %v3213_v59  ;;  %845 = vmatpush.bf16.msrb.mxu1 %v3093_v0 }
  0x41   : > { %4501 = vst [vmem:[#allocation3_spill] sm:$0xff] %v3577_v5  ;;  %752 = vmatmul.bf16.vlgmr.msra.gmra.mxu2 %v3577_v5  ;;  %v3585_v15 = vld [vmem:[#allocation2 + $0x128] sm:$0xff]  ;;  %v3587_v16 = vld [vmem:[#allocation2 + $0x130] sm:$0x3]  ;;  %v571_v17 = vrot.slane %v3581_v9, 1  ;;  %v515_v18 = vsel %vm510_vm0, %v512_v54, %v514_v7  ;;  %v3109_v54 = vld [vmem:[%s4456_s1 + $0x98] sm:$0xff] }
  0x42   : > { %4502 = vst [vmem:[#allocation4_spill] sm:$0xff] %v3581_v9  ;;  %v572_v21 = vrot.slane %v3585_v15, 1  ;;  %v574_v22 = vrot.slane %v3587_v16, 1  ;;  %v623_v23 = vpack.c.bf16 %v515_v18, %v513_v6  ;;  %v3593_v24 = vld [vmem:[#allocation2 + $0x78] sm:$0xff]  ;;  %1128 = vmatpush.bf16.msrb.mxu2 %v3109_v54  ;;  %v3108_v7 = vld [vmem:[%s4456_s1 + $0x90] sm:$0xff] }
  0x43   : > { %4503 = vst [vmem:[#allocation5_spill] sm:$0xff] %v3585_v15  ;;  %v3596_v27 = vld [vmem:[#allocation2 + $0x80] sm:$0xff]  ;;  %v3598_v28 = vld [vmem:[#allocation2 + $0x88] sm:$0x3]  ;;  %v536_v29 = vrot.slane %v3593_v24, 1 }
  0x44   : > { %4504 = vst [vmem:[#allocation6_spill] sm:$0xff] %v3587_v16  ;;  %v573_v32 = vsel %vm510_vm0, %v571_v17, %v572_v21  ;;  %v575_v33 = vsel %vm510_vm0, %v572_v21, %v574_v22  ;;  %712 = vmatmul.bf16.vlgmr.msra.gmra.mxu0 %v623_v23  ;;  %v537_v34 = vrot.slane %v3596_v27, 1  ;;  %v539_v35 = vrot.slane %v3598_v28, 1  ;;  %v3605_v36 = vld [vmem:[#allocation2 + $0xd8] sm:$0xff]  ;;  %v3092_v23 = vld [vmem:[%s4456_s1 + $0x10] sm:$0xff] }
  0x45   : > { %344 = vst [vmem:[#allocation2 + $0x19] sm:$0xff] %v3164_v62  ;;  %v3607_v37 = vpack.c.bf16 %v575_v33, %v573_v32  ;;  %v3609_v38 = vld [vmem:[#allocation2 + $0xe0] sm:$0xff]  ;;  %v3611_v39 = vld [vmem:[#allocation2 + $0xe8] sm:$0x3]  ;;  %v556_v40 = vrot.slane %v3605_v36, 1  ;;  %v3125_v17 = vld [vmem:[%s4456_s1 + $0x118] sm:$0xff]  ;;  %846 = vmatpush.bf16.msrb.mxu1 %v3092_v23 }
  0x46   : > { %345 = vst [vmem:[#allocation2 + $0x21] sm:$0xff] %v3165_v3  ;;  %v538_v43 = vsel %vm510_vm0, %v536_v29, %v537_v34  ;;  %v540_v44 = vsel %vm510_vm0, %v537_v34, %v539_v35  ;;  %v557_v45 = vrot.slane %v3609_v38, 1  ;;  %v559_v46 = vrot.slane %v3611_v39, 1  ;;  %v3621_v49 = vld [vmem:[#allocation2 + $0x138] sm:$0xff]  ;;  %1129 = vmatpush.bf16.msrb.mxu2 %v3108_v7  ;;  %v3315_v32 = vld [vmem:[%s3435_s25 + $0x50] sm:$0xff]   ;;  %1512 = vmatpush.bf16.msrb.mxu0 %v3125_v17 }
  0x47   : > { %354 = vst [vmem:[#allocation2 + $0x91] sm:$0xff] %v3184_v8  ;;  %772 = vmatmul.bf16.vlgmr.msra.gmra.mxu3 %v3607_v37  ;;  %v3619_v48 = vpack.c.bf16 %v540_v44, %v538_v43  ;;  %v3623_v50 = vld [vmem:[#allocation2 + $0x140] sm:$0xff]  ;;  %v3625_v53 = vld [vmem:[#allocation2 + $0x148] sm:$0x3]  ;;  %v3116_v8 = vld [vmem:[%s4456_s1 + $0xd0] sm:$0xff] }
  0x48   : > { %355 = vst [vmem:[#allocation2 + $0x99] sm:$0xff] %v3185_v13  ;;  %v558_v59 = vsel %vm510_vm0, %v556_v40, %v557_v45  ;;  %v560_v60 = vsel %vm510_vm0, %v557_v45, %v559_v46  ;;  %v577_v21 = vrot.slane %v3623_v50, 1  ;;  %v579_v22 = vrot.slane %v3625_v53, 1  ;;  %1316 = vmatpush.bf16.msrb.mxu3 %v3116_v8  ;;  %v3319_v40 = vld [vmem:[%s3435_s25 + $0x70] sm:$0xff]  }
  0x49   : > { %4505 = vst [vmem:[#allocation7_spill] sm:$0xff] %v3607_v37  ;;  %737 = vmatmul.bf16.gmra.mxu1 %v3619_v48  ;;  %v3666_v18 = vpack.c.bf16 %v560_v60, %v558_v59  ;;  %v3307_v46 = vld [vmem:[%s3435_s25 + $0x10] sm:$0xff]   ;;  %v3220_v54 = vunpack.c.l.bf16 %v3319_v40  ;;  %v3221_v56 = vunpack.c.h.bf16 %v3319_v40 }
  0x4a   : > { %362 = vst [vmem:[#allocation2 + $0xf1] sm:$0xff] %v3200_v19  ;;  %v576_v19 = vrot.slane %v3621_v49, 1  ;;  %v580_v44 = vsel %vm510_vm0, %v577_v21, %v579_v22  ;;  %v3173_v7 = vunpack.c.h.bf16 %v3307_v46 }
  0x4b   : > { %363 = vst [vmem:[#allocation2 + $0xf9] sm:$0xff] %v3201_v25  ;;  %v3311_v25 = vld [vmem:[%s3435_s25 + $0x30] sm:$0xff]  }
  0x4c   : > { %4506 = vst [vmem:[#allocation8_spill] sm:$0xff] %v3619_v48  ;;  %v3630_v55 = vld [vmem:[#allocation2 + $0x18] sm:$0xff]  ;;  %v578_v43 = vsel %vm510_vm0, %v576_v19, %v577_v21 }
  0x4d   : > { %4507 = vst [vmem:[#allocation9_spill] sm:$0xff] %v3621_v49  ;;  %v3641_v61 = vld [vmem:[#allocation2 + $0x20] sm:$0xff]  ;;  %v3643_v62 = vld [vmem:[#allocation2 + $0x28] sm:$0x3]  ;;  %v516_v63 = vrot.slane %v3630_v55, 1  ;;  %v3694_v0 = vpack.c.bf16 %v580_v44, %v578_v43 }
  0x4e   : > { %4508 = vst [vmem:[#allocation10_spill] sm:$0xff] %v3623_v50  ;;  %v517_v3 = vrot.slane %v3641_v61, 1  ;;  %v519_v4 = vrot.slane %v3643_v62, 1  ;;  %v3651_v6 = vld [vmem:[#allocation2 + $0x90] sm:$0xff] }
  0x4f   : > { %4509 = vst [vmem:[#allocation11_spill] sm:$0xff] %v3625_v53  ;;  %v3659_v13 = vld [vmem:[#allocation2 + $0x98] sm:$0xff]  ;;  %v3661_v14 = vld [vmem:[#allocation2 + $0xa0] sm:$0x3]  ;;  %v541_v33 = vrot.slane %v3651_v6, 1 }
  0x50   : > { %370 = vst [vmem:[#allocation2 + $0x151] sm:$0xff] %v3216_v30  ;;  %v518_v26 = vsel %vm510_vm0, %v516_v63, %v517_v3  ;;  %v520_v29 = vsel %vm510_vm0, %v517_v3, %v519_v4  ;;  %v3188_v30 = vunpack.c.l.bf16 %v3311_v25  ;;  %v542_v34 = vrot.slane %v3659_v13, 1 }
  0x51   : > { %371 = vst [vmem:[#allocation2 + $0x159] sm:$0xff] %v3217_v31  ;;  %v3189_v31 = vunpack.c.h.bf16 %v3311_v25  ;;  %v544_v35 = vrot.slane %v3661_v14, 1  ;;  %v3684_v45 = vpack.c.bf16 %v520_v29, %v518_v26  ;;  %757 = vmatmul.bf16.gmra.mxu2 %v3666_v18  ;;  %v3690_v60 = vld [vmem:[#allocation2 + $0xf0] sm:$0xff]  ;;  %v3172_v4 = vunpack.c.l.bf16 %v3307_v46  ;;  %v3107_v29 = vld [vmem:[%s4456_s1 + $0x88] sm:$0xff]  ;;  %v3106_v46 = vld [vmem:[%s4456_s1 + $0x80] sm:$0xff] }
  0x52   : > { %346 = vst [vmem:[#allocation2 + $0x31] sm:$0xff] %v3168_v41  ;;  %v3204_v41 = vunpack.c.l.bf16 %v3315_v32  ;;  %v543_v57 = vsel %vm510_vm0, %v541_v33, %v542_v34  ;;  %v3692_v63 = vld [vmem:[#allocation2 + $0xf8] sm:$0xff]  ;;  %v3696_v3 = vld [vmem:[#allocation2 + $0x100] sm:$0x3]  ;;  %v561_v17 = vrot.slane %v3690_v60, 1  ;;  %1130 = vmatpush.bf16.msrb.mxu2 %v3107_v29 }
  0x53   : > { %347 = vst [vmem:[#allocation2 + $0x39] sm:$0xff] %v3169_v42  ;;  %v3205_v42 = vunpack.c.h.bf16 %v3315_v32  ;;  %v545_v59 = vsel %vm510_vm0, %v542_v34, %v544_v35  ;;  %v562_v19 = vrot.slane %v3692_v63, 1  ;;  %v564_v21 = vrot.slane %v3696_v3, 1  ;;  %v3124_v32 = vld [vmem:[%s4456_s1 + $0x110] sm:$0xff] }
  0x54   : > { %4510 = vst [vmem:[#allocation12_spill] sm:$0xff] %v3666_v18  ;;  %717 = vmatmul.bf16.gmra.mxu0 %v3684_v45  ;;  %v3699_v8 = vpack.c.bf16 %v545_v59, %v543_v57  ;;  %v3123_v59 = vld [vmem:[%s4456_s1 + $0x108] sm:$0xff] }
  0x55   : > { %356 = vst [vmem:[#allocation2 + $0xa9] sm:$0xff] %v3188_v30  ;;  %v565_v43 = vsel %vm510_vm0, %v562_v19, %v564_v21  ;;  %1513 = vmatpush.bf16.msrb.mxu0 %v3124_v32 }
  0x56   : > { %357 = vst [vmem:[#allocation2 + $0xb1] sm:$0xff] %v3189_v31  ;;  %v3115_v31 = vld [vmem:[%s4456_s1 + $0xc8] sm:$0xff]  ;;  %1131 = vmatpush.bf16.msrb.mxu2 %v3106_v46 }
  0x57   : > { %364 = vst [vmem:[#allocation2 + $0x109] sm:$0xff] %v3204_v41  ;;  %777 = vmatmul.bf16.gmra.mxu3 %v3694_v0  ;;  %v3711_v26 = vld [vmem:[#allocation2 + $0x150] sm:$0xff]  ;;  %v3091_v41 = vld [vmem:[%s4456_s1 + $0x8] sm:$0xff] }
  0x58   : > { %365 = vst [vmem:[#allocation2 + $0x111] sm:$0xff] %v3205_v42  ;;  %v3716_v30 = vld [vmem:[#allocation2 + $0x158] sm:$0xff]  ;;  %v3725_v33 = vld [vmem:[#allocation2 + $0x160] sm:$0x3]  ;;  %v563_v42 = vsel %vm510_vm0, %v561_v17, %v562_v19  ;;  %1317 = vmatpush.bf16.msrb.mxu3 %v3115_v31  ;;  %847 = vmatpush.bf16.msrb.mxu1 %v3091_v41 }
  0x59   : > { %4511 = vst [vmem:[#allocation13_spill] sm:$0xff] %v3694_v0  ;;  %v3704_v22 = vld [vmem:[#allocation2 + $0x30] sm:$0xff]  ;;  %742 = vmatmul.bf16.gmra.mxu1 %v3699_v8  ;;  %v584_v17 = vrot.slane %v3725_v33, 1  ;;  %v3090_v19 = vld [vmem:[%s4456_s1] sm:$0xff]  ;;  %v3756_v21 = vpack.c.bf16 %v565_v43, %v563_v42  ;;  %1514 = vmatpush.bf16.msrb.mxu0 %v3123_v59 }
  0x5a   : > { %372 = vst [vmem:[#allocation2 + $0x169] sm:$0xff] %v3220_v54  ;;  %v3706_v23 = vld [vmem:[#allocation2 + $0x38] sm:$0xff]  ;;  %v3708_v25 = vld [vmem:[#allocation2 + $0x40] sm:$0x3]  ;;  %v521_v34 = vrot.slane %v3704_v22, 1 }
  0x5b   : > { %373 = vst [vmem:[#allocation2 + $0x171] sm:$0xff] %v3221_v56  ;;  %v522_v35 = vrot.slane %v3706_v23, 1  ;;  %v524_v40 = vrot.slane %v3708_v25, 1  ;;  %v3114_v54 = vld [vmem:[%s4456_s1 + $0xc0] sm:$0xff] }
  0x5c   : > { %4512 = vst [vmem:[#allocation14_spill] sm:$0xff] %v3699_v8  ;;  %v3735_v44 = vld [vmem:[#allocation2 + $0xa8] sm:$0xff]  ;;  %1318 = vmatpush.bf16.msrb.mxu3 %v3114_v54  ;;  %848 = vmatpush.bf16.msrb.mxu1 %v3090_v19 }
  0x5d   : > { %348 = vst [vmem:[#allocation2 + $0x49] sm:$0xff] %v3172_v4  ;;  %v3743_v56 = vld [vmem:[#allocation2 + $0xb0] sm:$0xff]  ;;  %v3745_v57 = vld [vmem:[#allocation2 + $0xb8] sm:$0x3]  ;;  %v581_v4 = vrot.slane %v3711_v26, 1  ;;  %v523_v29 = vsel %vm510_vm0, %v521_v34, %v522_v35  ;;  %v525_v31 = vsel %vm510_vm0, %v522_v35, %v524_v40  ;;  %v546_v32 = vrot.slane %v3735_v44, 1 }
  0x5e   : > { %349 = vst [vmem:[#allocation2 + $0x51] sm:$0xff] %v3173_v7  ;;  %v582_v7 = vrot.slane %v3716_v30, 1  ;;  %v547_v41 = vrot.slane %v3743_v56, 1  ;;  %v549_v1 = vrot.slane %v3745_v57, 1  ;;  %v3768_v43 = vpack.c.bf16 %v525_v31, %v523_v29  ;;  %v3773_v46 = vld [vmem:[#allocation2 + $0x108] sm:$0xff] }
  0x5f   : > { %4513 = vst [vmem:[#allocation15_spill] sm:$0xff] %v3711_v26  ;;  %v3777_v59 = vld [vmem:[#allocation2 + $0x110] sm:$0xff]  ;;  %v3779_v19 = vld [vmem:[#allocation2 + $0x118] sm:$0x3] }
  0x60   : > { %4514 = vst [vmem:[#allocation16_spill] sm:$0xff] %v3716_v30  ;;  %v583_v42 = vsel %vm510_vm0, %v581_v4, %v582_v7  ;;  %v585_v34 = vsel %vm510_vm0, %v582_v7, %v584_v17  ;;  %v548_v35 = vsel %vm510_vm0, %v546_v32, %v547_v41  ;;  %v550_v40 = vsel %vm510_vm0, %v547_v41, %v549_v1  ;;  %v3145_v32 = vld [vmem:[%s4456_s1 + $0x1b8] sm:$0xff] }
  0x61   : > { %4515 = vst [vmem:[#allocation17_spill] sm:$0xff] %v3725_v33  ;;  %v3122_v33 = vld [vmem:[%s4456_s1 + $0x100] sm:$0xff]  ;;  %762 = vmatmul.bf16.gmra.mxu2 %v3756_v21  ;;  %v3775_v54 = vpack.c.bf16 %v585_v34, %v583_v42  ;;  %v3782_v4 = vpack.c.bf16 %v550_v40, %v548_v35  ;;  %v566_v7 = vrot.slane %v3773_v46, 1  ;;  %v567_v17 = vrot.slane %v3777_v59, 1  ;;  %v3153_v41 = vld [vmem:[%s4456_s1 + $0x1f8] sm:$0xff]  ;;  %v3803_v34 = vld [vmem:[#allocation2 + $0x168] sm:$0xff] }
  0x62   : > { %1515 = vmatpush.bf16.msrb.mxu0 %v3122_v33  ;;  %4517 = vst [vmem:[#allocation19_spill] sm:$0xff] %v3779_v19  ;;  %v569_v29 = vrot.slane %v3779_v19, 1  ;;  %v3137_v42 = vld [vmem:[%s4456_s1 + $0x178] sm:$0xff]  ;;  %v3809_v40 = vld [vmem:[#allocation2 + $0x170] sm:$0xff]  ;;  %1889 = vmatpush.bf16.msra.mxu2 %v3145_v32  ;;  %v586_v49 = vrot.slane %v3803_v34, 1 }
  0x63   : > { %4516 = vst [vmem:[#allocation18_spill] sm:$0xff] %v3775_v54  ;;  %v3161_v35 = vld [vmem:[%s4456_s1 + $0x238] sm:$0xff]  ;;  %v568_v0 = vsel %vm510_vm0, %v566_v7, %v567_v17  ;;  %2086 = vmatpush.bf16.msra.mxu3 %v3153_v41  ;;  %1702 = vmatpush.bf16.msra.mxu1 %v3137_v42  ;;  %v587_v16 = vrot.slane %v3809_v40, 1  ;;  %v430_v41 = vpack.c.bf16 0.0, %v3568_v58  ;;  %v3152_v42 = vld [vmem:[%s4456_s1 + $0x1f0] sm:$0xff] }
  0x64   : > { %722 = vmatmul.bf16.gmra.mxu0 %v3768_v43  ;;  %4518 = vst [vmem:[#allocation20_spill] sm:$0xff] %v3782_v4  ;;  %v3787_v1 = vld [vmem:[#allocation2 + $0x48] sm:$0xff]  ;;  %v570_v50 = vsel %vm510_vm0, %v567_v17, %v569_v29 }
  0x65   : > { %v3789_v31 = vld [vmem:[#allocation2 + $0x50] sm:$0xff]  ;;  %v3791_v33 = vld [vmem:[#allocation2 + $0x58] sm:$0x3]  ;;  %v526_v30 = vrot.slane %v3787_v1, 1  ;;  %v3821_v15 = vpack.c.bf16 %v570_v50, %v568_v0  ;;  %v588_v32 = vsel %vm510_vm0, %v586_v49, %v587_v16  ;;  %v934_v50 = vrot.slane %v3574_v2, 2 }
  0x66   : > { %v527_v26 = vrot.slane %v3789_v31, 1  ;;  %v529_v53 = vrot.slane %v3791_v33, 1  ;;  %2280 = vmatpush.bf16.msra.mxu0 %v3161_v35  ;;  %v931_v0 = vrot.slane %v3568_v58, 2  ;;  %v431_v49 = vpack.c.bf16 %v3641_v61, %v3630_v55  ;;  %v3136_v35 = vld [vmem:[%s4456_s1 + $0x170] sm:$0xff] }
  0x67   : > { %782 = vmatmul.bf16.gmra.mxu3 %v3775_v54  ;;  %v3811_v54 = vld [vmem:[#allocation2 + $0x178] sm:$0x3]  ;;  %4519 = vst [vmem:[#allocation21_spill] sm:$0xff] %v3821_v15  ;;  %v936_v2 = vrot.slane %v3630_v55, 2  ;;  %v937_v58 = vrot.slane %v3641_v61, 2  ;;  %v3160_v55 = vld [vmem:[%s4456_s1 + $0x230] sm:$0xff]  ;;  %1703 = vmatpush.bf16.msra.mxu1 %v3136_v35 }
  0x68   : > { %v589_v37 = vrot.slane %v3811_v54, 1  ;;  %v528_v9 = vsel %vm510_vm0, %v526_v30, %v527_v26  ;;  %v530_v19 = vsel %vm510_vm0, %v527_v26, %v529_v53  ;;  %v4521_v30 = vmov 0.0   ;;  %2087 = vmatpush.bf16.msra.mxu3 %v3152_v42 }
  0x69   : > { %747 = vmatmul.bf16.gmra.mxu1 %v3782_v4  ;;  %v3827_v17 = vpack.c.bf16 %v530_v19, %v528_v9  ;;  %v932_v53 = vrot.slane %v4521_v30, 2  ;;  %v939_v26 = vrot.slane %v3643_v62, 2  ;;  %v3144_v19 = vld [vmem:[%s4456_s1 + $0x1b0] sm:$0xff]  ;;  %v938_v61 = vsel %vm930_vm1, %v936_v2, %v937_v58 }
  0x6a   : > { %v590_v7 = vsel %vm510_vm0, %v587_v16, %v589_v37  ;;  %1890 = vmatpush.bf16.msra.mxu2 %v3144_v19  ;;  %2281 = vmatpush.bf16.msra.mxu0 %v3160_v55  ;;  %v951_v19 = vrot.slane %v3461_v10, 2  ;;  %v952_v42 = vrot.slane %v3463_v11, 2  ;;  %v954_v35 = vrot.slane %v3465_v12, 2 }
  0x6b   : > { %v3830_v29 = vpack.c.bf16 %v590_v7, %v588_v32  ;;  %v933_v9 = vsel %vm930_vm1, %v931_v0, %v932_v53  ;;  %v935_v16 = vsel %vm930_vm1, %v932_v53, %v934_v50  ;;  %v940_v62 = vsel %vm930_vm1, %v937_v58, %v939_v26 }
  0x6c   : > { %v1043_v37 = vpack.c.bf16 %v935_v16, %v933_v9  ;;  %v3865_v32 = vpack.c.bf16 %v3706_v23, %v3704_v22  ;;  %v941_v7 = vrot.slane %v3704_v22, 2  ;;  %v944_v50 = vrot.slane %v3708_v25, 2  ;;  %v3143_v16 = vld [vmem:[%s4456_s1 + $0x1a8] sm:$0xff] }
  0x6d   : > { %4520 = vst [vmem:[#allocation22_spill] sm:$0xff] %v3830_v29  ;;  %v3880_v9 = vpack.c.bf16 %v3789_v31, %v3787_v1  ;;  %v946_v22 = vrot.slane %v3787_v1, 2  ;;  %v949_v25 = vrot.slane %v3791_v33, 2  ;;  %v3159_v33 = vld [vmem:[%s4456_s1 + $0x228] sm:$0xff]  ;;  %v3909_v26 = vpack.c.bf16 %v3463_v11, %v3461_v10 }
  0x6e   : > { %1891 = vmatpush.bf16.msra.mxu2 %v3143_v16  ;;  %2282 = vmatpush.bf16.msra.mxu0 %v3159_v33  ;;  %v953_v55 = vsel %vm930_vm1, %v951_v19, %v952_v42  ;;  %v3928_v10 = vpack.c.bf16 %v3596_v27, %v3593_v24  ;;  %v3134_v16 = vld [vmem:[%s4456_s1 + $0x160] sm:$0xff] }
  0x71   : > { %767 = vmatmul.bf16.gmra.mxu2 %v3821_v15 }
  0x74   : > { %727 = vmatmul.bf16.gmra.mxu0 %v3827_v17 }
  0x77   : > { %787 = vmatmul.bf16.gmra.mxu3 %v3830_v29 }
  0x79   : > { %849 = vmatmul.bf16.vlgmr.msrb.gmra.mxu1 %v430_v41  ;;  %v942_v41 = vrot.slane %v3706_v23, 2  ;;  %v947_v23 = vrot.slane %v3789_v31, 2  ;;  %v3135_v31 = vld [vmem:[%s4456_s1 + $0x168] sm:$0xff] }
  0x7a   : > { %1704 = vmatpush.bf16.msra.mxu1 %v3135_v31 }
  0x7b   : > { %v943_v0 = vsel %vm930_vm1, %v941_v7, %v942_v41  ;;  %v945_v30 = vsel %vm930_vm1, %v942_v41, %v944_v50  ;;  %v950_v1 = vsel %vm930_vm1, %v947_v23, %v949_v25  ;;  %v956_v50 = vrot.slane %v3593_v24, 2 }
  0x7c   : > { %v3875_v53 = vpack.c.bf16 %v945_v30, %v943_v0  ;;  %v957_v0 = vrot.slane %v3596_v27, 2  ;;  %v959_v30 = vrot.slane %v3598_v28, 2 }
  0x7e   : > { %v958_v27 = vsel %vm930_vm1, %v956_v50, %v957_v0  ;;  %v960_v28 = vsel %vm930_vm1, %v957_v0, %v959_v30  ;;  %1705 = vmatpush.bf16.msra.mxu1 %v3134_v16  ;;  %v962_v50 = vrot.slane %v3659_v13, 2  ;;  %v964_v0 = vrot.slane %v3661_v14, 2 }
  0x81   : > { %1132 = vmatmul.bf16.vlgmr.msrb.gmra.mxu2 %v1043_v37  ;;  %v3151_v37 = vld [vmem:[%s4456_s1 + $0x1e8] sm:$0xff] }
  0x82   : > { %2088 = vmatpush.bf16.msra.mxu3 %v3151_v37  ;;  %v3158_v37 = vld [vmem:[%s4456_s1 + $0x220] sm:$0xff] }
  0x83   : > { %2283 = vmatpush.bf16.msra.mxu0 %v3158_v37  ;;  %v4002_v37 = vpack.c.bf16 %v3743_v56, %v3735_v44 }
  0x84   : > { %1516 = vmatmul.bf16.vlgmr.msrb.gmra.mxu0 %v3684_v45  ;;  %v3860_v45 = vpack.c.bf16 %v940_v62, %v938_v61  ;;  %v955_v61 = vsel %vm930_vm1, %v952_v42, %v954_v35  ;;  %v3971_v42 = vpack.c.bf16 %v3659_v13, %v3651_v6 }
  0x85   : > { %v3921_v7 = vpack.c.bf16 %v955_v61, %v953_v55  ;;  %v961_v61 = vrot.slane %v3651_v6, 2  ;;  %4528 = vst [vmem:[#allocation29_spill] sm:$0xff] %v4002_v37 }
  0x86   : > { %4524 = vst [vmem:[#allocation25_spill] sm:$0xff] %v3971_v42 }
  0x87   : > { %1319 = vmatmul.bf16.vlgmr.msrb.gmra.mxu3 %v431_v49 }
  0x89   : > { %854 = vmatmul.bf16.gmra.mxu1 %v431_v49  ;;  %v948_v49 = vsel %vm930_vm1, %v946_v22, %v947_v23  ;;  %v3142_v22 = vld [vmem:[%s4456_s1 + $0x1a0] sm:$0xff] }
  0x8a   : > { %v3902_v2 = vpack.c.bf16 %v950_v1, %v948_v49  ;;  %v3150_v23 = vld [vmem:[%s4456_s1 + $0x1e0] sm:$0xff]  ;;  %1892 = vmatpush.bf16.msra.mxu2 %v3142_v22  ;;  %v3960_v1 = vpack.c.bf16 %v960_v28, %v958_v27  ;;  %v965_v27 = vsel %vm930_vm1, %v962_v50, %v964_v0  ;;  %v966_v0 = vrot.slane %v3735_v44, 2 }
  0x8b   : > { %2089 = vmatpush.bf16.msra.mxu3 %v3150_v23  ;;  %v963_v23 = vsel %vm930_vm1, %v961_v61, %v962_v50 }
  0x8c   : > { %v3991_v16 = vpack.c.bf16 %v965_v27, %v963_v23  ;;  %v967_v23 = vrot.slane %v3743_v56, 2  ;;  %v969_v27 = vrot.slane %v3745_v57, 2 }
  0x8e   : > { %4526 = vst [vmem:[#allocation27_spill] sm:$0xff] %v3991_v16  ;;  %v968_v56 = vsel %vm930_vm1, %v966_v0, %v967_v23  ;;  %v970_v57 = vsel %vm930_vm1, %v967_v23, %v969_v27  ;;  %v4045_v23 = vpack.c.bf16 %v3560_v51, %v3552_v47 }
  0x90   : > { %4532 = vst [vmem:[#allocation33_spill] sm:$0xff] %v4045_v23 }
  0x91   : > { %1137 = vmatmul.bf16.gmra.mxu2 %v3860_v45 }
  0x94   : > { %1521 = vmatmul.bf16.gmra.mxu0 %v3768_v43 }
  0x97   : > { %1324 = vmatmul.bf16.gmra.mxu3 %v3865_v32 }
  0x99   : > { %859 = vmatmul.bf16.gmra.mxu1 %v3865_v32 }
  0xa1   : > { %1142 = vmatmul.bf16.gmra.mxu2 %v3875_v53 }
  0xa4   : > { %1526 = vmatmul.bf16.gmra.mxu0 %v3827_v17 }
  0xa7   : > { %1329 = vmatmul.bf16.gmra.mxu3 %v3880_v9 }
  0xa8   : > { %v3905_v58 = vpop.f32.mrf.mxu1 }
  0xa9   : > { %864 = vmatmul.bf16.gmra.mxu1 %v3880_v9 }
  0xb0   : > { %v3919_v62 = vpop.f32.mrf.mxu1 }
  0xb1   : > { %1147 = vmatmul.bf16.gmra.mxu2 %v3902_v2 }
  0xb4   : > { %1531 = vmatmul.bf16.gmra.mxu0 %v3488_v20 }
  0xb7   : > { %1334 = vmatmul.bf16.gmra.mxu3 %v3909_v26 }
  0xb9   : > { %869 = vmatmul.bf16.gmra.mxu1 %v3909_v26 }
  0xc1   : > { %v3923_v41 = vpop.f32.mrf.mxu0  ;;  %1152 = vmatmul.bf16.gmra.mxu2 %v3921_v7 }
  0xc4   : > { %1536 = vmatmul.bf16.gmra.mxu0 %v3619_v48  ;;  %v3931_v11 = vpop.f32.mrf.mxu2 }
  0xc6   : > { %v3933_v12 = vpop.f32.mrf.mxu1 }
  0xc7   : > { %1339 = vmatmul.bf16.gmra.mxu3 %v3928_v10 }
  0xc9   : > { %v3945_v25 = vpop.f32.mrf.mxu0  ;;  %874 = vmatmul.bf16.gmra.mxu1 %v3928_v10 }
  0xca   : > { %v3948_v24 = vpop.f32.mrf.mxu3 }
  0xcb   : > { %4522 = vst [vmem:[#allocation23_spill] sm:$0xff] %v3948_v24  ;;  %v4034_v24 = vpack.c.bf16 %v970_v57, %v968_v56  ;;  %v974_v57 = vrot.slane %v3562_v52, 2 }
  0xcc   : > { %v3958_v49 = vpop.f32.mrf.mxu2 }
  0xcd   : > { %4530 = vst [vmem:[#allocation31_spill] sm:$0xff] %v4034_v24 }
  0xce   : > { %v3962_v31 = vpop.f32.mrf.mxu1 }
  0xd1   : > { %v3964_v33 = vpop.f32.mrf.mxu0  ;;  %1157 = vmatmul.bf16.gmra.mxu2 %v3960_v1 }
  0xd2   : > { %v3967_v19 = vpop.f32.mrf.mxu3 }
  0xd3   : > { %4523 = vst [vmem:[#allocation24_spill] sm:$0xff] %v3967_v19  ;;  %v3133_v19 = vld [vmem:[%s4456_s1 + $0x158] sm:$0xff] }
  0xd4   : > { %1541 = vmatmul.bf16.gmra.mxu0 %v3699_v8  ;;  %v3974_v35 = vpop.f32.mrf.mxu2  ;;  %v3157_v8 = vld [vmem:[%s4456_s1 + $0x218] sm:$0xff]  ;;  %1706 = vmatpush.bf16.msra.mxu1 %v3133_v19  ;;  %v971_v19 = vrot.slane %v3552_v47, 2 }
  0xd5   : > { %2284 = vmatpush.bf16.msra.mxu0 %v3157_v8  ;;  %v972_v8 = vrot.slane %v3560_v51, 2 }
  0xd6   : > { %v3976_v55 = vpop.f32.mrf.mxu1 }
  0xd7   : > { %1344 = vmatmul.bf16.gmra.mxu3 %v3971_v42 }
  0xd9   : > { %v3982_v30 = vpop.f32.mrf.mxu0  ;;  %879 = vmatmul.bf16.gmra.mxu1 %v3971_v42 }
  0xda   : > { %v3985_v22 = vpop.f32.mrf.mxu3 }
  0xdb   : > { %4525 = vst [vmem:[#allocation26_spill] sm:$0xff] %v3985_v22 }
  0xdc   : > { %v3989_v28 = vpop.f32.mrf.mxu2 }
  0xde   : > { %v3993_v6 = vpop.f32.mrf.mxu1 }
  0xe1   : > { %v3995_v13 = vpop.f32.mrf.mxu0  ;;  %1162 = vmatmul.bf16.gmra.mxu2 %v3991_v16 }
  0xe2   : > { %v3998_v14 = vpop.f32.mrf.mxu3 }
  0xe3   : > { %4527 = vst [vmem:[#allocation28_spill] sm:$0xff] %v3998_v14  ;;  %v3141_v14 = vld [vmem:[%s4456_s1 + $0x198] sm:$0xff] }
  0xe4   : > { %1546 = vmatmul.bf16.gmra.mxu0 %v3782_v4  ;;  %v4005_v61 = vpop.f32.mrf.mxu2  ;;  %v3149_v4 = vld [vmem:[%s4456_s1 + $0x1d8] sm:$0xff]  ;;  %1893 = vmatpush.bf16.msra.mxu2 %v3141_v14 }
  0xe5   : > { %2090 = vmatpush.bf16.msra.mxu3 %v3149_v4 }
  0xe6   : > { %v4007_v50 = vpop.f32.mrf.mxu1 }
  0xe7   : > { %1349 = vmatmul.bf16.gmra.mxu3 %v4002_v37 }
  0xe9   : > { %v4019_v22 = vpop.f32.mrf.mxu0  ;;  %884 = vmatmul.bf16.gmra.mxu1 %v4002_v37  ;;  %v975_v37 = vsel %vm930_vm1, %v972_v8, %v974_v57 }
  0xea   : > { %v4022_v44 = vpop.f32.mrf.mxu3 }
  0xeb   : > { %4529 = vst [vmem:[#allocation30_spill] sm:$0xff] %v4022_v44 }
  0xec   : > { %v4032_v16 = vpop.f32.mrf.mxu2 }
  0xee   : > { %v4036_v14 = vpop.f32.mrf.mxu1 }
  0xf1   : > { %v4038_v0 = vpop.f32.mrf.mxu0  ;;  %1167 = vmatmul.bf16.gmra.mxu2 %v4034_v24 }
  0xf2   : > { %v4041_v4 = vpop.f32.mrf.mxu3 }
  0xf3   : > { %4531 = vst [vmem:[#allocation32_spill] sm:$0xff] %v4041_v4 }
  0xf4   : > { %1551 = vmatmul.bf16.gmra.mxu0 %v3577_v5  ;;  %v4048_v27 = vpop.f32.mrf.mxu2  ;;  %v973_v5 = vsel %vm930_vm1, %v971_v19, %v972_v8 }
  0xf5   : > { %v4064_v47 = vpack.c.bf16 %v975_v37, %v973_v5  ;;  %v976_v5 = vrot.slane %v3605_v36, 2  ;;  %v977_v37 = vrot.slane %v3609_v38, 2 }
  0xf6   : > { %v850_v56 = vpop.f32.mrf.mxu1 }
  0xf7   : > { %1354 = vmatmul.bf16.gmra.mxu3 %v4045_v23  ;;  %v851_v44 = vadd.f32 %v850_v56, %v3923_v41  ;;  %4534 = vst [vmem:[#allocation35_spill] sm:$0xff] %v4064_v47  ;;  %v4072_v56 = vpack.c.bf16 %v3609_v38, %v3605_v36  ;;  %v978_v38 = vsel %vm930_vm1, %v976_v5, %v977_v37 }
  0xf9   : > { %v4055_v4 = vpop.f32.mrf.mxu0  ;;  %889 = vmatmul.bf16.gmra.mxu1 %v4045_v23 }
  0xfa   : > { %v4058_v24 = vpop.f32.mrf.mxu3 }
  0xfb   : > { %4533 = vst [vmem:[#allocation34_spill] sm:$0xff] %v4058_v24 }
  0xfc   : > { %v4062_v42 = vpop.f32.mrf.mxu2 }
  0xfe   : > { %v852_v51 = vpop.f32.mrf.mxu1 }
  0xff   : > { %v853_v52 = vadd.f32 %v852_v51, %v3945_v25  ;;  %v979_v25 = vrot.slane %v3611_v39, 2 }
 0x101   : > { %v1517_v48 = vpop.f32.mrf.mxu0  ;;  %1172 = vmatmul.bf16.gmra.mxu2 %v4064_v47  ;;  %v980_v39 = vsel %vm930_vm1, %v977_v37, %v979_v25 }
 0x102   : > { %v4068_v41 = vpop.f32.mrf.mxu3  ;;  %v4095_v23 = vpack.c.bf16 %v980_v39, %v978_v38  ;;  %v981_v39 = vrot.slane %v3690_v60, 2 }
 0x103   : > { %4535 = vst [vmem:[#allocation36_spill] sm:$0xff] %v4068_v41  ;;  %v3140_v41 = vld [vmem:[%s4456_s1 + $0x190] sm:$0xff] }
 0x104   : > { %1556 = vmatmul.bf16.gmra.mxu0 %v3666_v18  ;;  %v1133_v19 = vpop.f32.mrf.mxu2  ;;  %v3148_v18 = vld [vmem:[%s4456_s1 + $0x1d0] sm:$0xff]  ;;  %1894 = vmatpush.bf16.msra.mxu2 %v3140_v41 }
 0x105   : > { %v1213_v8 = vadd.f32 %v1133_v19, %v851_v44  ;;  %2091 = vmatpush.bf16.msra.mxu3 %v3148_v18 }
 0x106   : > { %v855_v57 = vpop.f32.mrf.mxu1 }
 0x107   : > { %1359 = vmatmul.bf16.gmra.mxu3 %v4072_v56  ;;  %v856_v51 = vadd.f32 %v855_v57, %v3964_v33  ;;  %v3132_v33 = vld [vmem:[%s4456_s1 + $0x150] sm:$0xff] }
 0x108   : > { %v3156_v57 = vld [vmem:[%s4456_s1 + $0x210] sm:$0xff]  ;;  %1707 = vmatpush.bf16.msra.mxu1 %v3132_v33 }
 0x109   : > { %v1519_v44 = vpop.f32.mrf.mxu0  ;;  %894 = vmatmul.bf16.gmra.mxu1 %v4072_v56  ;;  %2285 = vmatpush.bf16.msra.mxu0 %v3156_v57 }
 0x10a   : > { %v1320_v36 = vpop.f32.mrf.mxu3 }
 0x10b   : > { %v1400_v19 = vadd.f32 %v1320_v36, %v1213_v8  ;;  %v4103_v36 = vpack.c.bf16 %v3692_v63, %v3690_v60 }
 0x10c   : > { %v1135_v24 = vpop.f32.mrf.mxu2 }
 0x10d   : > { %v1214_v47 = vadd.f32 %v1135_v24, %v853_v52  ;;  %v4097_v41 = vadd.f32 %v1517_v48, %v1400_v19  ;;  %v984_v19 = vrot.slane %v3696_v3, 2 }
 0x10e   : > { %v857_v5 = vpop.f32.mrf.mxu1 }
 0x10f   : > { %v858_v18 = vadd.f32 %v857_v5, %v3982_v30  ;;  %v982_v30 = vrot.slane %v3692_v63, 2 }
 0x111   : > { %v1522_v8 = vpop.f32.mrf.mxu0  ;;  %1177 = vmatmul.bf16.gmra.mxu2 %v4095_v23  ;;  %v983_v5 = vsel %vm930_vm1, %v981_v39, %v982_v30  ;;  %v4124_v39 = vpack.c.bf16 %v3777_v59, %v3773_v46 }
 0x112   : > { %v1322_v37 = vpop.f32.mrf.mxu3 }
 0x113   : > { %v1401_v25 = vadd.f32 %v1322_v37, %v1214_v47 }
 0x114   : > { %1561 = vmatmul.bf16.gmra.mxu0 %v3756_v21  ;;  %v1138_v24 = vpop.f32.mrf.mxu2 }
 0x115   : > { %v1215_v52 = vadd.f32 %v1138_v24, %v856_v51  ;;  %v4106_v38 = vadd.f32 %v1519_v44, %v1401_v25  ;;  %v985_v51 = vsel %vm930_vm1, %v982_v30, %v984_v19  ;;  %v986_v19 = vrot.slane %v3773_v46, 2 }
 0x116   : > { %v860_v48 = vpop.f32.mrf.mxu1  ;;  %v4116_v60 = vpack.c.bf16 %v985_v51, %v983_v5 }
 0x117   : > { %4536 = vst [vmem:[#allocation37_spill] sm:$0xff] %v4106_v38  ;;  %1364 = vmatmul.bf16.gmra.mxu3 %v4103_v36  ;;  %v861_v47 = vadd.f32 %v860_v48, %v3995_v13 }
 0x119   : > { %v1524_v33 = vpop.f32.mrf.mxu0  ;;  %899 = vmatmul.bf16.gmra.mxu1 %v4103_v36 }
 0x11a   : > { %v1325_v57 = vpop.f32.mrf.mxu3 }
 0x11b   : > { %v1402_v44 = vadd.f32 %v1325_v57, %v1215_v52  ;;  %v4538_v57 = vld [vmem:[#allocation19_spill] sm:$0xff] }
 0x11c   : > { %v1140_v37 = vpop.f32.mrf.mxu2  ;;  %v989_v5 = vrot.slane %v4538_v57, 2 }
 0x11d   : > { %v1216_v25 = vadd.f32 %v1140_v37, %v858_v18  ;;  %v4118_v63 = vadd.f32 %v1522_v8, %v1402_v44  ;;  %v3139_v44 = vld [vmem:[%s4456_s1 + $0x188] sm:$0xff] }
 0x11e   : > { %v862_v3 = vpop.f32.mrf.mxu1  ;;  %1895 = vmatpush.bf16.msra.mxu2 %v3139_v44  ;;  %v4540_v44 = vld [vmem:[#allocation4_spill] sm:$0xff] }
 0x11f   : > { %v863_v24 = vadd.f32 %v862_v3, %v4019_v22  ;;  %v987_v22 = vrot.slane %v3777_v59, 2  ;;  %v3155_v3 = vld [vmem:[%s4456_s1 + $0x208] sm:$0xff] }
 0x120   : > { %2286 = vmatpush.bf16.msra.mxu0 %v3155_v3 }
 0x121   : > { %v1527_v38 = vpop.f32.mrf.mxu0  ;;  %1182 = vmatmul.bf16.gmra.mxu2 %v4116_v60  ;;  %v988_v59 = vsel %vm930_vm1, %v986_v19, %v987_v22  ;;  %v990_v37 = vsel %vm930_vm1, %v987_v22, %v989_v5 }
 0x122   : > { %v1327_v13 = vpop.f32.mrf.mxu3 }
 0x123   : > { %v1403_v48 = vadd.f32 %v1327_v13, %v1216_v25 }
 0x124   : > { %1566 = vmatmul.bf16.gmra.mxu0 %v3821_v15  ;;  %v1143_v52 = vpop.f32.mrf.mxu2  ;;  %v4548_v15 = vld [vmem:[#allocation10_spill] sm:$0xff] }
 0x125   : > { %v1217_v18 = vadd.f32 %v1143_v52, %v861_v47  ;;  %v4127_v30 = vadd.f32 %v1524_v33, %v1403_v48  ;;  %v3147_v47 = vld [vmem:[%s4456_s1 + $0x1c8] sm:$0xff]  ;;  %v4149_v52 = vpack.c.bf16 %v990_v37, %v988_v59 }
 0x126   : > { %v865_v8 = vpop.f32.mrf.mxu1  ;;  %2092 = vmatpush.bf16.msra.mxu3 %v3147_v47  ;;  %v4541_v47 = vld [vmem:[#allocation5_spill] sm:$0xff] }
 0x127   : > { %4537 = vst [vmem:[#allocation38_spill] sm:$0xff] %v4127_v30  ;;  %1369 = vmatmul.bf16.gmra.mxu3 %v4124_v39  ;;  %v866_v51 = vadd.f32 %v865_v8, %v4038_v0  ;;  %v3131_v0 = vld [vmem:[%s4456_s1 + $0x148] sm:$0xff]  ;;  %v4543_v30 = vld [vmem:[#allocation7_spill] sm:$0xff] }
 0x128   : > { %1708 = vmatpush.bf16.msra.mxu1 %v3131_v0  ;;  %v4545_v0 = vld [vmem:[#allocation6_spill] sm:$0xff] }
 0x129   : > { %v1529_v33 = vpop.f32.mrf.mxu0  ;;  %904 = vmatmul.bf16.gmra.mxu1 %v4124_v39  ;;  %v994_v3 = vrot.slane %v4545_v0, 2 }
 0x12a   : > { %v1330_v46 = vpop.f32.mrf.mxu3 }
 0x12b   : > { %v1404_v25 = vadd.f32 %v1330_v46, %v1217_v18  ;;  %v4157_v46 = vpack.c.bf16 %v4541_v47, %v4540_v44 }
 0x12c   : > { %v1145_v13 = vpop.f32.mrf.mxu2 }
 0x12d   : > { %v1218_v48 = vadd.f32 %v1145_v13, %v863_v24  ;;  %v4151_v8 = vadd.f32 %v1527_v38, %v1404_v25  ;;  %4542 = vst [vmem:[#allocation4_spill] sm:$0xff] %v4157_v46  ;;  %v991_v25 = vrot.slane %v4540_v44, 2 }
 0x12e   : > { %v867_v19 = vpop.f32.mrf.mxu1 }
 0x12f   : > { %4539 = vst [vmem:[#allocation19_spill] sm:$0xff] %v4151_v8  ;;  %v868_v22 = vadd.f32 %v867_v19, %v4055_v4  ;;  %v992_v4 = vrot.slane %v4541_v47, 2 }
 0x131   : > { %v1532_v18 = vpop.f32.mrf.mxu0  ;;  %1187 = vmatmul.bf16.gmra.mxu2 %v4149_v52  ;;  %v993_v19 = vsel %vm930_vm1, %v991_v25, %v992_v4 }
 0x132   : > { %v1332_v57 = vpop.f32.mrf.mxu3 }
 0x133   : > { %v1405_v5 = vadd.f32 %v1332_v57, %v1218_v48  ;;  %v995_v57 = vsel %vm930_vm1, %v992_v4, %v994_v3 }
 0x134   : > { %1571 = vmatmul.bf16.gmra.mxu0 %v4543_v30  ;;  %v1148_v24 = vpop.f32.mrf.mxu2 }
 0x135   : > { %v1219_v59 = vadd.f32 %v1148_v24, %v866_v51  ;;  %v4160_v37 = vadd.f32 %v1529_v33, %v1405_v5  ;;  %v4169_v24 = vpack.c.bf16 %v995_v57, %v993_v19  ;;  %v997_v19 = vrot.slane %v4548_v15, 2  ;;  %v4551_v57 = vld [vmem:[#allocation11_spill] sm:$0xff] }
 0x136   : > { %v870_v38 = vpop.f32.mrf.mxu1 }
 0x137   : > { %4544 = vst [vmem:[#allocation5_spill] sm:$0xff] %v4160_v37  ;;  %1374 = vmatmul.bf16.gmra.mxu3 %v4157_v46  ;;  %v871_v8 = vadd.f32 %v870_v38, %v3905_v58  ;;  %v3138_v58 = vld [vmem:[%s4456_s1 + $0x180] sm:$0xff] }
 0x138   : > { %v3146_v38 = vld [vmem:[%s4456_s1 + $0x1c0] sm:$0xff]  ;;  %1896 = vmatpush.bf16.msra.mxu2 %v3138_v58 }
 0x139   : > { %v1534_v13 = vpop.f32.mrf.mxu0  ;;  %909 = vmatmul.bf16.gmra.mxu1 %v4157_v46  ;;  %v4547_v46 = vld [vmem:[#allocation9_spill] sm:$0xff]  ;;  %2093 = vmatpush.bf16.msra.mxu3 %v3146_v38 }
 0x13a   : > { %v1335_v48 = vpop.f32.mrf.mxu3  ;;  %v4177_v25 = vpack.c.bf16 %v4548_v15, %v4547_v46  ;;  %v3154_v58 = vld [vmem:[%s4456_s1 + $0x200] sm:$0xff] }
 0x13b   : > { %v1406_v51 = vadd.f32 %v1335_v48, %v1219_v59  ;;  %v4549_v59 = vld [vmem:[#allocation13_spill] sm:$0xff]  ;;  %v996_v48 = vrot.slane %v4547_v46, 2  ;;  %2287 = vmatpush.bf16.msra.mxu0 %v3154_v58 }
 0x13c   : > { %v1150_v33 = vpop.f32.mrf.mxu2 }
 0x13d   : > { %v1220_v5 = vadd.f32 %v1150_v33, %v868_v22  ;;  %v4171_v44 = vadd.f32 %v1532_v18, %v1406_v51  ;;  %v999_v51 = vrot.slane %v4551_v57, 2  ;;  %v998_v15 = vsel %vm930_vm1, %v996_v48, %v997_v19  ;;  %v3130_v57 = vld [vmem:[%s4456_s1 + $0x140] sm:$0xff] }
 0x13e   : > { %v872_v47 = vpop.f32.mrf.mxu1  ;;  %1709 = vmatpush.bf16.msra.mxu1 %v3130_v57 }
 0x13f   : > { %4546 = vst [vmem:[#allocation6_spill] sm:$0xff] %v4171_v44 }
 0x141   : > { %v1537_v37 = vpop.f32.mrf.mxu0  ;;  %1192 = vmatmul.bf16.gmra.mxu2 %v4169_v24 }
 0x142   : > { %v1337_v0 = vpop.f32.mrf.mxu3 }
 0x143   : > { %v1407_v30 = vadd.f32 %v1337_v0, %v1220_v5 }
 0x144   : > { %1576 = vmatmul.bf16.gmra.mxu0 %v4549_v59  ;;  %v1153_v22 = vpop.f32.mrf.mxu2 }
 0x145   : > { %v1221_v4 = vadd.f32 %v1153_v22, %v871_v8  ;;  %v4180_v3 = vadd.f32 %v1534_v13, %v1407_v30  ;;  %v3320_v30 = vld [vmem:[%s3435_s25 + $0x78] sm:$0xff]   ;;  %v1000_v13 = vsel %vm930_vm1, %v997_v19, %v999_v51  ;;  %v873_v22 = vadd.f32 %v872_v47, %v3919_v62 }
 0x146   : > { %v875_v18 = vpop.f32.mrf.mxu1  ;;  %v3224_v33 = vunpack.c.l.bf16 %v3320_v30  ;;  %v3225_v5 = vunpack.c.h.bf16 %v3320_v30  ;;  %v4203_v48 = vpack.c.bf16 %v1000_v13, %v998_v15  ;;  %v4553_v30 = vld [vmem:[#allocation15_spill] sm:$0xff] }
 0x147   : > { %4550 = vst [vmem:[#allocation9_spill] sm:$0xff] %v4180_v3  ;;  %1379 = vmatmul.bf16.gmra.mxu3 %v4177_v25  ;;  %v876_v38 = vadd.f32 %v875_v18, %v3933_v12 }
 0x148   : > { %374 = vst [vmem:[#allocation2 + $0x181] sm:$0xff] %v3224_v33 }
 0x149   : > { %v1539_v8 = vpop.f32.mrf.mxu0  ;;  %914 = vmatmul.bf16.gmra.mxu1 %v4177_v25  ;;  %375 = vst [vmem:[#allocation2 + $0x189] sm:$0xff] %v3225_v5 }
 0x14a   : > { %v1340_v46 = vpop.f32.mrf.mxu3 }
 0x14b   : > { %v1408_v0 = vadd.f32 %v1340_v46, %v1221_v4  ;;  %v4554_v46 = vld [vmem:[#allocation16_spill] sm:$0xff] }
 0x14c   : > { %v1155_v3 = vpop.f32.mrf.mxu2  ;;  %v4211_v44 = vpack.c.bf16 %v4554_v46, %v4553_v30  ;;  %v1002_v5 = vrot.slane %v4554_v46, 2 }
 0x14d   : > { %v1222_v59 = vadd.f32 %v1155_v3, %v873_v22  ;;  %v4205_v19 = vadd.f32 %v1537_v37, %v1408_v0  ;;  %v4555_v3 = vld [vmem:[#allocation18_spill] sm:$0xff]  ;;  %v1001_v37 = vrot.slane %v4553_v30, 2  ;;  %v4556_v0 = vld [vmem:[#allocation17_spill] sm:$0xff] }
 0x14e   : > { %v877_v4 = vpop.f32.mrf.mxu1  ;;  %v1004_v22 = vrot.slane %v4556_v0, 2 }
 0x14f   : > { %4552 = vst [vmem:[#allocation10_spill] sm:$0xff] %v4205_v19  ;;  %v1003_v18 = vsel %vm930_vm1, %v1001_v37, %v1002_v5  ;;  %v4232_v37 = vpack.c.bf16 %v3809_v40, %v3803_v34 }
 0x150   : > { %v1005_v58 = vsel %vm930_vm1, %v1002_v5, %v1004_v22  ;;  %v1009_v5 = vrot.slane %v3811_v54, 2 }
 0x151   : > { %v1542_v62 = vpop.f32.mrf.mxu0  ;;  %1197 = vmatmul.bf16.gmra.mxu2 %v4203_v48  ;;  %v4224_v46 = vpack.c.bf16 %v1005_v58, %v1003_v18 }
 0x152   : > { %v1342_v47 = vpop.f32.mrf.mxu3 }
 0x153   : > { %v1409_v51 = vadd.f32 %v1342_v47, %v1222_v59 }
 0x154   : > { %1581 = vmatmul.bf16.gmra.mxu0 %v4555_v3  ;;  %v1158_v15 = vpop.f32.mrf.mxu2 }
 0x155   : > { %v1223_v13 = vadd.f32 %v1158_v15, %v876_v38  ;;  %v4217_v57 = vadd.f32 %v1539_v8, %v1409_v51  ;;  %v878_v38 = vadd.f32 %v877_v4, %v3962_v31  ;;  %v1006_v4 = vrot.slane %v3803_v34, 2 }
 0x156   : > { %v880_v33 = vpop.f32.mrf.mxu1 }
 0x157   : > { %4557 = vst [vmem:[#allocation11_spill] sm:$0xff] %v4217_v57  ;;  %1384 = vmatmul.bf16.gmra.mxu3 %v4211_v44  ;;  %v881_v19 = vadd.f32 %v880_v33, %v3976_v55  ;;  %v4242_v55 = vld [vmem:[#allocation2 + $0x188] sm:$0xff]  ;;  %v4244_v33 = vld [vmem:[#allocation2 + $0x190] sm:$0x3] }
 0x159   : > { %v1544_v12 = vpop.f32.mrf.mxu0  ;;  %919 = vmatmul.bf16.gmra.mxu1 %v4211_v44 }
 0x15a   : > { %v1345_v59 = vpop.f32.mrf.mxu3 }
 0x15b   : > { %v1410_v47 = vadd.f32 %v1345_v59, %v1223_v13 }
 0x15c   : > { %v1160_v30 = vpop.f32.mrf.mxu2 }
 0x15d   : > { %v1224_v15 = vadd.f32 %v1160_v30, %v878_v38  ;;  %v4226_v0 = vadd.f32 %v1542_v62, %v1410_v47  ;;  %v1007_v62 = vrot.slane %v3809_v40, 2  ;;  %v1436_v40 = vrot.slane %v4242_v55, 1 }
 0x15e   : > { %v882_v8 = vpop.f32.mrf.mxu1 }
 0x15f   : > { %4558 = vst [vmem:[#allocation15_spill] sm:$0xff] %v4226_v0  ;;  %v1008_v18 = vsel %vm930_vm1, %v1006_v4, %v1007_v62  ;;  %v1010_v34 = vsel %vm930_vm1, %v1007_v62, %v1009_v5  ;;  %v883_v47 = vadd.f32 %v882_v8, %v3993_v6 }
 0x160   : > { %v4254_v30 = vpack.c.bf16 %v1010_v34, %v1008_v18 }
 0x161   : > { %v1547_v51 = vpop.f32.mrf.mxu0  ;;  %1202 = vmatmul.bf16.gmra.mxu2 %v4224_v46 }
 0x162   : > { %v1347_v57 = vpop.f32.mrf.mxu3 }
 0x163   : > { %v1411_v3 = vadd.f32 %v1347_v57, %v1224_v15  ;;  %v4240_v57 = vld [vmem:[#allocation2 + $0x180] sm:$0xff] }
 0x164   : > { %1586 = vmatmul.bf16.gmra.mxu0 %v3830_v29  ;;  %v1163_v31 = vpop.f32.mrf.mxu2  ;;  %v1435_v54 = vrot.slane %v4240_v57, 1  ;;  %v4266_v8 = vpack.c.bf16 %v4242_v55, %v4240_v57 }
 0x165   : > { %v1225_v13 = vadd.f32 %v1163_v31, %v881_v19  ;;  %v4238_v22 = vadd.f32 %v1544_v12, %v1411_v3  ;;  %v1438_v19 = vrot.slane %v4244_v33, 1 }
 0x166   : > { %v885_v59 = vpop.f32.mrf.mxu1  ;;  %v1437_v31 = vsel %vm510_vm0, %v1435_v54, %v1436_v40 }
 0x167   : > { %4559 = vst [vmem:[#allocation16_spill] sm:$0xff] %v4238_v22  ;;  %1389 = vmatmul.bf16.gmra.mxu3 %v4232_v37  ;;  %v1439_v4 = vsel %vm510_vm0, %v1436_v40, %v1438_v19  ;;  %v886_v6 = vadd.f32 %v885_v59, %v4007_v50 }
 0x168   : > { %v4260_v5 = vpack.c.bf16 %v1439_v4, %v1437_v31 }
 0x169   : > { %v1549_v58 = vpop.f32.mrf.mxu0  ;;  %924 = vmatmul.bf16.gmra.mxu1 %v4232_v37 }
 0x16a   : > { %v1350_v3 = vpop.f32.mrf.mxu3 }
 0x16b   : > { %v1412_v12 = vadd.f32 %v1350_v3, %v1225_v13 }
 0x16c   : > { %v1165_v38 = vpop.f32.mrf.mxu2 }
 0x16d   : > { %v1226_v15 = vadd.f32 %v1165_v38, %v883_v47  ;;  %v4258_v22 = vadd.f32 %v1547_v51, %v1412_v12 }
 0x16e   : > { %v887_v62 = vpop.f32.mrf.mxu1 }
 0x16f   : > { %v888_v50 = vadd.f32 %v887_v62, %v4036_v14 }
 0x171   : > { %v1552_v29 = vpop.f32.mrf.mxu0  ;;  %1207 = vmatmul.bf16.gmra.mxu2 %v4254_v30 }
 0x172   : > { %v1352_v0 = vpop.f32.mrf.mxu3 }
 0x173   : > { %v1413_v13 = vadd.f32 %v1352_v0, %v1226_v15 }
 0x174   : > { %1591 = vmatmul.bf16.gmra.mxu0 %v4260_v5  ;;  %v1168_v18 = vpop.f32.mrf.mxu2 }
 0x175   : > { %v1227_v34 = vadd.f32 %v1168_v18, %v886_v6  ;;  %v4269_v51 = vadd.f32 %v1549_v58, %v1413_v13 }
 0x176   : > { %v890_v54 = vpop.f32.mrf.mxu1 }
 0x177   : > { %1394 = vmatmul.bf16.gmra.mxu3 %v4266_v8  ;;  %v891_v31 = vadd.f32 %v890_v54, %v3931_v11 }
 0x179   : > { %v1554_v40 = vpop.f32.mrf.mxu0  ;;  %1710 = vmatmul.bf16.vlgmr.msra.gmra.mxu1 %v3860_v45 }
 0x17a   : > { %v1355_v19 = vpop.f32.mrf.mxu3 }
 0x17b   : > { %v1414_v0 = vadd.f32 %v1355_v19, %v1227_v34 }
 0x17c   : > { %v1170_v59 = vpop.f32.mrf.mxu2 }
 0x17d   : > { %v1228_v3 = vadd.f32 %v1170_v59, %v888_v50  ;;  %v4274_v12 = vadd.f32 %v1552_v29, %v1414_v0 }
 0x17e   : > { %v892_v47 = vpop.f32.mrf.mxu1 }
 0x181   : > { %v1557_v38 = vpop.f32.mrf.mxu0  ;;  %1897 = vmatmul.bf16.vlgmr.msra.gmra.mxu2 %v3865_v32  ;;  %v893_v32 = vadd.f32 %v892_v47, %v3958_v49 }
 0x182   : > { %v1357_v58 = vpop.f32.mrf.mxu3 }
 0x183   : > { %v1415_v15 = vadd.f32 %v1357_v58, %v1228_v3 }
 0x184   : > { %2288 = vmatmul.bf16.vlgmr.msra.gmra.mxu0 %v3875_v53  ;;  %v1173_v4 = vpop.f32.mrf.mxu2 }
 0x185   : > { %v1229_v45 = vadd.f32 %v1173_v4, %v891_v31  ;;  %v4279_v13 = vadd.f32 %v1554_v40, %v1415_v15 }
 0x186   : > { %v895_v6 = vpop.f32.mrf.mxu1 }
 0x187   : > { %2094 = vmatmul.bf16.vlgmr.msra.gmra.mxu3 %v3768_v43  ;;  %v896_v50 = vadd.f32 %v895_v6, %v3974_v35 }
 0x189   : > { %v1559_v14 = vpop.f32.mrf.mxu0  ;;  %1715 = vmatmul.bf16.gmra.mxu1 %v3875_v53 }
 0x18a   : > { %v1360_v29 = vpop.f32.mrf.mxu3 }
 0x18b   : > { %v1416_v62 = vadd.f32 %v1360_v29, %v1229_v45 }
 0x18c   : > { %v1175_v18 = vpop.f32.mrf.mxu2 }
 0x18d   : > { %v1230_v34 = vadd.f32 %v1175_v18, %v893_v32  ;;  %v4284_v19 = vadd.f32 %v1557_v38, %v1416_v62 }
 0x18e   : > { %v897_v11 = vpop.f32.mrf.mxu1 }
 0x191   : > { %v1562_v54 = vpop.f32.mrf.mxu0  ;;  %1902 = vmatmul.bf16.gmra.mxu2 %v3880_v9  ;;  %v898_v9 = vadd.f32 %v897_v11, %v3989_v28 }
 0x192   : > { %v1362_v40 = vpop.f32.mrf.mxu3 }
 0x193   : > { %v1417_v0 = vadd.f32 %v1362_v40, %v1230_v34 }
 0x194   : > { %2293 = vmatmul.bf16.gmra.mxu0 %v3902_v2  ;;  %v1178_v43 = vpop.f32.mrf.mxu2 }
 0x195   : > { %v1231_v53 = vadd.f32 %v1178_v43, %v896_v50  ;;  %v4289_v59 = vadd.f32 %v1559_v14, %v1417_v0 }
 0x196   : > { %v900_v3 = vpop.f32.mrf.mxu1 }
 0x197   : > { %2099 = vmatmul.bf16.gmra.mxu3 %v3827_v17  ;;  %v901_v14 = vadd.f32 %v900_v3, %v4005_v61 }
 0x199   : > { %v1564_v49 = vpop.f32.mrf.mxu0  ;;  %1720 = vmatmul.bf16.gmra.mxu1 %v3902_v2 }
 0x19a   : > { %v1365_v47 = vpop.f32.mrf.mxu3 }
 0x19b   : > { %v1418_v38 = vadd.f32 %v1365_v47, %v1231_v53 }
 0x19c   : > { %v1180_v58 = vpop.f32.mrf.mxu2 }
 0x19d   : > { %v1232_v15 = vadd.f32 %v1180_v58, %v898_v9  ;;  %v4294_v31 = vadd.f32 %v1562_v54, %v1418_v38 }
 0x19e   : > { %v902_v35 = vpop.f32.mrf.mxu1 }
 0x1a1   : > { %v1567_v4 = vpop.f32.mrf.mxu0  ;;  %1907 = vmatmul.bf16.gmra.mxu2 %v3909_v26  ;;  %v903_v26 = vadd.f32 %v902_v35, %v4032_v16  ;;  %v4560_v16 = vld [vmem:[#allocation8_spill] sm:$0xff] }
 0x1a2   : > { %v1367_v45 = vpop.f32.mrf.mxu3 }
 0x1a3   : > { %v1419_v6 = vadd.f32 %v1367_v45, %v1232_v15 }
 0x1a4   : > { %2298 = vmatmul.bf16.gmra.mxu0 %v3921_v7  ;;  %v1183_v17 = vpop.f32.mrf.mxu2 }
 0x1a5   : > { %v1233_v2 = vadd.f32 %v1183_v17, %v901_v14  ;;  %v4299_v29 = vadd.f32 %v1564_v49, %v1419_v6  ;;  %v4562_v14 = vld [vmem:[#allocation23_spill] sm:$0xff] }
 0x1a6   : > { %v905_v62 = vpop.f32.mrf.mxu1 }
 0x1a7   : > { %2104 = vmatmul.bf16.gmra.mxu3 %v3488_v20  ;;  %v906_v43 = vadd.f32 %v905_v62, %v4048_v27 }
 0x1a9   : > { %v1569_v28 = vpop.f32.mrf.mxu0  ;;  %1725 = vmatmul.bf16.gmra.mxu1 %v3921_v7 }
 0x1aa   : > { %v1370_v32 = vpop.f32.mrf.mxu3 }
 0x1ab   : > { %v1420_v18 = vadd.f32 %v1370_v32, %v1233_v2  ;;  %v4563_v2 = vld [vmem:[#allocation27_spill] sm:$0xff] }
 0x1ac   : > { %v1185_v34 = vpop.f32.mrf.mxu2 }
 0x1ad   : > { %v1234_v11 = vadd.f32 %v1185_v34, %v903_v26  ;;  %v4304_v54 = vadd.f32 %v1567_v4, %v1420_v18  ;;  %v4561_v4 = vld [vmem:[#allocation25_spill] sm:$0xff] }
 0x1ae   : > { %v907_v61 = vpop.f32.mrf.mxu1 }
 0x1b1   : > { %v1572_v40 = vpop.f32.mrf.mxu0  ;;  %1912 = vmatmul.bf16.gmra.mxu2 %v3928_v10  ;;  %v908_v10 = vadd.f32 %v907_v61, %v4062_v42  ;;  %v4564_v42 = vld [vmem:[#allocation14_spill] sm:$0xff] }
 0x1b2   : > { %v1372_v0 = vpop.f32.mrf.mxu3 }
 0x1b3   : > { %v1421_v50 = vadd.f32 %v1372_v0, %v1234_v11  ;;  %v4565_v11 = vld [vmem:[#allocation24_spill] sm:$0xff] }
 0x1b4   : > { %2303 = vmatmul.bf16.gmra.mxu0 %v3960_v1  ;;  %v1188_v20 = vpop.f32.mrf.mxu2 }
 0x1b5   : > { %v1235_v7 = vadd.f32 %v1188_v20, %v906_v43  ;;  %v4309_v53 = vadd.f32 %v1569_v28, %v1421_v50 }
 0x1b6   : > { %v910_v3 = vpop.f32.mrf.mxu1 }
 0x1b7   : > { %2109 = vmatmul.bf16.gmra.mxu3 %v4560_v16  ;;  %v911_v17 = vadd.f32 %v910_v3, %v4562_v14  ;;  %v4570_v14 = vld [vmem:[#allocation28_spill] sm:$0xff] }
 0x1b9   : > { %v1574_v49 = vpop.f32.mrf.mxu0  ;;  %1730 = vmatmul.bf16.gmra.mxu1 %v3960_v1 }
 0x1ba   : > { %v1375_v47 = vpop.f32.mrf.mxu3 }
 0x1bb   : > { %v1422_v38 = vadd.f32 %v1375_v47, %v1235_v7  ;;  %v4566_v7 = vld [vmem:[#allocation29_spill] sm:$0xff] }
 0x1bc   : > { %v1190_v9 = vpop.f32.mrf.mxu2 }
 0x1bd   : > { %v1236_v58 = vadd.f32 %v1190_v9, %v908_v10  ;;  %v4314_v15 = vadd.f32 %v1572_v40, %v1422_v38  ;;  %v4568_v38 = vld [vmem:[#allocation31_spill] sm:$0xff] }
 0x1be   : > { %v912_v27 = vpop.f32.mrf.mxu1 }
 0x1bf   : > { %v913_v61 = vadd.f32 %v912_v27, %v4565_v11  ;;  %v4569_v27 = vld [vmem:[#allocation20_spill] sm:$0xff]  ;;  %v4572_v11 = vld [vmem:[#allocation30_spill] sm:$0xff] }
 0x1c1   : > { %v1577_v35 = vpop.f32.mrf.mxu0  ;;  %1917 = vmatmul.bf16.gmra.mxu2 %v4561_v4 }
 0x1c2   : > { %v1377_v45 = vpop.f32.mrf.mxu3 }
 0x1c3   : > { %v1423_v6 = vadd.f32 %v1377_v45, %v1236_v58 }
 0x1c4   : > { %2308 = vmatmul.bf16.gmra.mxu0 %v4563_v2  ;;  %v1193_v62 = vpop.f32.mrf.mxu2 }
 0x1c5   : > { %v1237_v1 = vadd.f32 %v1193_v62, %v911_v17  ;;  %v4319_v28 = vadd.f32 %v1574_v49, %v1423_v6  ;;  %v4567_v49 = vld [vmem:[#allocation26_spill] sm:$0xff] }
 0x1c6   : > { %v915_v32 = vpop.f32.mrf.mxu1 }
 0x1c7   : > { %2114 = vmatmul.bf16.gmra.mxu3 %v4564_v42  ;;  %v916_v47 = vadd.f32 %v915_v32, %v4567_v49 }
 0x1c9   : > { %v1579_v18 = vpop.f32.mrf.mxu0  ;;  %1735 = vmatmul.bf16.gmra.mxu1 %v4563_v2 }
 0x1ca   : > { %v1380_v26 = vpop.f32.mrf.mxu3 }
 0x1cb   : > { %v1424_v34 = vadd.f32 %v1380_v26, %v1237_v1  ;;  %v4571_v26 = vld [vmem:[#allocation33_spill] sm:$0xff] }
 0x1cc   : > { %v1195_v40 = vpop.f32.mrf.mxu2 }
 0x1cd   : > { %v1238_v0 = vadd.f32 %v1195_v40, %v913_v61  ;;  %v4324_v50 = vadd.f32 %v1577_v35, %v1424_v34  ;;  %v4573_v40 = vld [vmem:[#allocation35_spill] sm:$0xff] }
 0x1ce   : > { %v917_v43 = vpop.f32.mrf.mxu1 }
 0x1cf   : > { %v918_v17 = vadd.f32 %v917_v43, %v4570_v14  ;;  %v4574_v43 = vld [vmem:[#allocation3_spill] sm:$0xff] }
 0x1d1   : > { %v1582_v20 = vpop.f32.mrf.mxu0  ;;  %1922 = vmatmul.bf16.gmra.mxu2 %v4566_v7 }
 0x1d2   : > { %v1382_v3 = vpop.f32.mrf.mxu3 }
 0x1d3   : > { %v1425_v16 = vadd.f32 %v1382_v3, %v1238_v0 }
 0x1d4   : > { %2313 = vmatmul.bf16.gmra.mxu0 %v4568_v38  ;;  %v1198_v10 = vpop.f32.mrf.mxu2 }
 0x1d5   : > { %v1239_v9 = vadd.f32 %v1198_v10, %v916_v47  ;;  %v4329_v58 = vadd.f32 %v1579_v18, %v1425_v16 }
 0x1d6   : > { %v920_v4 = vpop.f32.mrf.mxu1 }
 0x1d7   : > { %2119 = vmatmul.bf16.gmra.mxu3 %v4569_v27  ;;  %v921_v61 = vadd.f32 %v920_v4, %v4572_v11 }
 0x1d9   : > { %v1584_v45 = vpop.f32.mrf.mxu0  ;;  %1740 = vmatmul.bf16.gmra.mxu1 %v4568_v38  ;;  %v4575_v38 = vld [vmem:[#allocation32_spill] sm:$0xff] }
 0x1da   : > { %v1385_v35 = vpop.f32.mrf.mxu3 }
 0x1db   : > { %v1426_v6 = vadd.f32 %v1385_v35, %v1239_v9 }
 0x1dc   : > { %v1200_v2 = vpop.f32.mrf.mxu2 }
 0x1dd   : > { %v1240_v62 = vadd.f32 %v1200_v2, %v918_v17  ;;  %v4334_v1 = vadd.f32 %v1582_v20, %v1426_v6  ;;  %v4576_v17 = vld [vmem:[#allocation34_spill] sm:$0xff] }
 0x1de   : > { %v922_v32 = vpop.f32.mrf.mxu1 }
 0x1df   : > { %v923_v10 = vadd.f32 %v922_v32, %v4575_v38  ;;  %v4577_v32 = vld [vmem:[#allocation12_spill] sm:$0xff] }
 0x1e1   : > { %v1587_v42 = vpop.f32.mrf.mxu0  ;;  %1927 = vmatmul.bf16.gmra.mxu2 %v4571_v26 }
 0x1e2   : > { %v1387_v18 = vpop.f32.mrf.mxu3 }
 0x1e3   : > { %v1427_v34 = vadd.f32 %v1387_v18, %v1240_v62 }
 0x1e4   : > { %2318 = vmatmul.bf16.gmra.mxu0 %v4573_v40  ;;  %v1203_v0 = vpop.f32.mrf.mxu2 }
 0x1e5   : > { %v1241_v7 = vadd.f32 %v1203_v0, %v921_v61  ;;  %v4339_v3 = vadd.f32 %v1584_v45, %v1427_v34 }
 0x1e6   : > { %v925_v16 = vpop.f32.mrf.mxu1 }
 0x1e7   : > { %2124 = vmatmul.bf16.gmra.mxu3 %v4574_v43  ;;  %v926_v2 = vadd.f32 %v925_v16, %v4576_v17 }
 0x1e9   : > { %v1589_v49 = vpop.f32.mrf.mxu0  ;;  %1745 = vmatmul.bf16.gmra.mxu1 %v4573_v40  ;;  %v4578_v40 = vld [vmem:[#allocation36_spill] sm:$0xff] }
 0x1ea   : > { %v1390_v20 = vpop.f32.mrf.mxu3 }
 0x1eb   : > { %v1428_v47 = vadd.f32 %v1390_v20, %v1241_v7 }
 0x1ec   : > { %v1205_v9 = vpop.f32.mrf.mxu2 }
 0x1ed   : > { %v1242_v27 = vadd.f32 %v1205_v9, %v923_v10  ;;  %v4344_v35 = vadd.f32 %v1587_v42, %v1428_v47 }
 0x1ee   : > { %v927_v4 = vpop.f32.mrf.mxu1 }
 0x1f1   : > { %v1592_v6 = vpop.f32.mrf.mxu0  ;;  %1932 = vmatmul.bf16.gmra.mxu2 %v4072_v56  ;;  %v928_v56 = vadd.f32 %v927_v4, %v4578_v40 }
 0x1f2   : > { %v1392_v45 = vpop.f32.mrf.mxu3 }
 0x1f3   : > { %v1429_v14 = vadd.f32 %v1392_v45, %v1242_v27 }
 0x1f4   : > { %2323 = vmatmul.bf16.gmra.mxu0 %v4095_v23  ;;  %v1208_v62 = vpop.f32.mrf.mxu2 }
 0x1f5   : > { %v1243_v26 = vadd.f32 %v1208_v62, %v926_v2  ;;  %v4349_v18 = vadd.f32 %v1589_v49, %v1429_v14 }
 0x1f6   : > { %v1711_v34 = vpop.f32.mrf.mxu1 }
 0x1f7   : > { %2129 = vmatmul.bf16.gmra.mxu3 %v4577_v32  ;;  %v1791_v9 = vadd.f32 %v1711_v34, %v4097_v41 }
 0x1f9   : > { %v1594_v11 = vpop.f32.mrf.mxu0  ;;  %1750 = vmatmul.bf16.gmra.mxu1 %v4095_v23 }
 0x1fa   : > { %v1395_v42 = vpop.f32.mrf.mxu3 }
 0x1fb   : > { %v1430_v61 = vadd.f32 %v1395_v42, %v1243_v26 }
 0x1fc   : > { %v1210_v0 = vpop.f32.mrf.mxu2 }
 0x1fd   : > { %v1244_v7 = vadd.f32 %v1210_v0, %v928_v56  ;;  %v4354_v43 = vadd.f32 %v1592_v6, %v1430_v61  ;;  %v4580_v0 = vld [vmem:[#allocation21_spill] sm:$0xff] }
 0x1fe   : > { %v1713_v16 = vpop.f32.mrf.mxu1 }
 0x201   : > { %v2289_v20 = vpop.f32.mrf.mxu0  ;;  %1937 = vmatmul.bf16.gmra.mxu2 %v4103_v36  ;;  %v4579_v36 = vld [vmem:[#allocation37_spill] sm:$0xff] }
 0x202   : > { %v1397_v49 = vpop.f32.mrf.mxu3  ;;  %v1792_v14 = vadd.f32 %v1713_v16, %v4579_v36 }
 0x203   : > { %v1431_v47 = vadd.f32 %v1397_v49, %v1244_v7 }
 0x204   : > { %2328 = vmatmul.bf16.gmra.mxu0 %v4116_v60  ;;  %v1898_v38 = vpop.f32.mrf.mxu2 }
 0x205   : > { %v4358_v10 = vadd.f32 %v1594_v11, %v1431_v47  ;;  %v1978_v4 = vadd.f32 %v1898_v38, %v1791_v9 }
 0x206   : > { %v1716_v23 = vpop.f32.mrf.mxu1 }
 0x207   : > { %2134 = vmatmul.bf16.gmra.mxu3 %v3756_v21 }
 0x209   : > { %v2291_v27 = vpop.f32.mrf.mxu0  ;;  %1755 = vmatmul.bf16.gmra.mxu1 %v4116_v60  ;;  %v1793_v60 = vadd.f32 %v1716_v23, %v4118_v63  ;;  %v4581_v23 = vld [vmem:[#allocation38_spill] sm:$0xff] }
 0x20a   : > { %v2095_v6 = vpop.f32.mrf.mxu3 }
 0x20b   : > { %v2175_v17 = vadd.f32 %v2095_v6, %v1978_v4 }
 0x20c   : > { %v1900_v45 = vpop.f32.mrf.mxu2 }
 0x20d   : > { %v1979_v62 = vadd.f32 %v1900_v45, %v1792_v14  ;;  %v2369_v32 = vadd.f32 %v2289_v20, %v2175_v17  ;;  %v4582_v17 = vld [vmem:[#allocation4_spill] sm:$0xff] }
 0x20e   : > { %v1718_v2 = vpop.f32.mrf.mxu1 }
 0x20f   : > { %v2502_v42 = vmul.f32 %v2369_v32, %v2369_v32  ;;  %v1794_v9 = vadd.f32 %v1718_v2, %v4581_v23 }
 0x211   : > { %v2294_v26 = vpop.f32.mrf.mxu0  ;;  %1942 = vmatmul.bf16.gmra.mxu2 %v4124_v39 }
 0x212   : > { %v2097_v11 = vpop.f32.mrf.mxu3 }
 0x213   : > { %v2176_v21 = vadd.f32 %v2097_v11, %v1979_v62 }
 0x214   : > { %2333 = vmatmul.bf16.gmra.mxu0 %v4149_v52  ;;  %v1903_v41 = vpop.f32.mrf.mxu2 }
 0x215   : > { %v2370_v34 = vadd.f32 %v2291_v27, %v2176_v21  ;;  %v1980_v7 = vadd.f32 %v1903_v41, %v1793_v60  ;;  %v4583_v21 = vld [vmem:[#allocation19_spill] sm:$0xff] }
 0x216   : > { %v1721_v61 = vpop.f32.mrf.mxu1 }
 0x217   : > { %v3229_v40 = vpack.c.bf16 %v2370_v34, %v2369_v32  ;;  %v2465_v39 = vadd.f32 %v2370_v34, %v2369_v32  ;;  %v2503_v56 = vmul.f32 %v2370_v34, %v2370_v34  ;;  %2139 = vmatmul.bf16.gmra.mxu3 %v4580_v0  ;;  %v1795_v41 = vadd.f32 %v1721_v61, %v4583_v21 }
 0x219   : > { %3230 = vst [vmem:[%s4372_s29] sm:$0xff] %v3229_v40   ;;  %v2534_v16 = vadd.f32 %v2503_v56, %v2502_v42  ;;  %v2296_v20 = vpop.f32.mrf.mxu0  ;;  %1760 = vmatmul.bf16.gmra.mxu1 %v4149_v52  ;;  %v4584_v42 = vld [vmem:[#allocation7_spill] sm:$0xff] }
 0x21a   : > { %v2100_v63 = vpop.f32.mrf.mxu3 }
 0x21b   : > { %v2177_v49 = vadd.f32 %v2100_v63, %v1980_v7 }
 0x21c   : > { %v1905_v47 = vpop.f32.mrf.mxu2 }
 0x21d   : > { %v2371_v38 = vadd.f32 %v2294_v26, %v2177_v49  ;;  %v1981_v45 = vadd.f32 %v1905_v47, %v1794_v9  ;;  %v4585_v49 = vld [vmem:[#allocation5_spill] sm:$0xff] }
 0x21e   : > { %v1723_v27 = vpop.f32.mrf.mxu1 }
 0x21f   : > { %v2466_v4 = vadd.f32 %v2465_v39, %v2371_v38  ;;  %v2504_v6 = vmul.f32 %v2371_v38, %v2371_v38 }
 0x221   : > { %v2535_v36 = vadd.f32 %v2534_v16, %v2504_v6  ;;  %v2299_v14 = vpop.f32.mrf.mxu0  ;;  %1947 = vmatmul.bf16.gmra.mxu2 %v4582_v17  ;;  %v4586_v17 = vld [vmem:[#allocation6_spill] sm:$0xff] }
 0x222   : > { %v2102_v62 = vpop.f32.mrf.mxu3 }
 0x223   : > { %v2178_v32 = vadd.f32 %v2102_v62, %v1981_v45 }
 0x224   : > { %2338 = vmatmul.bf16.gmra.mxu0 %v4169_v24  ;;  %v1908_v52 = vpop.f32.mrf.mxu2 }
 0x225   : > { %v2372_v11 = vadd.f32 %v2296_v20, %v2178_v32  ;;  %v1982_v40 = vadd.f32 %v1908_v52, %v1795_v41  ;;  %v1796_v20 = vadd.f32 %v1723_v27, %v4585_v49  ;;  %v1629_v49 = vrot.slane %v4240_v57, 2 }
 0x226   : > { %v1726_v26 = vpop.f32.mrf.mxu1 }
 0x227   : > { %v3234_v34 = vpack.c.bf16 %v2372_v11, %v2371_v38  ;;  %v2467_v2 = vadd.f32 %v2466_v4, %v2372_v11  ;;  %v2505_v60 = vmul.f32 %v2372_v11, %v2372_v11  ;;  %2144 = vmatmul.bf16.gmra.mxu3 %v4584_v42  ;;  %v1797_v62 = vadd.f32 %v1726_v26, %v4586_v17  ;;  %v4587_v11 = vld [vmem:[#allocation13_spill] sm:$0xff] }
 0x229   : > { %3321 = vst [vmem:[%s4372_s29 + $0x8] sm:$0xff] %v3234_v34   ;;  %v2536_v39 = vadd.f32 %v2535_v36, %v2505_v60  ;;  %v2301_v56 = vpop.f32.mrf.mxu0  ;;  %1765 = vmatmul.bf16.gmra.mxu1 %v4169_v24 }
 0x22a   : > { %v2105_v0 = vpop.f32.mrf.mxu3 }
 0x22b   : > { %v2179_v7 = vadd.f32 %v2105_v0, %v1982_v40  ;;  %v4588_v40 = vld [vmem:[#allocation9_spill] sm:$0xff] }
 0x22c   : > { %v1910_v16 = vpop.f32.mrf.mxu2 }
 0x22d   : > { %v2373_v63 = vadd.f32 %v2299_v14, %v2179_v7  ;;  %v1983_v38 = vadd.f32 %v1910_v16, %v1796_v20  ;;  %v1630_v20 = vrot.slane %v4242_v55, 2  ;;  %v4590_v55 = vld [vmem:[#allocation18_spill] sm:$0xff] }
 0x22e   : > { %v1728_v47 = vpop.f32.mrf.mxu1 }
 0x22f   : > { %v2468_v61 = vadd.f32 %v2467_v2, %v2373_v63  ;;  %v2506_v23 = vmul.f32 %v2373_v63, %v2373_v63 }
 0x231   : > { %v2537_v9 = vadd.f32 %v2536_v39, %v2506_v23  ;;  %v2304_v4 = vpop.f32.mrf.mxu0  ;;  %1952 = vmatmul.bf16.gmra.mxu2 %v4177_v25  ;;  %v1798_v39 = vadd.f32 %v1728_v47, %v4588_v40  ;;  %v1632_v47 = vrot.slane %v4244_v33, 2 }
 0x232   : > { %v2107_v6 = vpop.f32.mrf.mxu3 }
 0x233   : > { %v2180_v45 = vadd.f32 %v2107_v6, %v1983_v38 }
 0x234   : > { %2343 = vmatmul.bf16.gmra.mxu0 %v4203_v48  ;;  %v1913_v24 = vpop.f32.mrf.mxu2 }
 0x235   : > { %v2374_v36 = vadd.f32 %v2301_v56, %v2180_v45  ;;  %v1984_v21 = vadd.f32 %v1913_v24, %v1797_v62  ;;  %v1631_v45 = vsel %vm930_vm1, %v1629_v49, %v1630_v20 }
 0x236   : > { %v1731_v14 = vpop.f32.mrf.mxu1 }
 0x237   : > { %v3239_v32 = vpack.c.bf16 %v2374_v36, %v2373_v63  ;;  %v2469_v27 = vadd.f32 %v2468_v61, %v2374_v36  ;;  %v2507_v52 = vmul.f32 %v2374_v36, %v2374_v36  ;;  %2149 = vmatmul.bf16.gmra.mxu3 %v4587_v11 }
 0x239   : > { %3322 = vst [vmem:[%s4372_s29 + $0x10] sm:$0xff] %v3239_v32   ;;  %v2538_v41 = vadd.f32 %v2537_v9, %v2507_v52  ;;  %v2306_v34 = vpop.f32.mrf.mxu0  ;;  %1770 = vmatmul.bf16.gmra.mxu1 %v4203_v48  ;;  %v4589_v9 = vld [vmem:[#allocation10_spill] sm:$0xff] }
 0x23a   : > { %v2110_v25 = vpop.f32.mrf.mxu3 }
 0x23b   : > { %v2181_v2 = vadd.f32 %v2110_v25, %v1984_v21  ;;  %v4591_v21 = vld [vmem:[#allocation11_spill] sm:$0xff] }
 0x23c   : > { %v1915_v60 = vpop.f32.mrf.mxu2 }
 0x23d   : > { %v2375_v42 = vadd.f32 %v2304_v4, %v2181_v2  ;;  %v1985_v7 = vadd.f32 %v1915_v60, %v1798_v39  ;;  %v1799_v4 = vadd.f32 %v1731_v14, %v4589_v9 }
 0x23e   : > { %v1733_v56 = vpop.f32.mrf.mxu1 }
 0x23f   : > { %v2470_v26 = vadd.f32 %v2469_v27, %v2375_v42  ;;  %v2508_v0 = vmul.f32 %v2375_v42, %v2375_v42 }
 0x241   : > { %v2539_v16 = vadd.f32 %v2538_v41, %v2508_v0  ;;  %v2309_v63 = vpop.f32.mrf.mxu0  ;;  %1957 = vmatmul.bf16.gmra.mxu2 %v4211_v44  ;;  %v1633_v44 = vsel %vm930_vm1, %v1630_v20, %v1632_v47  ;;  %v1800_v41 = vadd.f32 %v1733_v56, %v4591_v21 }
 0x242   : > { %v2112_v61 = vpop.f32.mrf.mxu3  ;;  %v1636_v62 = vpack.c.bf16 %v1633_v44, %v1631_v45  ;;  %v4594_v45 = vld [vmem:[#allocation16_spill] sm:$0xff] }
 0x243   : > { %v2182_v48 = vadd.f32 %v2112_v61, %v1985_v7  ;;  %v4592_v7 = vld [vmem:[#allocation15_spill] sm:$0xff]  ;;  %v4593_v61 = vld [vmem:[#allocation22_spill] sm:$0xff] }
 0x244   : > { %2348 = vmatmul.bf16.gmra.mxu0 %v4224_v46  ;;  %v1918_v23 = vpop.f32.mrf.mxu2 }
 0x245   : > { %v2376_v38 = vadd.f32 %v2306_v34, %v2182_v48  ;;  %v1986_v17 = vadd.f32 %v1918_v23, %v1799_v4 }
 0x246   : > { %v1736_v6 = vpop.f32.mrf.mxu1 }
 0x247   : > { %v3244_v24 = vpack.c.bf16 %v2376_v38, %v2375_v42  ;;  %v2471_v57 = vadd.f32 %v2470_v26, %v2376_v38  ;;  %v2509_v36 = vmul.f32 %v2376_v38, %v2376_v38  ;;  %2154 = vmatmul.bf16.gmra.mxu3 %v4590_v55 }
 0x249   : > { %3323 = vst [vmem:[%s4372_s29 + $0x18] sm:$0xff] %v3244_v24   ;;  %v2540_v32 = vadd.f32 %v2539_v16, %v2509_v36  ;;  %v2311_v27 = vpop.f32.mrf.mxu0  ;;  %1775 = vmatmul.bf16.gmra.mxu1 %v4224_v46  ;;  %v1801_v16 = vadd.f32 %v1736_v6, %v4592_v7 }
 0x24a   : > { %v2115_v33 = vpop.f32.mrf.mxu3 }
 0x24b   : > { %v2183_v52 = vadd.f32 %v2115_v33, %v1986_v17 }
 0x24c   : > { %v1920_v14 = vpop.f32.mrf.mxu2 }
 0x24d   : > { %v2377_v11 = vadd.f32 %v2309_v63, %v2183_v52  ;;  %v1987_v60 = vadd.f32 %v1920_v14, %v1800_v41 }
 0x24e   : > { %v1738_v34 = vpop.f32.mrf.mxu1 }
 0x24f   : > { %v2472_v25 = vadd.f32 %v2471_v57, %v2377_v11  ;;  %v2510_v2 = vmul.f32 %v2377_v11, %v2377_v11  ;;  %v1802_v44 = vadd.f32 %v1738_v34, %v4594_v45 }
 0x251   : > { %v2541_v42 = vadd.f32 %v2540_v32, %v2510_v2  ;;  %v2314_v40 = vpop.f32.mrf.mxu0  ;;  %1962 = vmatmul.bf16.gmra.mxu2 %v4232_v37  ;;  %v429_v2 = vld [vmem:[#allocation2 + $0x1a8] sm:$0x3] }
 0x252   : > { %v2117_v39 = vpop.f32.mrf.mxu3 }
 0x253   : > { %v2184_v26 = vadd.f32 %v2117_v39, %v1987_v60 }
 0x254   : > { %2353 = vmatmul.bf16.gmra.mxu0 %v4254_v30  ;;  %v1923_v46 = vpop.f32.mrf.mxu2 }
 0x255   : > { %v2378_v0 = vadd.f32 %v2311_v27, %v2184_v26  ;;  %v1988_v48 = vadd.f32 %v1923_v46, %v1801_v16  ;;  %v2210_v26 = vrot.slane %v429_v2, 2 }
 0x256   : > { %v1741_v63 = vpop.f32.mrf.mxu1 }
 0x257   : > { %v3249_v49 = vpack.c.bf16 %v2378_v0, %v2377_v11  ;;  %v2473_v56 = vadd.f32 %v2472_v25, %v2378_v0  ;;  %v2511_v20 = vmul.f32 %v2378_v0, %v2378_v0  ;;  %2159 = vmatmul.bf16.gmra.mxu3 %v4593_v61  ;;  %v1803_v52 = vadd.f32 %v1741_v63, %v4258_v22  ;;  %v427_v25 = vld [vmem:[#allocation2 + $0x198] sm:$0xff] }
 0x258   : > { %v2013_v16 = vrot.slane %v427_v25, 1 }
 0x259   : > { %3324 = vst [vmem:[%s4372_s29 + $0x20] sm:$0xff] %v3249_v49   ;;  %v2542_v23 = vadd.f32 %v2541_v42, %v2511_v20  ;;  %v2316_v47 = vpop.f32.mrf.mxu0  ;;  %1780 = vmatmul.bf16.gmra.mxu1 %v4254_v30  ;;  %v2016_v49 = vrot.slane %v429_v2, 1 }
 0x25a   : > { %v2120_v37 = vpop.f32.mrf.mxu3 }
 0x25b   : > { %v2185_v38 = vadd.f32 %v2120_v37, %v1988_v48 }
 0x25c   : > { %v1925_v9 = vpop.f32.mrf.mxu2 }
 0x25d   : > { %v2379_v4 = vadd.f32 %v2314_v40, %v2185_v38  ;;  %v1989_v36 = vadd.f32 %v1925_v9, %v1802_v44  ;;  %v3369_v40 = vld [vmem:[#allocation2 + $0x8] sm:$0xff] }
 0x25e   : > { %v1743_v24 = vpop.f32.mrf.mxu1  ;;  %v2208_v39 = vrot.slane %v3369_v40, 2  ;;  %v1823_v7 = vpack.c.bf16 %v3369_v40, %v427_v25  ;;  %v2014_v63 = vrot.slane %v3369_v40, 1 }
 0x25f   : > { %v2474_v6 = vadd.f32 %v2473_v56, %v2379_v4  ;;  %v2512_v57 = vmul.f32 %v2379_v4, %v2379_v4 }
 0x260   : > { %v2211_v61 = vsel %vm930_vm1, %v2208_v39, %v2210_v26  ;;  %v2015_v37 = vsel %vm510_vm0, %v2013_v16, %v2014_v63  ;;  %v2017_v38 = vsel %vm510_vm0, %v2014_v63, %v2016_v49 }
 0x261   : > { %v2543_v55 = vadd.f32 %v2542_v23, %v2512_v57  ;;  %v2319_v17 = vpop.f32.mrf.mxu0  ;;  %1967 = vmatmul.bf16.gmra.mxu2 %v4266_v8  ;;  %v2207_v8 = vrot.slane %v427_v25, 2 }
 0x262   : > { %v2122_v32 = vpop.f32.mrf.mxu3 }
 0x263   : > { %v2186_v27 = vadd.f32 %v2122_v32, %v1989_v36  ;;  %v2209_v20 = vsel %vm930_vm1, %v2207_v8, %v2208_v39 }
 0x264   : > { %2358 = vmatmul.bf16.gmra.mxu0 %v1636_v62  ;;  %v1928_v33 = vpop.f32.mrf.mxu2  ;;  %v2214_v9 = vpack.c.bf16 %v2211_v61, %v2209_v20 }
 0x265   : > { %v2380_v30 = vadd.f32 %v2316_v47, %v2186_v27  ;;  %v1990_v34 = vadd.f32 %v1928_v33, %v1803_v52 }
 0x266   : > { %v1746_v14 = vpop.f32.mrf.mxu1 }
 0x267   : > { %v3254_v11 = vpack.c.bf16 %v2380_v30, %v2379_v4  ;;  %v2475_v21 = vadd.f32 %v2474_v6, %v2380_v30  ;;  %v2513_v41 = vmul.f32 %v2380_v30, %v2380_v30  ;;  %2164 = vmatmul.bf16.gmra.mxu3 %v4260_v5  ;;  %v1804_v5 = vadd.f32 %v1743_v24, %v4269_v51 }
 0x268   : > { %v2020_v51 = vpack.c.bf16 %v2017_v38, %v2015_v37  ;;  %v1805_v36 = vadd.f32 %v1746_v14, %v4274_v12 }
 0x269   : > { %3325 = vst [vmem:[%s4372_s29 + $0x28] sm:$0xff] %v3254_v11   ;;  %v2544_v60 = vadd.f32 %v2543_v55, %v2513_v41  ;;  %v2321_v42 = vpop.f32.mrf.mxu0  ;;  %1785 = vmatmul.bf16.gmra.mxu1 %v1636_v62 }
 0x26a   : > { %v2125_v46 = vpop.f32.mrf.mxu3 }
 0x26b   : > { %v2187_v0 = vadd.f32 %v2125_v46, %v1990_v34 }
 0x26c   : > { %v1930_v22 = vpop.f32.mrf.mxu2 }
 0x26d   : > { %v2381_v56 = vadd.f32 %v2319_v17, %v2187_v0  ;;  %v1991_v47 = vadd.f32 %v1930_v22, %v1804_v5 }
 0x26e   : > { %v1748_v48 = vpop.f32.mrf.mxu1 }
 0x26f   : > { %v2476_v62 = vadd.f32 %v2475_v21, %v2381_v56  ;;  %v2514_v23 = vmul.f32 %v2381_v56, %v2381_v56  ;;  %v1806_v25 = vadd.f32 %v1748_v48, %v4279_v13 }
 0x271   : > { %v2545_v4 = vadd.f32 %v2544_v60, %v2514_v23  ;;  %v2324_v45 = vpop.f32.mrf.mxu0  ;;  %1972 = vmatmul.bf16.gmra.mxu2 %v1823_v7 }
 0x272   : > { %v2127_v44 = vpop.f32.mrf.mxu3 }
 0x273   : > { %v2188_v6 = vadd.f32 %v2127_v44, %v1991_v47 }
 0x274   : > { %2363 = vmatmul.bf16.gmra.mxu0 %v2214_v9  ;;  %v1933_v24 = vpop.f32.mrf.mxu2 }
 0x275   : > { %v2382_v57 = vadd.f32 %v2321_v42, %v2188_v6  ;;  %v1992_v33 = vadd.f32 %v1933_v24, %v1805_v36 }
 0x276   : > { %v1751_v55 = vpop.f32.mrf.mxu1 }
 0x277   : > { %v3259_v17 = vpack.c.bf16 %v2382_v57, %v2381_v56  ;;  %v2477_v32 = vadd.f32 %v2476_v62, %v2382_v57  ;;  %v2515_v27 = vmul.f32 %v2382_v57, %v2382_v57  ;;  %2169 = vmatmul.bf16.gmra.mxu3 %v2020_v51  ;;  %v1807_v0 = vadd.f32 %v1751_v55, %v4284_v19 }
 0x279   : > { %3326 = vst [vmem:[%s4372_s29 + $0x30] sm:$0xff] %v3259_v17   ;;  %v2546_v30 = vadd.f32 %v2545_v4, %v2515_v27  ;;  %v2326_v52 = vpop.f32.mrf.mxu0 }
 0x27a   : > { %v2130_v11 = vpop.f32.mrf.mxu3 }
 0x27b   : > { %v2189_v21 = vadd.f32 %v2130_v11, %v1992_v33 }
 0x27c   : > { %v1935_v41 = vpop.f32.mrf.mxu2 }
 0x27d   : > { %v2383_v34 = vadd.f32 %v2324_v45, %v2189_v21  ;;  %v1993_v12 = vadd.f32 %v1935_v41, %v1806_v25 }
 0x27e   : > { %v1753_v2 = vpop.f32.mrf.mxu1 }
 0x27f   : > { %v2478_v60 = vadd.f32 %v2477_v32, %v2383_v34  ;;  %v2516_v42 = vmul.f32 %v2383_v34, %v2383_v34  ;;  %v1808_v62 = vadd.f32 %v1753_v2, %v4289_v59 }
 0x281   : > { %v2547_v14 = vadd.f32 %v2546_v30, %v2516_v42  ;;  %v2329_v8 = vpop.f32.mrf.mxu0 }
 0x282   : > { %v2132_v40 = vpop.f32.mrf.mxu3 }
 0x283   : > { %v2190_v39 = vadd.f32 %v2132_v40, %v1993_v12 }
 0x284   : > { %v1938_v26 = vpop.f32.mrf.mxu2 }
 0x285   : > { %v2384_v46 = vadd.f32 %v2326_v52, %v2190_v39  ;;  %v1994_v49 = vadd.f32 %v1938_v26, %v1807_v0 }
 0x286   : > { %v1756_v22 = vpop.f32.mrf.mxu1 }
 0x287   : > { %v3264_v7 = vpack.c.bf16 %v2384_v46, %v2383_v34  ;;  %v2479_v16 = vadd.f32 %v2478_v60, %v2384_v46  ;;  %v2517_v63 = vmul.f32 %v2384_v46, %v2384_v46  ;;  %v1809_v51 = vadd.f32 %v1756_v22, %v4294_v31 }
 0x289   : > { %3327 = vst [vmem:[%s4372_s29 + $0x38] sm:$0xff] %v3264_v7   ;;  %v2548_v13 = vadd.f32 %v2547_v14, %v2517_v63  ;;  %v2331_v56 = vpop.f32.mrf.mxu0 }
 0x28a   : > { %v2135_v5 = vpop.f32.mrf.mxu3 }
 0x28b   : > { %v2191_v20 = vadd.f32 %v2135_v5, %v1994_v49 }
 0x28c   : > { %v1940_v61 = vpop.f32.mrf.mxu2 }
 0x28d   : > { %v2385_v48 = vadd.f32 %v2329_v8, %v2191_v20  ;;  %v1995_v38 = vadd.f32 %v1940_v61, %v1808_v62 }
 0x28e   : > { %v1758_v23 = vpop.f32.mrf.mxu1 }
 0x28f   : > { %v2480_v47 = vadd.f32 %v2479_v16, %v2385_v48  ;;  %v2518_v37 = vmul.f32 %v2385_v48, %v2385_v48  ;;  %v1810_v11 = vadd.f32 %v1758_v23, %v4299_v29 }
 0x291   : > { %v2549_v19 = vadd.f32 %v2548_v13, %v2518_v37  ;;  %v2334_v9 = vpop.f32.mrf.mxu0 }
 0x292   : > { %v2137_v4 = vpop.f32.mrf.mxu3 }
 0x293   : > { %v2192_v45 = vadd.f32 %v2137_v4, %v1995_v38 }
 0x294   : > { %v1943_v44 = vpop.f32.mrf.mxu2 }
 0x295   : > { %v2386_v6 = vadd.f32 %v2331_v56, %v2192_v45  ;;  %v1996_v17 = vadd.f32 %v1943_v44, %v1809_v51 }
 0x296   : > { %v1761_v24 = vpop.f32.mrf.mxu1 }
 0x297   : > { %v3269_v57 = vpack.c.bf16 %v2386_v6, %v2385_v48  ;;  %v2481_v36 = vadd.f32 %v2480_v47, %v2386_v6  ;;  %v2519_v55 = vmul.f32 %v2386_v6, %v2386_v6  ;;  %v1811_v8 = vadd.f32 %v1761_v24, %v4304_v54 }
 0x299   : > { %3328 = vst [vmem:[%s4372_s29 + $0x40] sm:$0xff] %v3269_v57   ;;  %v2550_v59 = vadd.f32 %v2549_v19, %v2519_v55  ;;  %v2336_v32 = vpop.f32.mrf.mxu0 }
 0x29a   : > { %v2140_v27 = vpop.f32.mrf.mxu3 }
 0x29b   : > { %v2193_v33 = vadd.f32 %v2140_v27, %v1996_v17 }
 0x29c   : > { %v1945_v30 = vpop.f32.mrf.mxu2 }
 0x29d   : > { %v2387_v52 = vadd.f32 %v2334_v9, %v2193_v33  ;;  %v1997_v25 = vadd.f32 %v1945_v30, %v1810_v11 }
 0x29e   : > { %v1763_v21 = vpop.f32.mrf.mxu1 }
 0x29f   : > { %v2482_v41 = vadd.f32 %v2481_v36, %v2387_v52  ;;  %v2520_v34 = vmul.f32 %v2387_v52, %v2387_v52  ;;  %v1812_v13 = vadd.f32 %v1763_v21, %v4309_v53 }
 0x2a1   : > { %v2551_v31 = vadd.f32 %v2550_v59, %v2520_v34  ;;  %v2339_v2 = vpop.f32.mrf.mxu0 }
 0x2a2   : > { %v2142_v60 = vpop.f32.mrf.mxu3 }
 0x2a3   : > { %v2194_v42 = vadd.f32 %v2142_v60, %v1997_v25 }
 0x2a4   : > { %v1948_v12 = vpop.f32.mrf.mxu2 }
 0x2a5   : > { %v2388_v14 = vadd.f32 %v2336_v32, %v2194_v42  ;;  %v1998_v0 = vadd.f32 %v1948_v12, %v1811_v8 }
 0x2a6   : > { %v1766_v40 = vpop.f32.mrf.mxu1 }
 0x2a7   : > { %v3274_v39 = vpack.c.bf16 %v2388_v14, %v2387_v52  ;;  %v2483_v26 = vadd.f32 %v2482_v41, %v2388_v14  ;;  %v2521_v46 = vmul.f32 %v2388_v14, %v2388_v14  ;;  %v1813_v38 = vadd.f32 %v1766_v40, %v4314_v15 }
 0x2a9   : > { %3329 = vst [vmem:[%s4372_s29 + $0x48] sm:$0xff] %v3274_v39   ;;  %v2552_v29 = vadd.f32 %v2551_v31, %v2521_v46  ;;  %v2341_v22 = vpop.f32.mrf.mxu0 }
 0x2aa   : > { %v2145_v7 = vpop.f32.mrf.mxu3 }
 0x2ab   : > { %v2195_v16 = vadd.f32 %v2145_v7, %v1998_v0 }
 0x2ac   : > { %v1950_v63 = vpop.f32.mrf.mxu2 }
 0x2ad   : > { %v2389_v49 = vadd.f32 %v2339_v2, %v2195_v16  ;;  %v1999_v61 = vadd.f32 %v1950_v63, %v1812_v13 }
 0x2ae   : > { %v1768_v56 = vpop.f32.mrf.mxu1 }
 0x2af   : > { %v2484_v5 = vadd.f32 %v2483_v26, %v2389_v49  ;;  %v2522_v20 = vmul.f32 %v2389_v49, %v2389_v49  ;;  %v1814_v55 = vadd.f32 %v1768_v56, %v4319_v28 }
 0x2b1   : > { %v2553_v54 = vadd.f32 %v2552_v29, %v2522_v20  ;;  %v2344_v48 = vpop.f32.mrf.mxu0 }
 0x2b2   : > { %v2147_v62 = vpop.f32.mrf.mxu3 }
 0x2b3   : > { %v2196_v23 = vadd.f32 %v2147_v62, %v1999_v61 }
 0x2b4   : > { %v1953_v47 = vpop.f32.mrf.mxu2 }
 0x2b5   : > { %v2390_v37 = vadd.f32 %v2341_v22, %v2196_v23  ;;  %v2000_v44 = vadd.f32 %v1953_v47, %v1813_v38 }
 0x2b6   : > { %v1771_v19 = vpop.f32.mrf.mxu1 }
 0x2b7   : > { %v3279_v9 = vpack.c.bf16 %v2390_v37, %v2389_v49  ;;  %v2485_v4 = vadd.f32 %v2484_v5, %v2390_v37  ;;  %v2523_v45 = vmul.f32 %v2390_v37, %v2390_v37  ;;  %v1815_v41 = vadd.f32 %v1771_v19, %v4324_v50 }
 0x2b9   : > { %3330 = vst [vmem:[%s4372_s29 + $0x50] sm:$0xff] %v3279_v9   ;;  %v2554_v53 = vadd.f32 %v2553_v54, %v2523_v45  ;;  %v2346_v6 = vpop.f32.mrf.mxu0 }
 0x2ba   : > { %v2150_v51 = vpop.f32.mrf.mxu3 }
 0x2bb   : > { %v2197_v24 = vadd.f32 %v2150_v51, %v2000_v44 }
 0x2bc   : > { %v1955_v57 = vpop.f32.mrf.mxu2 }
 0x2bd   : > { %v2391_v36 = vadd.f32 %v2344_v48, %v2197_v24  ;;  %v2001_v27 = vadd.f32 %v1955_v57, %v1814_v55 }
 0x2be   : > { %v1773_v17 = vpop.f32.mrf.mxu1 }
 0x2bf   : > { %v2486_v59 = vadd.f32 %v2485_v4, %v2391_v36  ;;  %v2524_v32 = vmul.f32 %v2391_v36, %v2391_v36  ;;  %v1816_v39 = vadd.f32 %v1773_v17, %v4329_v58 }
 0x2c1   : > { %v2555_v15 = vadd.f32 %v2554_v53, %v2524_v32  ;;  %v2349_v33 = vpop.f32.mrf.mxu0 }
 0x2c2   : > { %v2152_v30 = vpop.f32.mrf.mxu3 }
 0x2c3   : > { %v2198_v52 = vadd.f32 %v2152_v30, %v2001_v27 }
 0x2c4   : > { %v1958_v11 = vpop.f32.mrf.mxu2 }
 0x2c5   : > { %v2392_v21 = vadd.f32 %v2346_v6, %v2198_v52  ;;  %v2002_v2 = vadd.f32 %v1958_v11, %v1815_v41 }
 0x2c6   : > { %v1776_v60 = vpop.f32.mrf.mxu1 }
 0x2c7   : > { %v3284_v34 = vpack.c.bf16 %v2392_v21, %v2391_v36  ;;  %v2487_v25 = vadd.f32 %v2486_v59, %v2392_v21  ;;  %v2525_v31 = vmul.f32 %v2392_v21, %v2392_v21  ;;  %v1817_v13 = vadd.f32 %v1776_v60, %v4334_v1 }
 0x2c9   : > { %3331 = vst [vmem:[%s4372_s29 + $0x58] sm:$0xff] %v3284_v34   ;;  %v2556_v28 = vadd.f32 %v2555_v15, %v2525_v31  ;;  %v2351_v42 = vpop.f32.mrf.mxu0 }
 0x2ca   : > { %v2155_v12 = vpop.f32.mrf.mxu3 }
 0x2cb   : > { %v2199_v14 = vadd.f32 %v2155_v12, %v2002_v2 }
 0x2cc   : > { %v1960_v8 = vpop.f32.mrf.mxu2 }
 0x2cd   : > { %v2393_v40 = vadd.f32 %v2349_v33, %v2199_v14  ;;  %v2003_v0 = vadd.f32 %v1960_v8, %v1816_v39 }
 0x2ce   : > { %v1778_v50 = vpop.f32.mrf.mxu1 }
 0x2cf   : > { %v2488_v26 = vadd.f32 %v2487_v25, %v2393_v40  ;;  %v2526_v46 = vmul.f32 %v2393_v40, %v2393_v40  ;;  %v1818_v38 = vadd.f32 %v1778_v50, %v4339_v3 }
 0x2d1   : > { %v2557_v29 = vadd.f32 %v2556_v28, %v2526_v46  ;;  %v2354_v7 = vpop.f32.mrf.mxu0 }
 0x2d2   : > { %v2157_v22 = vpop.f32.mrf.mxu3 }
 0x2d3   : > { %v2200_v16 = vadd.f32 %v2157_v22, %v2003_v0 }
 0x2d4   : > { %v1963_v63 = vpop.f32.mrf.mxu2 }
 0x2d5   : > { %v2394_v49 = vadd.f32 %v2351_v42, %v2200_v16  ;;  %v2004_v61 = vadd.f32 %v1963_v63, %v1817_v13 }
 0x2d6   : > { %v1781_v62 = vpop.f32.mrf.mxu1 }
 0x2d7   : > { %v3289_v56 = vpack.c.bf16 %v2394_v49, %v2393_v40  ;;  %v2489_v5 = vadd.f32 %v2488_v26, %v2394_v49  ;;  %v2527_v20 = vmul.f32 %v2394_v49, %v2394_v49  ;;  %v1819_v51 = vadd.f32 %v1781_v62, %v4344_v35 }
 0x2d9   : > { %3332 = vst [vmem:[%s4372_s29 + $0x60] sm:$0xff] %v3289_v56   ;;  %v2558_v54 = vadd.f32 %v2557_v29, %v2527_v20  ;;  %v2356_v23 = vpop.f32.mrf.mxu0 }
 0x2da   : > { %v2160_v58 = vpop.f32.mrf.mxu3 }
 0x2db   : > { %v2201_v48 = vadd.f32 %v2160_v58, %v2004_v61 }
 0x2dc   : > { %v1965_v47 = vpop.f32.mrf.mxu2 }
 0x2dd   : > { %v2395_v37 = vadd.f32 %v2354_v7, %v2201_v48  ;;  %v2005_v4 = vadd.f32 %v1965_v47, %v1818_v38 }
 0x2de   : > { %v1783_v24 = vpop.f32.mrf.mxu1 }
 0x2df   : > { %v2490_v19 = vadd.f32 %v2489_v5, %v2395_v37  ;;  %v2528_v9 = vmul.f32 %v2395_v37, %v2395_v37  ;;  %v1820_v30 = vadd.f32 %v1783_v24, %v4349_v18 }
 0x2e1   : > { %v2559_v45 = vadd.f32 %v2558_v54, %v2528_v9  ;;  %v2359_v57 = vpop.f32.mrf.mxu0 }
 0x2e2   : > { %v2162_v1 = vpop.f32.mrf.mxu3 }
 0x2e3   : > { %v2202_v44 = vadd.f32 %v2162_v1, %v2005_v4 }
 0x2e4   : > { %v1968_v53 = vpop.f32.mrf.mxu2 }
 0x2e5   : > { %v2396_v6 = vadd.f32 %v2356_v23, %v2202_v44  ;;  %v2006_v59 = vadd.f32 %v1968_v53, %v1819_v51 }
 0x2e6   : > { %v1786_v41 = vpop.f32.mrf.mxu1 }
 0x2e7   : > { %v3294_v36 = vpack.c.bf16 %v2396_v6, %v2395_v37  ;;  %v2491_v55 = vadd.f32 %v2490_v19, %v2396_v6  ;;  %v2529_v17 = vmul.f32 %v2396_v6, %v2396_v6  ;;  %v1821_v28 = vadd.f32 %v1786_v41, %v4354_v43 }
 0x2e9   : > { %3333 = vst [vmem:[%s4372_s29 + $0x68] sm:$0xff] %v3294_v36   ;;  %v2560_v32 = vadd.f32 %v2559_v45, %v2529_v17  ;;  %v2361_v35 = vpop.f32.mrf.mxu0 }
 0x2ea   : > { %v2165_v3 = vpop.f32.mrf.mxu3 }
 0x2eb   : > { %v2203_v27 = vadd.f32 %v2165_v3, %v2006_v59 }
 0x2ec   : > { %v1970_v15 = vpop.f32.mrf.mxu2 }
 0x2ed   : > { %v2397_v33 = vadd.f32 %v2359_v57, %v2203_v27  ;;  %v2007_v21 = vadd.f32 %v1970_v15, %v1820_v30 }
 0x2ee   : > { %v1788_v18 = vpop.f32.mrf.mxu1 }
 0x2ef   : > { %v2492_v52 = vadd.f32 %v2491_v55, %v2397_v33  ;;  %v2530_v11 = vmul.f32 %v2397_v33, %v2397_v33  ;;  %v1822_v50 = vadd.f32 %v1788_v18, %v4358_v10 }
 0x2f1   : > { %v2561_v34 = vadd.f32 %v2560_v32, %v2530_v11  ;;  %v2364_v39 = vpop.f32.mrf.mxu0 }
 0x2f2   : > { %v2167_v25 = vpop.f32.mrf.mxu3 }
 0x2f3   : > { %v2204_v31 = vadd.f32 %v2167_v25, %v2007_v21 }
 0x2f4   : > { %v1973_v2 = vpop.f32.mrf.mxu2 }
 0x2f5   : > { %v2398_v60 = vadd.f32 %v2361_v35, %v2204_v31  ;;  %v2008_v8 = vadd.f32 %v1973_v2, %v1821_v28 }
 0x2f7   : > { %v3299_v42 = vpack.c.bf16 %v2398_v60, %v2397_v33  ;;  %v2493_v12 = vadd.f32 %v2492_v52, %v2398_v60  ;;  %v2531_v14 = vmul.f32 %v2398_v60, %v2398_v60 }
 0x2f9   : > { %3334 = vst [vmem:[%s4372_s29 + $0x70] sm:$0xff] %v3299_v42   ;;  %v2562_v40 = vadd.f32 %v2561_v34, %v2531_v14  ;;  %v2366_v13 = vpop.f32.mrf.mxu0 }
 0x2fa   : > { %v2170_v26 = vpop.f32.mrf.mxu3 }
 0x2fb   : > { %v2205_v46 = vadd.f32 %v2170_v26, %v2008_v8 }
 0x2fc   : > { %v1975_v0 = vpop.f32.mrf.mxu2 }
 0x2fd   : > { %v2399_v29 = vadd.f32 %v2364_v39, %v2205_v46  ;;  %v2009_v16 = vadd.f32 %v1975_v0, %v1822_v50 }
 0x2ff   : > { %v2494_v22 = vadd.f32 %v2493_v12, %v2399_v29  ;;  %v2532_v7 = vmul.f32 %v2399_v29, %v2399_v29 }
 0x301   : > { %v2563_v63 = vadd.f32 %v2562_v40, %v2532_v7 }
 0x302   : > { %v2172_v43 = vpop.f32.mrf.mxu3 }
 0x303   : > { %v2206_v49 = vadd.f32 %v2172_v43, %v2009_v16 }
 0x305   : > { %v2400_v56 = vadd.f32 %v2366_v13, %v2206_v49 }
 0x307   : > { %v3304_v5 = vpack.c.bf16 %v2400_v56, %v2399_v29  ;;  %v2495_v20 = vadd.f32 %v2494_v22, %v2400_v56  ;;  %v2533_v61 = vmul.f32 %v2400_v56, %v2400_v56 }
 0x309   : > { %3335 = vst [vmem:[%s4372_s29 + $0x78] sm:$0xff] %v3304_v5   ;;  %v2496_v54 = vrot.slane %v2495_v20, 4  ;;  %v2564_v58 = vadd.f32 %v2563_v63, %v2533_v61 }
 0x30b   : > { %v2497_v48 = vadd.f32 %v2496_v54, %v2495_v20  ;;  %v2565_v62 = vrot.slane %v2564_v58, 4 }
 0x30d   : > { %v2498_v23 = vrot.slane %v2497_v48, 2  ;;  %v2566_v47 = vadd.f32 %v2565_v62, %v2564_v58 }
 0x30f   : > { %v2499_v10 = vadd.f32 %v2498_v23, %v2497_v48  ;;  %v2567_v37 = vrot.slane %v2566_v47, 2 }
 0x311   : > { %v2500_v38 = vrot.slane %v2499_v10, 1  ;;  %v2568_v19 = vadd.f32 %v2567_v37, %v2566_v47 }
 0x313   : > { %v2569_v9 = vrot.slane %v2568_v19, 1  ;;  %v2501_v4 = vadd.f32 %v2500_v38, %v2499_v10 }
 0x315   : > { %v2570_v45 = vadd.f32 %v2569_v9, %v2568_v19 }
 0x317   : > { %v2572_v1 = vsel %vm2571_vm2, %v2501_v4, %v2570_v45 }
 0x318   : > { %2573 = vst [vmem:[%s235_s7] sm:$0x3] %v2572_v1 }
 0x319 PF: > { %s16_s18 = sadd.s32 1, %s3376_s18  }
 0x31a   : > { %p13_p4 = scmp.ge.s32.totalorder %s16_s18, 4  }
 0x31c   :  { %15 = sbr.rel (!%p13_p4) target bundleno = 1 (0x1), region = 88 }

// kernel: conv_block_forward.4
= control target key start
LH: loop header
LB: loop body
LE: loop exit
PB: predicated region body
PF: predicated region fallthrough
CT: control target
= control target key end

     0   :  { %s3517_s18 = smov 0   ;;  %s4692_s0 = inlined_call_operand.vmem [shape: bf16[2,16,16,128], index: 0, kind: input, shape index: {}]   ;;  %s4693_s1 = inlined_call_operand.vmem [shape: bf16[9,128,128], index: 1, kind: input, shape index: {}]   ;;  %s4694_s2 = inlined_call_operand.vmem [shape: f32[1,128], index: 2, kind: input, shape index: {}]   ;;  %s4695_s3 = inlined_call_operand.vmem [shape: f32[1,128], index: 3, kind: input, shape index: {}]   ;;  %s4696_s4 = inlined_call_operand.vmem [shape: bf16[2,16,16,128], index: 4, kind: output, shape index: {0}]   ;;  %s4697_s5 = inlined_call_operand.vmem [shape: f32[2,2,128], index: 5, kind: output, shape index: {1}]  }
   0x1 LB: > { %s2764_s19 = sadd.s32 4294967295, %s3484_s18   ;;  %p2768_p0 = scmp.ge.s32.totalorder %s3484_s18, 1  ;;  %s3484_s18 = sphi %s3517_s18, %s16_s18  }
   0x2   : > { %p190_p1 = scmp.lt.s32.totalorder %s3484_s18, 3 }
   0x4   : > { %p191_p2 = pnand %p2768_p0, %p190_p1 }
   0x6   : > { %194 = sbr.rel (%p191_p2) target bundleno = 793 (0x319), region = 36 }
   0xb   : > { %v3209_v0 = vld [vmem:[%s4693_s1 + $0x78] sm:$0xff]  ;;  %p222_p3 = scmp.lt.s32.totalorder %s2764_s19, 1  ;;  %v4698_v1 = vmov 0.0   ;;  %v3208_v2 = vld [vmem:[%s4693_s1 + $0x70] sm:$0xff]  ;;  %v3547_v3 = vld [vmem:[%s4694_s2] ss:$0 sm:$0xff] }
   0xc   : > { %415 = vst [vmem:[#allocation2 + $0x60] sm:$0x1] %v4698_v1  ;;  %3440 = vmatpush.bf16.msra.mxu1 %v3209_v0  ;;  %3441 = vmatpush.bf16.msra.mxu2 %v3209_v0  ;;  %v3207_v4 = vld [vmem:[%s4693_s1 + $0x68] sm:$0xff]  ;;  %v3558_v8 = vld [vmem:[%s4695_s3] ss:$0 sm:$0xff]  ;;  %v3205_v16 = vld [vmem:[%s4693_s1 + $0x58] sm:$0xff] }
   0xd   : > { %s4833_s19 = smov (!%p222_p3, %s2764_s19), 1  ;;  %404 = vst [vmem:[#allocation2] sm:$0xff] %v4698_v1  ;;  %3442 = vmatpush.bf16.msra.mxu3 %v3209_v0  ;;  %808 = vmatpush.bf16.msra.mxu0 %v3209_v0  ;;  %v3206_v11 = vld [vmem:[%s4693_s1 + $0x60] sm:$0xff]  ;;  %v3204_v17 = vld [vmem:[%s4693_s1 + $0x50] sm:$0xff]  ;;  %v3203_v18 = vld [vmem:[%s4693_s1 + $0x48] sm:$0xff]  ;;  %vm614_vm0 = vcmask 1046528  }
   0xe   : > { %s3192_s24 = sshll.u32 %s4833_s19, 7  ;;  %433 = vst [vmem:[#allocation2 + $0x71] sm:$0x1] %v4698_v1  ;;  %v3202_v27 = vld [vmem:[%s4693_s1 + $0x40] sm:$0xff]  ;;  %v3217_v38 = vld [vmem:[%s4693_s1 + $0xb8] sm:$0xff]  ;;  %v3216_v44 = vld [vmem:[%s4693_s1 + $0xb0] sm:$0xff] }
   0xf   : > { %s3542_s27 = scalar_lea.vmem %s4692_s0, %s3192_s24  ;;  %405 = vst [vmem:[#allocation2 + $0x8] sm:$0xff] %v4698_v1  ;;  %v3225_v39 = vld [vmem:[%s4693_s1 + $0xf8] sm:$0xff]  ;;  %v3224_v45 = vld [vmem:[%s4693_s1 + $0xf0] sm:$0xff]  ;;  %vm1034_vm1 = vcmask 1045504   ;;  %s4609_s30 = scalar_lea.vmem %s4696_s4, %s3192_s24  ;;  %vm2675_vm2 = vcmask 1040384  }
  0x10   : > { %3443 = vmatpush.bf16.msra.mxu1 %v3208_v2  ;;  %3444 = vmatpush.bf16.msra.mxu2 %v3208_v2  ;;  %v3412_v5 = vld [vmem:[%s3542_s27 + $0x18] sm:$0xff]   ;;  %406 = vst [vmem:[#allocation2 + $0x10] sm:$0x3] %v4698_v1  ;;  %v3413_v35 = vld [vmem:[%s3542_s27 + $0x20] sm:$0xff]   ;;  %v3200_v51 = vld [vmem:[%s4693_s1 + $0x30] sm:$0xff]  ;;  %s2773_s24 = sshll.u32 %s4833_s19, 1 }
  0x11   : > { %3445 = vmatpush.bf16.msra.mxu3 %v3208_v2  ;;  %809 = vmatpush.bf16.msra.mxu0 %v3208_v2  ;;  %v3280_v6 = vunpack.c.l.bf16 %v3412_v5  ;;  %v3281_v7 = vunpack.c.h.bf16 %v3412_v5  ;;  %408 = vst [vmem:[#allocation2 + $0x198] sm:$0xff] %v4698_v1  ;;  %v3416_v20 = vld [vmem:[%s3542_s27 + $0x38] sm:$0xff]   ;;  %v3284_v46 = vunpack.c.l.bf16 %v3413_v35  ;;  %v3417_v47 = vld [vmem:[%s3542_s27 + $0x40] sm:$0xff]   ;;  %v3285_v52 = vunpack.c.h.bf16 %v3413_v35  ;;  %s235_s8 = scalar_lea.vmem %s4697_s5, %s2773_s24 }
  0x12   : > { %410 = vst [vmem:[#allocation2 + $0x1a8] sm:$0x3] %v4698_v1  ;;  %v3420_v26 = vld [vmem:[%s3542_s27 + $0x58] sm:$0xff]   ;;  %v3296_v30 = vunpack.c.l.bf16 %v3416_v20  ;;  %v3297_v31 = vunpack.c.h.bf16 %v3416_v20  ;;  %v3421_v48 = vld [vmem:[%s3542_s27 + $0x60] sm:$0xff]   ;;  %v3300_v54 = vunpack.c.l.bf16 %v3417_v47  ;;  %v3301_v55 = vunpack.c.h.bf16 %v3417_v47 }
  0x13   : > { %v311_v9 = vmul.f32 %v3547_v3, %v3280_v6  ;;  %v312_v10 = vmul.f32 %v3547_v3, %v3281_v7  ;;  %412 = vst [vmem:[#allocation2 + $0x18] sm:$0x1] %v4698_v1  ;;  %v3312_v32 = vunpack.c.l.bf16 %v3420_v26  ;;  %v3313_v33 = vunpack.c.h.bf16 %v3420_v26  ;;  %v3201_v40 = vld [vmem:[%s4693_s1 + $0x38] sm:$0xff]  ;;  %v3267_v59 = vld [vmem:[%s3542_s27] sm:$0xff]  }
  0x14   : > { %3446 = vmatpush.bf16.msra.mxu1 %v3207_v4  ;;  %3447 = vmatpush.bf16.msra.mxu2 %v3207_v4  ;;  %413 = vst [vmem:[#allocation2 + $0x30] sm:$0x1] %v4698_v1  ;;  %v319_v36 = vmul.f32 %v3547_v3, %v3296_v30  ;;  %v320_v37 = vmul.f32 %v3547_v3, %v3297_v31  ;;  %v3233_v42 = vld [vmem:[%s4693_s1 + $0x138] sm:$0xff]  ;;  %v3316_v58 = vunpack.c.l.bf16 %v3421_v48  ;;  %v3317_v60 = vunpack.c.h.bf16 %v3421_v48  ;;  %v3199_v48 = vld [vmem:[%s4693_s1 + $0x28] sm:$0xff] }
  0x15   : > { %3448 = vmatpush.bf16.msra.mxu3 %v3207_v4  ;;  %810 = vmatpush.bf16.msra.mxu0 %v3207_v4  ;;  %v346_v12 = vadd.f32 %v3558_v8, %v311_v9  ;;  %v347_v13 = vadd.f32 %v3558_v8, %v312_v10  ;;  %414 = vst [vmem:[#allocation2 + $0x48] sm:$0x1] %v4698_v1  ;;  %v3268_v5 = vunpack.c.l.bf16 %v3267_v59  ;;  %v3269_v10 = vunpack.c.h.bf16 %v3267_v59  ;;  %v3231_v59 = vld [vmem:[%s4693_s1 + $0x128] sm:$0xff] }
  0x16   : > { %416 = vst [vmem:[#allocation2 + $0x78] sm:$0x1] %v4698_v1  ;;  %v327_v41 = vmul.f32 %v3547_v3, %v3312_v32  ;;  %v328_v43 = vmul.f32 %v3547_v3, %v3313_v33  ;;  %v354_v49 = vadd.f32 %v3558_v8, %v319_v36  ;;  %v355_v50 = vadd.f32 %v3558_v8, %v320_v37 }
  0x17   : > { %v378_v14 = vmax.f32 %v346_v12, 0.0  ;;  %v379_v15 = vmax.f32 %v347_v13, 0.0  ;;  %417 = vst [vmem:[#allocation2 + $0x90] sm:$0x1] %v4698_v1  ;;  %v313_v57 = vmul.f32 %v3547_v3, %v3284_v46  ;;  %v314_v63 = vmul.f32 %v3547_v3, %v3285_v52  ;;  %v3418_v12 = vld [vmem:[%s3542_s27 + $0x48] sm:$0xff]  }
  0x18   : > { %3449 = vmatpush.bf16.msra.mxu1 %v3206_v11  ;;  %3450 = vmatpush.bf16.msra.mxu2 %v3206_v11  ;;  %418 = vst [vmem:[#allocation2 + $0xa8] sm:$0x1] %v4698_v1  ;;  %v3652_v53 = vadd.f32 %v3558_v8, %v327_v41  ;;  %v3656_v56 = vadd.f32 %v3558_v8, %v328_v43  ;;  %v386_v61 = vmax.f32 %v354_v49, 0.0  ;;  %v387_v62 = vmax.f32 %v355_v50, 0.0  ;;  %v3422_v13 = vld [vmem:[%s3542_s27 + $0x68] sm:$0xff]  }
  0x19   : > { %3451 = vmatpush.bf16.msra.mxu3 %v3206_v11  ;;  %811 = vmatpush.bf16.msra.mxu0 %v3206_v11  ;;  %454 = vst [vmem:[#allocation2 + $0x61] sm:$0xff] %v378_v14  ;;  %v321_v2 = vmul.f32 %v3547_v3, %v3300_v54  ;;  %v322_v4 = vmul.f32 %v3547_v3, %v3301_v55  ;;  %v3414_v11 = vld [vmem:[%s3542_s27 + $0x28] sm:$0xff]   ;;  %v3222_v54 = vld [vmem:[%s4693_s1 + $0xe0] sm:$0xff] }
  0x1a   : > { %455 = vst [vmem:[#allocation2 + $0x69] sm:$0xff] %v379_v15  ;;  %v394_v0 = vmax.f32 %v3652_v53, 0.0  ;;  %v395_v6 = vmax.f32 %v3656_v56, 0.0  ;;  %v3670_v7 = vadd.f32 %v3558_v8, %v313_v57  ;;  %v329_v9 = vmul.f32 %v3547_v3, %v3316_v58  ;;  %v3223_v41 = vld [vmem:[%s4693_s1 + $0xe8] sm:$0xff]  ;;  %v3214_v53 = vld [vmem:[%s4693_s1 + $0xa0] sm:$0xff] }
  0x1b   : > { %419 = vst [vmem:[#allocation2 + $0xc0] sm:$0x1] %v4698_v1  ;;  %v330_v14 = vmul.f32 %v3547_v3, %v3317_v60  ;;  %v3288_v15 = vunpack.c.l.bf16 %v3414_v11  ;;  %v349_v20 = vadd.f32 %v3558_v8, %v314_v63  ;;  %v356_v26 = vadd.f32 %v3558_v8, %v321_v2  ;;  %v3198_v60 = vld [vmem:[%s4693_s1 + $0x20] sm:$0xff] }
  0x1c   : > { %3452 = vmatpush.bf16.msra.mxu1 %v3205_v16  ;;  %3453 = vmatpush.bf16.msra.mxu2 %v3205_v16  ;;  %420 = vst [vmem:[#allocation2 + $0xd8] sm:$0x1] %v4698_v1  ;;  %v380_v30 = vmax.f32 %v3670_v7, 0.0  ;;  %v306_v31 = vmul.f32 %v3547_v3, %v3269_v10  ;;  %v3694_v35 = vadd.f32 %v3558_v8, %v329_v9 }
  0x1d   : > { %3454 = vmatpush.bf16.msra.mxu3 %v3205_v16  ;;  %812 = vmatpush.bf16.msra.mxu0 %v3205_v16  ;;  %421 = vst [vmem:[#allocation2 + $0xf0] sm:$0x1] %v4698_v1  ;;  %v3289_v16 = vunpack.c.h.bf16 %v3414_v11  ;;  %v315_v32 = vmul.f32 %v3547_v3, %v3288_v15  ;;  %v3697_v36 = vadd.f32 %v3558_v8, %v330_v14  ;;  %v388_v46 = vmax.f32 %v356_v26, 0.0 }
  0x1e   : > { %422 = vst [vmem:[#allocation2 + $0x108] sm:$0x1] %v4698_v1  ;;  %v3722_v52 = vadd.f32 %v3558_v8, %v306_v31  ;;  %v396_v57 = vmax.f32 %v3694_v35, 0.0 }
  0x1f   : > { %423 = vst [vmem:[#allocation2 + $0x120] sm:$0x1] %v4698_v1  ;;  %v316_v37 = vmul.f32 %v3547_v3, %v3289_v16  ;;  %v3731_v55 = vadd.f32 %v3558_v8, %v315_v32  ;;  %v397_v58 = vmax.f32 %v3697_v36, 0.0 }
  0x20   : > { %3455 = vmatpush.bf16.msra.mxu1 %v3204_v17  ;;  %3456 = vmatpush.bf16.msra.mxu2 %v3204_v17  ;;  %v3588_v19 = vld [vmem:[#allocation2 + $0x60] sm:$0xff]  ;;  %424 = vst [vmem:[#allocation2 + $0x138] sm:$0x1] %v4698_v1  ;;  %v373_v15 = vmax.f32 %v3722_v52, 0.0 }
  0x21   : > { %3457 = vmatpush.bf16.msra.mxu3 %v3204_v17  ;;  %813 = vmatpush.bf16.msra.mxu0 %v3204_v17  ;;  %v3592_v21 = vld [vmem:[#allocation2 + $0x68] sm:$0xff]  ;;  %v3594_v22 = vld [vmem:[#allocation2 + $0x70] sm:$0x3]  ;;  %v635_v23 = vrot.slane %v3588_v19, 1  ;;  %425 = vst [vmem:[#allocation2 + $0x150] sm:$0x1] %v4698_v1  ;;  %v3304_v17 = vunpack.c.l.bf16 %v3418_v12 }
  0x22   : > { %v636_v24 = vrot.slane %v3592_v21, 1  ;;  %v638_v25 = vrot.slane %v3594_v22, 1  ;;  %426 = vst [vmem:[#allocation2 + $0x168] sm:$0x1] %v4698_v1  ;;  %v382_v16 = vmax.f32 %v3731_v55, 0.0 }
  0x23   : > { %427 = vst [vmem:[#allocation2 + $0x180] sm:$0x1] %v4698_v1 }
  0x24   : > { %3458 = vmatpush.bf16.msra.mxu1 %v3203_v18  ;;  %3459 = vmatpush.bf16.msra.mxu2 %v3203_v18  ;;  %v637_v28 = vsel %vm614_vm0, %v635_v23, %v636_v24  ;;  %v639_v29 = vsel %vm614_vm0, %v636_v24, %v638_v25  ;;  %430 = vst [vmem:[#allocation2 + $0x29] sm:$0x1] %v4698_v1  ;;  %v3305_v23 = vunpack.c.h.bf16 %v3418_v12  ;;  %v3320_v24 = vunpack.c.l.bf16 %v3422_v13  ;;  %v3410_v25 = vld [vmem:[%s3542_s27 + $0x8] sm:$0xff]  }
  0x25   : > { %3460 = vmatpush.bf16.msra.mxu3 %v3203_v18  ;;  %814 = vmatpush.bf16.msra.mxu0 %v3203_v18  ;;  %431 = vst [vmem:[#allocation2 + $0x41] sm:$0x1] %v4698_v1  ;;  %v3611_v34 = vpack.c.bf16 %v639_v29, %v637_v28  ;;  %v3679_v18 = vrot.slane %v4698_v1, 1  ;;  %v305_v28 = vmul.f32 %v3547_v3, %v3268_v5  ;;  %v3321_v29 = vunpack.c.h.bf16 %v3422_v13 }
  0x26   : > { %432 = vst [vmem:[#allocation2 + $0x59] sm:$0x1] %v4698_v1  ;;  %v3272_v33 = vunpack.c.l.bf16 %v3410_v25  ;;  %v324_v43 = vmul.f32 %v3547_v3, %v3305_v23 }
  0x27   : > { %434 = vst [vmem:[#allocation2 + $0x89] sm:$0x1] %v4698_v1  ;;  %v332_v49 = vmul.f32 %v3547_v3, %v3321_v29 }
  0x28   : > { %3461 = vmatpush.bf16.msra.mxu1 %v3202_v27  ;;  %3462 = vmatpush.bf16.msra.mxu2 %v3202_v27  ;;  %435 = vst [vmem:[#allocation2 + $0xa1] sm:$0x1] %v4698_v1  ;;  %v307_v50 = vmul.f32 %v3547_v3, %v3272_v33 }
  0x29   : > { %3463 = vmatpush.bf16.msra.mxu3 %v3202_v27  ;;  %815 = vmatpush.bf16.msra.mxu0 %v3202_v27  ;;  %436 = vst [vmem:[#allocation2 + $0xb9] sm:$0x1] %v4698_v1  ;;  %v3685_v27 = vadd.f32 %v3558_v8, %v322_v4  ;;  %v3755_v4 = vadd.f32 %v3558_v8, %v324_v43 }
  0x2a   : > { %437 = vst [vmem:[#allocation2 + $0xd1] sm:$0x1] %v4698_v1  ;;  %v3766_v11 = vadd.f32 %v3558_v8, %v332_v49  ;;  %v3769_v12 = vadd.f32 %v3558_v8, %v307_v50 }
  0x2b   : > { %836 = vmatmul.bf16.vlgmr.msra.gmra.mxu1 %v3611_v34  ;;  %438 = vst [vmem:[#allocation2 + $0xe9] sm:$0x1] %v4698_v1  ;;  %v389_v47 = vmax.f32 %v3685_v27, 0.0  ;;  %v391_v31 = vmax.f32 %v3755_v4, 0.0 }
  0x2c   : > { %1228 = vmatpush.bf16.msrb.mxu2 %v3217_v38  ;;  %945 = vmatpush.bf16.msrb.mxu1 %v3201_v40  ;;  %439 = vst [vmem:[#allocation2 + $0x101] sm:$0x1] %v4698_v1  ;;  %v323_v38 = vmul.f32 %v3547_v3, %v3304_v17  ;;  %v3215_v40 = vld [vmem:[%s4693_s1 + $0xa8] sm:$0xff]  ;;  %v399_v33 = vmax.f32 %v3766_v11, 0.0  ;;  %v374_v35 = vmax.f32 %v3769_v12, 0.0 }
  0x2d   : > { %1415 = vmatpush.bf16.msrb.mxu3 %v3225_v39  ;;  %1612 = vmatpush.bf16.msrb.mxu0 %v3233_v42  ;;  %440 = vst [vmem:[#allocation2 + $0x119] sm:$0x1] %v4698_v1  ;;  %v381_v39 = vmax.f32 %v349_v20, 0.0  ;;  %v3232_v42 = vld [vmem:[%s4693_s1 + $0x130] sm:$0xff] }
  0x2e   : > { %441 = vst [vmem:[#allocation2 + $0x131] sm:$0x1] %v4698_v1 }
  0x2f   : > { %442 = vst [vmem:[#allocation2 + $0x149] sm:$0x1] %v4698_v1 }
  0x30   : > { %1229 = vmatpush.bf16.msrb.mxu2 %v3216_v44  ;;  %946 = vmatpush.bf16.msrb.mxu1 %v3200_v51  ;;  %443 = vst [vmem:[#allocation2 + $0x161] sm:$0x1] %v4698_v1  ;;  %v331_v44 = vmul.f32 %v3547_v3, %v3320_v24  ;;  %v340_v51 = vadd.f32 %v3558_v8, %v305_v28 }
  0x31   : > { %1416 = vmatpush.bf16.msrb.mxu3 %v3224_v45  ;;  %444 = vst [vmem:[#allocation2 + $0x179] sm:$0x1] %v4698_v1  ;;  %v3273_v45 = vunpack.c.h.bf16 %v3410_v25  ;;  %1613 = vmatpush.bf16.msrb.mxu0 %v3232_v42 }
  0x32   : > { %445 = vst [vmem:[#allocation2 + $0x191] sm:$0x1] %v4698_v1  ;;  %v3758_v5 = vadd.f32 %v3558_v8, %v331_v44  ;;  %v372_v14 = vmax.f32 %v340_v51, 0.0 }
  0x33   : > { %462 = vst [vmem:[#allocation2 + $0xc1] sm:$0xff] %v386_v61  ;;  %v3744_v61 = vadd.f32 %v3558_v8, %v316_v37 }
  0x34   : > { %463 = vst [vmem:[#allocation2 + $0xc9] sm:$0xff] %v387_v62  ;;  %1230 = vmatpush.bf16.msrb.mxu2 %v3215_v40  ;;  %947 = vmatpush.bf16.msrb.mxu1 %v3199_v48  ;;  %v3747_v62 = vadd.f32 %v3558_v8, %v323_v38  ;;  %v398_v32 = vmax.f32 %v3758_v5, 0.0  ;;  %v3415_v40 = vld [vmem:[%s3542_s27 + $0x30] sm:$0xff]  }
  0x35   : > { %411 = vst [vmem:[#allocation2] sm:$0x1] %v4698_v1  ;;  %1417 = vmatpush.bf16.msrb.mxu3 %v3223_v41  ;;  %1614 = vmatpush.bf16.msrb.mxu0 %v3231_v59  ;;  %v383_v24 = vmax.f32 %v3744_v61, 0.0  ;;  %v3293_v50 = vunpack.c.h.bf16 %v3415_v40 }
  0x36   : > { %428 = vst [vmem:[#allocation2 + $0x198] sm:$0x1] %v4698_v1  ;;  %v390_v25 = vmax.f32 %v3747_v62, 0.0 }
  0x37   : > { %429 = vst [vmem:[#allocation2 + $0x11] sm:$0x1] %v4698_v1 }
  0x38   : > { %446 = vst [vmem:[#allocation2 + $0x1a9] sm:$0x1] %v4698_v1  ;;  %1231 = vmatpush.bf16.msrb.mxu2 %v3214_v53  ;;  %948 = vmatpush.bf16.msrb.mxu1 %v3198_v60 }
  0x39   : > { %470 = vst [vmem:[#allocation2 + $0x121] sm:$0xff] %v394_v0  ;;  %1418 = vmatpush.bf16.msrb.mxu3 %v3222_v54 }
  0x3a   : > { %v3733_v56 = vld [vmem:[#allocation2 + $0xc0] sm:$0xff]  ;;  %471 = vst [vmem:[#allocation2 + $0x129] sm:$0xff] %v395_v6  ;;  %v308_v6 = vmul.f32 %v3547_v3, %v3273_v45  ;;  %v3292_v45 = vunpack.c.l.bf16 %v3415_v40 }
  0x3b   : > { %v3749_v63 = vld [vmem:[#allocation2 + $0xc8] sm:$0xff]  ;;  %v3751_v0 = vld [vmem:[#allocation2 + $0xd0] sm:$0x3]  ;;  %v655_v2 = vrot.slane %v3733_v56, 1  ;;  %456 = vst [vmem:[#allocation2 + $0x79] sm:$0xff] %v380_v30 }
  0x3c   : > { %v656_v7 = vrot.slane %v3749_v63, 1  ;;  %v658_v9 = vrot.slane %v3751_v0, 1  ;;  %v3763_v10 = vld [vmem:[#allocation2] sm:$0xff]  ;;  %457 = vst [vmem:[#allocation2 + $0x81] sm:$0xff] %v381_v39  ;;  %v3786_v29 = vadd.f32 %v3558_v8, %v308_v6  ;;  %v317_v62 = vmul.f32 %v3547_v3, %v3292_v45 }
  0x3d   : > { %v615_v13 = vrot.slane %v3763_v10, 1  ;;  %464 = vst [vmem:[#allocation2 + $0xd9] sm:$0xff] %v388_v46  ;;  %v3808_v46 = vld [vmem:[%s3542_s27 + $0x50] sm:$0xff]  }
  0x3e   : > { %v657_v17 = vsel %vm614_vm0, %v655_v2, %v656_v7  ;;  %v659_v20 = vsel %vm614_vm0, %v656_v7, %v658_v9  ;;  %v3776_v23 = vld [vmem:[#allocation2 + $0x10] sm:$0x3]  ;;  %465 = vst [vmem:[#allocation2 + $0xe1] sm:$0xff] %v389_v47  ;;  %v3308_v51 = vunpack.c.l.bf16 %v3808_v46  ;;  %v318_v2 = vmul.f32 %v3547_v3, %v3293_v50 }
  0x3f   : > { %v3780_v26 = vpack.c.bf16 %v659_v20, %v657_v17  ;;  %v617_v27 = vsel %vm614_vm0, %v615_v13, %v3679_v18  ;;  %v618_v28 = vrot.slane %v3776_v23, 1  ;;  %472 = vst [vmem:[#allocation2 + $0x139] sm:$0xff] %v396_v57 }
  0x40   : > { %v3788_v30 = vld [vmem:[#allocation2 + $0x120] sm:$0xff]  ;;  %473 = vst [vmem:[#allocation2 + $0x141] sm:$0xff] %v397_v58 }
  0x41   : > { %4738 = vst [vmem:[#allocation3_spill] sm:$0xff] %v3780_v26  ;;  %856 = vmatmul.bf16.vlgmr.msra.gmra.mxu2 %v3780_v26  ;;  %v3795_v36 = vld [vmem:[#allocation2 + $0x128] sm:$0xff]  ;;  %v3797_v37 = vld [vmem:[#allocation2 + $0x130] sm:$0x3]  ;;  %v675_v38 = vrot.slane %v3788_v30, 1  ;;  %v619_v39 = vsel %vm614_vm0, %v3679_v18, %v618_v28  ;;  %v375_v18 = vmax.f32 %v3786_v29, 0.0 }
  0x42   : > { %4739 = vst [vmem:[#allocation4_spill] sm:$0xff] %v3788_v30  ;;  %v676_v41 = vrot.slane %v3795_v36, 1  ;;  %v678_v42 = vrot.slane %v3797_v37, 1  ;;  %v727_v43 = vpack.c.bf16 %v619_v39, %v617_v27  ;;  %v3805_v44 = vld [vmem:[#allocation2 + $0x78] sm:$0xff]  ;;  %v353_v27 = vadd.f32 %v3558_v8, %v318_v2 }
  0x43   : > { %4740 = vst [vmem:[#allocation5_spill] sm:$0xff] %v3795_v36  ;;  %v3810_v47 = vld [vmem:[#allocation2 + $0x80] sm:$0xff]  ;;  %v3812_v48 = vld [vmem:[#allocation2 + $0x88] sm:$0x3]  ;;  %v640_v49 = vrot.slane %v3805_v44, 1 }
  0x44   : > { %4741 = vst [vmem:[#allocation6_spill] sm:$0xff] %v3797_v37  ;;  %v677_v52 = vsel %vm614_vm0, %v675_v38, %v676_v41  ;;  %v679_v53 = vsel %vm614_vm0, %v676_v41, %v678_v42  ;;  %816 = vmatmul.bf16.vlgmr.msra.gmra.mxu0 %v727_v43  ;;  %v641_v54 = vrot.slane %v3810_v47, 1  ;;  %v643_v55 = vrot.slane %v3812_v48, 1  ;;  %v3821_v57 = vld [vmem:[#allocation2 + $0xd8] sm:$0xff]  ;;  %v3220_v42 = vld [vmem:[%s4693_s1 + $0xd0] sm:$0xff] }
  0x45   : > { %448 = vst [vmem:[#allocation2 + $0x19] sm:$0xff] %v372_v14  ;;  %v3823_v58 = vpack.c.bf16 %v679_v53, %v677_v52  ;;  %v3825_v59 = vld [vmem:[#allocation2 + $0xe0] sm:$0xff]  ;;  %v3827_v60 = vld [vmem:[#allocation2 + $0xe8] sm:$0x3]  ;;  %v660_v61 = vrot.slane %v3821_v57, 1  ;;  %v3213_v14 = vld [vmem:[%s4693_s1 + $0x98] sm:$0xff]  ;;  %v325_v38 = vmul.f32 %v3547_v3, %v3308_v51 }
  0x46   : > { %449 = vst [vmem:[#allocation2 + $0x21] sm:$0xff] %v373_v15  ;;  %v642_v4 = vsel %vm614_vm0, %v640_v49, %v641_v54  ;;  %v644_v5 = vsel %vm614_vm0, %v641_v54, %v643_v55  ;;  %v661_v6 = vrot.slane %v3825_v59, 1  ;;  %v663_v7 = vrot.slane %v3827_v60, 1  ;;  %v3839_v11 = vld [vmem:[#allocation2 + $0x138] sm:$0xff]  ;;  %1232 = vmatpush.bf16.msrb.mxu2 %v3213_v14  ;;  %v3196_v54 = vld [vmem:[%s4693_s1 + $0x10] sm:$0xff] }
  0x47   : > { %458 = vst [vmem:[#allocation2 + $0x91] sm:$0xff] %v382_v16  ;;  %876 = vmatmul.bf16.vlgmr.msra.gmra.mxu3 %v3823_v58  ;;  %v3837_v9 = vpack.c.bf16 %v644_v5, %v642_v4  ;;  %v3841_v12 = vld [vmem:[#allocation2 + $0x140] sm:$0xff]  ;;  %v3843_v13 = vld [vmem:[#allocation2 + $0x148] sm:$0x3]  ;;  %v352_v15 = vadd.f32 %v3558_v8, %v317_v62  ;;  %v3309_v16 = vunpack.c.h.bf16 %v3808_v46  ;;  %v3229_v46 = vld [vmem:[%s4693_s1 + $0x118] sm:$0xff]  ;;  %v680_v51 = vrot.slane %v3839_v11, 1 }
  0x48   : > { %459 = vst [vmem:[#allocation2 + $0x99] sm:$0xff] %v383_v24  ;;  %v662_v17 = vsel %vm614_vm0, %v660_v61, %v661_v6  ;;  %v3221_v24 = vld [vmem:[%s4693_s1 + $0xd8] sm:$0xff]  ;;  %v664_v28 = vsel %vm614_vm0, %v661_v6, %v663_v7  ;;  %v681_v52 = vrot.slane %v3841_v12, 1  ;;  %v683_v53 = vrot.slane %v3843_v13, 1  ;;  %v3423_v55 = vld [vmem:[%s3542_s27 + $0x70] sm:$0xff]  }
  0x49   : > { %4742 = vst [vmem:[#allocation7_spill] sm:$0xff] %v3823_v58  ;;  %841 = vmatmul.bf16.gmra.mxu1 %v3837_v9  ;;  %1419 = vmatpush.bf16.msrb.mxu3 %v3221_v24  ;;  %v384_v49 = vmax.f32 %v352_v15, 0.0  ;;  %v3889_v50 = vpack.c.bf16 %v664_v28, %v662_v17  ;;  %v385_v2 = vmax.f32 %v353_v27, 0.0  ;;  %v360_v4 = vadd.f32 %v3558_v8, %v325_v38  ;;  %v3411_v27 = vld [vmem:[%s3542_s27 + $0x10] sm:$0xff]  }
  0x4a   : > { %466 = vst [vmem:[#allocation2 + $0xf1] sm:$0xff] %v390_v25  ;;  %v3230_v25 = vld [vmem:[%s4693_s1 + $0x120] sm:$0xff]  ;;  %v682_v17 = vsel %vm614_vm0, %v680_v51, %v681_v52  ;;  %v684_v24 = vsel %vm614_vm0, %v681_v52, %v683_v53  ;;  %v3277_v51 = vunpack.c.h.bf16 %v3411_v27 }
  0x4b   : > { %467 = vst [vmem:[#allocation2 + $0xf9] sm:$0xff] %v391_v31  ;;  %1615 = vmatpush.bf16.msrb.mxu0 %v3230_v25  ;;  %v392_v15 = vmax.f32 %v360_v4, 0.0 }
  0x4c   : > { %4743 = vst [vmem:[#allocation8_spill] sm:$0xff] %v3837_v9  ;;  %v3851_v20 = vld [vmem:[#allocation2 + $0x18] sm:$0xff] }
  0x4d   : > { %4744 = vst [vmem:[#allocation9_spill] sm:$0xff] %v3839_v11  ;;  %v3862_v29 = vld [vmem:[#allocation2 + $0x20] sm:$0xff]  ;;  %v3864_v31 = vld [vmem:[#allocation2 + $0x28] sm:$0x3]  ;;  %1420 = vmatpush.bf16.msrb.mxu3 %v3220_v42 }
  0x4e   : > { %4745 = vst [vmem:[#allocation10_spill] sm:$0xff] %v3841_v12  ;;  %v621_v39 = vrot.slane %v3862_v29, 1  ;;  %v623_v40 = vrot.slane %v3864_v31, 1  ;;  %v3873_v41 = vld [vmem:[#allocation2 + $0x90] sm:$0xff] }
  0x4f   : > { %4746 = vst [vmem:[#allocation11_spill] sm:$0xff] %v3843_v13  ;;  %v3881_v43 = vld [vmem:[#allocation2 + $0x98] sm:$0xff]  ;;  %v3883_v45 = vld [vmem:[#allocation2 + $0xa0] sm:$0x3]  ;;  %v645_v5 = vrot.slane %v3873_v41, 1  ;;  %1616 = vmatpush.bf16.msrb.mxu0 %v3229_v46 }
  0x50   : > { %474 = vst [vmem:[#allocation2 + $0x151] sm:$0xff] %v398_v32  ;;  %v620_v32 = vrot.slane %v3851_v20, 1  ;;  %v624_v62 = vsel %vm614_vm0, %v621_v39, %v623_v40  ;;  %v646_v6 = vrot.slane %v3881_v43, 1  ;;  %v648_v7 = vrot.slane %v3883_v45, 1 }
  0x51   : > { %475 = vst [vmem:[#allocation2 + $0x159] sm:$0xff] %v399_v33  ;;  %v3197_v33 = vld [vmem:[%s4693_s1 + $0x18] sm:$0xff]  ;;  %861 = vmatmul.bf16.gmra.mxu2 %v3889_v50  ;;  %v3915_v40 = vpack.c.bf16 %v684_v24, %v682_v17  ;;  %v3211_v17 = vld [vmem:[%s4693_s1 + $0x88] sm:$0xff] }
  0x52   : > { %450 = vst [vmem:[#allocation2 + $0x31] sm:$0xff] %v374_v35  ;;  %v3212_v35 = vld [vmem:[%s4693_s1 + $0x90] sm:$0xff]  ;;  %949 = vmatpush.bf16.msrb.mxu1 %v3197_v33  ;;  %v622_v61 = vsel %vm614_vm0, %v620_v32, %v621_v39  ;;  %v3325_v32 = vunpack.c.h.bf16 %v3423_v55  ;;  %v647_v33 = vsel %vm614_vm0, %v645_v5, %v646_v6  ;;  %v649_v38 = vsel %vm614_vm0, %v646_v6, %v648_v7  ;;  %v3919_v42 = vld [vmem:[#allocation2 + $0x100] sm:$0x3]  ;;  %v3219_v24 = vld [vmem:[%s4693_s1 + $0xc8] sm:$0xff] }
  0x53   : > { %451 = vst [vmem:[#allocation2 + $0x39] sm:$0xff] %v375_v18  ;;  %v326_v18 = vmul.f32 %v3547_v3, %v3309_v16  ;;  %1233 = vmatpush.bf16.msrb.mxu2 %v3212_v35  ;;  %v3324_v16 = vunpack.c.l.bf16 %v3423_v55  ;;  %v3907_v25 = vpack.c.bf16 %v624_v62, %v622_v61  ;;  %v3913_v39 = vld [vmem:[#allocation2 + $0xf0] sm:$0xff]  ;;  %v3917_v35 = vld [vmem:[#allocation2 + $0xf8] sm:$0xff]  ;;  %v3924_v52 = vpack.c.bf16 %v649_v38, %v647_v33  ;;  %v3195_v33 = vld [vmem:[%s4693_s1 + $0x8] sm:$0xff] }
  0x54   : > { %4747 = vst [vmem:[#allocation12_spill] sm:$0xff] %v3889_v50  ;;  %v665_v53 = vrot.slane %v3913_v39, 1  ;;  %v666_v61 = vrot.slane %v3917_v35, 1  ;;  %v668_v62 = vrot.slane %v3919_v42, 1  ;;  %v310_v7 = vmul.f32 %v3547_v3, %v3277_v51  ;;  %1421 = vmatpush.bf16.msrb.mxu3 %v3219_v24 }
  0x55   : > { %460 = vst [vmem:[#allocation2 + $0xa9] sm:$0xff] %v384_v49  ;;  %v361_v14 = vadd.f32 %v3558_v8, %v326_v18  ;;  %v333_v46 = vmul.f32 %v3547_v3, %v3324_v16  ;;  %v334_v49 = vmul.f32 %v3547_v3, %v3325_v32  ;;  %v3276_v18 = vunpack.c.l.bf16 %v3411_v27  ;;  %821 = vmatmul.bf16.gmra.mxu0 %v3907_v25  ;;  %v3228_v32 = vld [vmem:[%s4693_s1 + $0x110] sm:$0xff] }
  0x56   : > { %950 = vmatpush.bf16.msrb.mxu1 %v3196_v54  ;;  %461 = vst [vmem:[#allocation2 + $0xb1] sm:$0xff] %v385_v2  ;;  %v667_v51 = vsel %vm614_vm0, %v665_v53, %v666_v61  ;;  %1617 = vmatpush.bf16.msrb.mxu0 %v3228_v32 }
  0x57   : > { %v393_v28 = vmax.f32 %v361_v14, 0.0  ;;  %468 = vst [vmem:[#allocation2 + $0x109] sm:$0xff] %v392_v15  ;;  %v368_v54 = vadd.f32 %v3558_v8, %v333_v46  ;;  %v369_v55 = vadd.f32 %v3558_v8, %v334_v49  ;;  %v309_v6 = vmul.f32 %v3547_v3, %v3276_v18  ;;  %881 = vmatmul.bf16.gmra.mxu3 %v3915_v40  ;;  %v3940_v14 = vld [vmem:[#allocation2 + $0x150] sm:$0xff] }
  0x58   : > { %4748 = vst [vmem:[#allocation13_spill] sm:$0xff] %v3915_v40  ;;  %v3948_v27 = vld [vmem:[#allocation2 + $0x160] sm:$0x3]  ;;  %v345_v3 = vadd.f32 %v3558_v8, %v310_v7  ;;  %v3959_v38 = vld [vmem:[#allocation2 + $0x158] sm:$0xff]  ;;  %1234 = vmatpush.bf16.msrb.mxu2 %v3211_v17  ;;  %v3227_v17 = vld [vmem:[%s4693_s1 + $0x108] sm:$0xff] }
  0x59   : > { %469 = vst [vmem:[#allocation2 + $0x111] sm:$0xff] %v393_v28  ;;  %v3931_v2 = vld [vmem:[#allocation2 + $0x30] sm:$0xff]  ;;  %v400_v15 = vmax.f32 %v368_v54, 0.0  ;;  %v401_v16 = vmax.f32 %v369_v55, 0.0  ;;  %v344_v28 = vadd.f32 %v3558_v8, %v309_v6  ;;  %846 = vmatmul.bf16.gmra.mxu1 %v3924_v52  ;;  %v3210_v8 = vld [vmem:[%s4693_s1 + $0x80] sm:$0xff]  ;;  %v669_v54 = vsel %vm614_vm0, %v666_v61, %v668_v62 }
  0x5a   : > { %4749 = vst [vmem:[#allocation14_spill] sm:$0xff] %v3924_v52  ;;  %v3933_v4 = vld [vmem:[#allocation2 + $0x38] sm:$0xff]  ;;  %v3935_v5 = vld [vmem:[#allocation2 + $0x40] sm:$0x3]  ;;  %v625_v46 = vrot.slane %v3931_v2, 1  ;;  %v377_v7 = vmax.f32 %v345_v3, 0.0  ;;  %951 = vmatpush.bf16.msrb.mxu1 %v3195_v33  ;;  %1618 = vmatpush.bf16.msrb.mxu0 %v3227_v17 }
  0x5b   : > { %4750 = vst [vmem:[#allocation15_spill] sm:$0xff] %v3940_v14  ;;  %v626_v49 = vrot.slane %v3933_v4, 1  ;;  %v628_v18 = vrot.slane %v3935_v5, 1  ;;  %v376_v6 = vmax.f32 %v344_v28, 0.0  ;;  %v3194_v61 = vld [vmem:[%s4693_s1] sm:$0xff]  ;;  %v685_v62 = vrot.slane %v3940_v14, 1 }
  0x5c   : > { %4751 = vst [vmem:[#allocation16_spill] sm:$0xff] %v3948_v27  ;;  %v3969_v55 = vld [vmem:[#allocation2 + $0xa8] sm:$0xff]  ;;  %v688_v24 = vrot.slane %v3948_v27, 1  ;;  %v3987_v28 = vpack.c.bf16 %v669_v54, %v667_v51  ;;  %1235 = vmatpush.bf16.msrb.mxu2 %v3210_v8 }
  0x5d   : > { %4752 = vst [vmem:[#allocation17_spill] sm:$0xff] %v3959_v38  ;;  %v3977_v1 = vld [vmem:[#allocation2 + $0xb0] sm:$0xff]  ;;  %v3979_v53 = vld [vmem:[#allocation2 + $0xb8] sm:$0x3]  ;;  %v627_v3 = vsel %vm614_vm0, %v625_v46, %v626_v49  ;;  %v629_v32 = vsel %vm614_vm0, %v626_v49, %v628_v18  ;;  %v650_v33 = vrot.slane %v3969_v55, 1 }
  0x5e   : > { %476 = vst [vmem:[#allocation2 + $0x169] sm:$0xff] %v400_v15  ;;  %v3218_v15 = vld [vmem:[%s4693_s1 + $0xc0] sm:$0xff]  ;;  %v651_v13 = vrot.slane %v3977_v1, 1  ;;  %v653_v40 = vrot.slane %v3979_v53, 1  ;;  %952 = vmatpush.bf16.msrb.mxu1 %v3194_v61  ;;  %v3999_v49 = vpack.c.bf16 %v629_v32, %v627_v3  ;;  %v4004_v54 = vld [vmem:[#allocation2 + $0x108] sm:$0xff]  ;;  %v3249_v32 = vld [vmem:[%s4693_s1 + $0x1b8] sm:$0xff] }
  0x5f   : > { %477 = vst [vmem:[#allocation2 + $0x171] sm:$0xff] %v401_v16  ;;  %v686_v16 = vrot.slane %v3959_v38, 1  ;;  %1422 = vmatpush.bf16.msrb.mxu3 %v3218_v15 }
  0x60   : > { %452 = vst [vmem:[#allocation2 + $0x49] sm:$0xff] %v376_v6  ;;  %v3226_v6 = vld [vmem:[%s4693_s1 + $0x100] sm:$0xff]  ;;  %v652_v18 = vsel %vm614_vm0, %v650_v33, %v651_v13  ;;  %v654_v8 = vsel %vm614_vm0, %v651_v13, %v653_v40  ;;  %v4008_v15 = vld [vmem:[#allocation2 + $0x110] sm:$0xff]  ;;  %v4010_v17 = vld [vmem:[#allocation2 + $0x118] sm:$0x3]  ;;  %1993 = vmatpush.bf16.msra.mxu2 %v3249_v32 }
  0x61   : > { %453 = vst [vmem:[#allocation2 + $0x51] sm:$0xff] %v377_v7  ;;  %v687_v51 = vsel %vm614_vm0, %v685_v62, %v686_v16  ;;  %v689_v46 = vsel %vm614_vm0, %v686_v16, %v688_v24  ;;  %866 = vmatmul.bf16.gmra.mxu2 %v3987_v28  ;;  %1619 = vmatpush.bf16.msrb.mxu0 %v3226_v6  ;;  %v670_v62 = vrot.slane %v4004_v54, 1  ;;  %v671_v16 = vrot.slane %v4008_v15, 1  ;;  %v3257_v33 = vld [vmem:[%s4693_s1 + $0x1f8] sm:$0xff] }
  0x62   : > { %v4006_v7 = vpack.c.bf16 %v689_v46, %v687_v51  ;;  %4754 = vst [vmem:[#allocation19_spill] sm:$0xff] %v4010_v17  ;;  %v4013_v61 = vpack.c.bf16 %v654_v8, %v652_v18  ;;  %v673_v24 = vrot.slane %v4010_v17, 1  ;;  %v3241_v6 = vld [vmem:[%s4693_s1 + $0x178] sm:$0xff] }
  0x63   : > { %v3265_v46 = vld [vmem:[%s4693_s1 + $0x238] sm:$0xff]  ;;  %v672_v14 = vsel %vm614_vm0, %v670_v62, %v671_v16  ;;  %2190 = vmatpush.bf16.msra.mxu3 %v3257_v33  ;;  %1806 = vmatpush.bf16.msra.mxu1 %v3241_v6  ;;  %v534_v33 = vpack.c.bf16 0.0, %v3763_v10  ;;  %v3256_v6 = vld [vmem:[%s4693_s1 + $0x1f0] sm:$0xff] }
  0x64   : > { %4753 = vst [vmem:[#allocation18_spill] sm:$0xff] %v4006_v7  ;;  %v674_v12 = vsel %vm614_vm0, %v671_v16, %v673_v24 }
  0x65   : > { %826 = vmatmul.bf16.gmra.mxu0 %v3999_v49  ;;  %4755 = vst [vmem:[#allocation20_spill] sm:$0xff] %v4013_v61  ;;  %v4034_v51 = vld [vmem:[#allocation2 + $0x168] sm:$0xff]  ;;  %v4052_v36 = vpack.c.bf16 %v674_v12, %v672_v14  ;;  %v1038_v12 = vrot.slane %v3776_v23, 2  ;;  %v1035_v14 = vrot.slane %v3763_v10, 2  ;;  %v1040_v23 = vrot.slane %v3851_v20, 2 }
  0x66   : > { %v4040_v18 = vld [vmem:[#allocation2 + $0x170] sm:$0xff]  ;;  %v4042_v8 = vld [vmem:[#allocation2 + $0x178] sm:$0x3]  ;;  %2384 = vmatpush.bf16.msra.mxu0 %v3265_v46  ;;  %v690_v11 = vrot.slane %v4034_v51, 1  ;;  %v1041_v10 = vrot.slane %v3862_v29, 2 }
  0x67   : > { %v4018_v13 = vld [vmem:[#allocation2 + $0x48] sm:$0xff]  ;;  %886 = vmatmul.bf16.gmra.mxu3 %v4006_v7  ;;  %v691_v37 = vrot.slane %v4040_v18, 1  ;;  %v693_v58 = vrot.slane %v4042_v8, 1  ;;  %4756 = vst [vmem:[#allocation21_spill] sm:$0xff] %v4052_v36  ;;  %v3240_v46 = vld [vmem:[%s4693_s1 + $0x170] sm:$0xff] }
  0x68   : > { %v4020_v40 = vld [vmem:[#allocation2 + $0x50] sm:$0xff]  ;;  %v4022_v3 = vld [vmem:[#allocation2 + $0x58] sm:$0x3]  ;;  %v630_v27 = vrot.slane %v4018_v13, 1  ;;  %2191 = vmatpush.bf16.msra.mxu3 %v3256_v6  ;;  %1807 = vmatpush.bf16.msra.mxu1 %v3240_v46  ;;  %v1056_v6 = vrot.slane %v3592_v21, 2  ;;  %v1058_v46 = vrot.slane %v3594_v22, 2 }
  0x69   : > { %851 = vmatmul.bf16.gmra.mxu1 %v4013_v61  ;;  %v631_v7 = vrot.slane %v4020_v40, 1  ;;  %v633_v38 = vrot.slane %v4022_v3, 1  ;;  %v692_v32 = vsel %vm614_vm0, %v690_v11, %v691_v37  ;;  %v694_v62 = vsel %vm614_vm0, %v691_v37, %v693_v58 }
  0x6a   : > { %v4061_v24 = vpack.c.bf16 %v694_v62, %v692_v32  ;;  %v535_v11 = vpack.c.bf16 %v3862_v29, %v3851_v20  ;;  %v3264_v20 = vld [vmem:[%s4693_s1 + $0x230] sm:$0xff]  ;;  %v1042_v29 = vsel %vm1034_vm1, %v1040_v23, %v1041_v10  ;;  %v4096_v32 = vpack.c.bf16 %v3933_v4, %v3931_v2 }
  0x6b   : > { %v632_v30 = vsel %vm614_vm0, %v630_v27, %v631_v7  ;;  %v634_v17 = vsel %vm614_vm0, %v631_v7, %v633_v38  ;;  %v4758_v27 = vmov 0.0   ;;  %v1043_v7 = vrot.slane %v3864_v31, 2  ;;  %2385 = vmatpush.bf16.msra.mxu0 %v3264_v20 }
  0x6c   : > { %v4058_v16 = vpack.c.bf16 %v634_v17, %v632_v30  ;;  %4757 = vst [vmem:[#allocation22_spill] sm:$0xff] %v4061_v24  ;;  %v1036_v38 = vrot.slane %v4758_v27, 2  ;;  %v3248_v17 = vld [vmem:[%s4693_s1 + $0x1b0] sm:$0xff]  ;;  %v1045_v62 = vrot.slane %v3931_v2, 2  ;;  %v1050_v2 = vrot.slane %v4018_v13, 2 }
  0x6d   : > { %1994 = vmatpush.bf16.msra.mxu2 %v3248_v17  ;;  %v1044_v31 = vsel %vm1034_vm1, %v1041_v10, %v1043_v7  ;;  %v4140_v7 = vpack.c.bf16 %v3592_v21, %v3588_v19  ;;  %v1055_v17 = vrot.slane %v3588_v19, 2  ;;  %v4159_v19 = vpack.c.bf16 %v3810_v47, %v3805_v44 }
  0x6e   : > { %v1037_v30 = vsel %vm1034_vm1, %v1035_v14, %v1036_v38  ;;  %v1039_v37 = vsel %vm1034_vm1, %v1036_v38, %v1038_v12  ;;  %v1048_v12 = vrot.slane %v3935_v5, 2  ;;  %v1053_v5 = vrot.slane %v4022_v3, 2  ;;  %v3263_v3 = vld [vmem:[%s4693_s1 + $0x228] sm:$0xff] }
  0x6f   : > { %v1147_v58 = vpack.c.bf16 %v1039_v37, %v1037_v30  ;;  %v4111_v30 = vpack.c.bf16 %v4020_v40, %v4018_v13  ;;  %v3247_v37 = vld [vmem:[%s4693_s1 + $0x1a8] sm:$0xff]  ;;  %2386 = vmatpush.bf16.msra.mxu0 %v3263_v3  ;;  %v1057_v20 = vsel %vm1034_vm1, %v1055_v17, %v1056_v6 }
  0x71   : > { %871 = vmatmul.bf16.gmra.mxu2 %v4052_v36 }
  0x72   : > { %1995 = vmatpush.bf16.msra.mxu2 %v3247_v37  ;;  %v3238_v37 = vld [vmem:[%s4693_s1 + $0x160] sm:$0xff] }
  0x75   : > { %831 = vmatmul.bf16.gmra.mxu0 %v4058_v16 }
  0x77   : > { %891 = vmatmul.bf16.gmra.mxu3 %v4061_v24 }
  0x79   : > { %953 = vmatmul.bf16.vlgmr.msrb.gmra.mxu1 %v534_v33  ;;  %v1046_v33 = vrot.slane %v3933_v4, 2  ;;  %v1051_v4 = vrot.slane %v4020_v40, 2  ;;  %v3239_v40 = vld [vmem:[%s4693_s1 + $0x168] sm:$0xff] }
  0x7a   : > { %1808 = vmatpush.bf16.msra.mxu1 %v3239_v40 }
  0x7b   : > { %v1047_v14 = vsel %vm1034_vm1, %v1045_v62, %v1046_v33  ;;  %v1049_v27 = vsel %vm1034_vm1, %v1046_v33, %v1048_v12  ;;  %v1054_v13 = vsel %vm1034_vm1, %v1051_v4, %v1053_v5  ;;  %v1060_v12 = vrot.slane %v3805_v44, 2 }
  0x7c   : > { %v4106_v38 = vpack.c.bf16 %v1049_v27, %v1047_v14  ;;  %v1061_v14 = vrot.slane %v3810_v47, 2  ;;  %v1063_v27 = vrot.slane %v3812_v48, 2 }
  0x7e   : > { %v1062_v47 = vsel %vm1034_vm1, %v1060_v12, %v1061_v14  ;;  %v1064_v48 = vsel %vm1034_vm1, %v1061_v14, %v1063_v27  ;;  %1809 = vmatpush.bf16.msra.mxu1 %v3238_v37  ;;  %v1066_v12 = vrot.slane %v3881_v43, 2  ;;  %v1068_v14 = vrot.slane %v3883_v45, 2 }
  0x81   : > { %1236 = vmatmul.bf16.vlgmr.msrb.gmra.mxu2 %v1147_v58  ;;  %v3255_v58 = vld [vmem:[%s4693_s1 + $0x1e8] sm:$0xff] }
  0x82   : > { %2192 = vmatpush.bf16.msra.mxu3 %v3255_v58  ;;  %v3262_v58 = vld [vmem:[%s4693_s1 + $0x220] sm:$0xff] }
  0x83   : > { %2387 = vmatpush.bf16.msra.mxu0 %v3262_v58  ;;  %v4233_v58 = vpack.c.bf16 %v3977_v1, %v3969_v55 }
  0x85   : > { %1620 = vmatmul.bf16.vlgmr.msrb.gmra.mxu0 %v3907_v25  ;;  %v4091_v25 = vpack.c.bf16 %v1044_v31, %v1042_v29  ;;  %v1059_v29 = vsel %vm1034_vm1, %v1056_v6, %v1058_v46  ;;  %v4202_v6 = vpack.c.bf16 %v3881_v43, %v3873_v41  ;;  %4765 = vst [vmem:[#allocation29_spill] sm:$0xff] %v4233_v58 }
  0x86   : > { %v4152_v62 = vpack.c.bf16 %v1059_v29, %v1057_v20  ;;  %v1065_v29 = vrot.slane %v3873_v41, 2 }
  0x87   : > { %1423 = vmatmul.bf16.vlgmr.msrb.gmra.mxu3 %v535_v11  ;;  %4761 = vst [vmem:[#allocation25_spill] sm:$0xff] %v4202_v6 }
  0x89   : > { %958 = vmatmul.bf16.gmra.mxu1 %v535_v11  ;;  %v1052_v11 = vsel %vm1034_vm1, %v1050_v2, %v1051_v4  ;;  %v3246_v2 = vld [vmem:[%s4693_s1 + $0x1a0] sm:$0xff] }
  0x8a   : > { %v4133_v23 = vpack.c.bf16 %v1054_v13, %v1052_v11  ;;  %v3254_v4 = vld [vmem:[%s4693_s1 + $0x1e0] sm:$0xff]  ;;  %1996 = vmatpush.bf16.msra.mxu2 %v3246_v2  ;;  %v4191_v13 = vpack.c.bf16 %v1064_v48, %v1062_v47  ;;  %v1069_v47 = vsel %vm1034_vm1, %v1066_v12, %v1068_v14  ;;  %v1070_v14 = vrot.slane %v3969_v55, 2 }
  0x8b   : > { %2193 = vmatpush.bf16.msra.mxu3 %v3254_v4  ;;  %v1067_v4 = vsel %vm1034_vm1, %v1065_v29, %v1066_v12 }
  0x8c   : > { %v4222_v37 = vpack.c.bf16 %v1069_v47, %v1067_v4  ;;  %v1071_v4 = vrot.slane %v3977_v1, 2  ;;  %v1073_v47 = vrot.slane %v3979_v53, 2 }
  0x8e   : > { %4763 = vst [vmem:[#allocation27_spill] sm:$0xff] %v4222_v37  ;;  %v1072_v1 = vsel %vm1034_vm1, %v1070_v14, %v1071_v4  ;;  %v1074_v53 = vsel %vm1034_vm1, %v1071_v4, %v1073_v47  ;;  %v4276_v4 = vpack.c.bf16 %v3749_v63, %v3733_v56 }
  0x90   : > { %4769 = vst [vmem:[#allocation33_spill] sm:$0xff] %v4276_v4 }
  0x91   : > { %1241 = vmatmul.bf16.gmra.mxu2 %v4091_v25 }
  0x95   : > { %1625 = vmatmul.bf16.gmra.mxu0 %v3999_v49 }
  0x97   : > { %1428 = vmatmul.bf16.gmra.mxu3 %v4096_v32 }
  0x99   : > { %963 = vmatmul.bf16.gmra.mxu1 %v4096_v32 }
  0xa1   : > { %1246 = vmatmul.bf16.gmra.mxu2 %v4106_v38 }
  0xa5   : > { %1630 = vmatmul.bf16.gmra.mxu0 %v4058_v16 }
  0xa7   : > { %1433 = vmatmul.bf16.gmra.mxu3 %v4111_v30 }
  0xa8   : > { %v4136_v10 = vpop.f32.mrf.mxu1 }
  0xa9   : > { %968 = vmatmul.bf16.gmra.mxu1 %v4111_v30 }
  0xb0   : > { %v4150_v31 = vpop.f32.mrf.mxu1 }
  0xb1   : > { %1251 = vmatmul.bf16.gmra.mxu2 %v4133_v23 }
  0xb5   : > { %1635 = vmatmul.bf16.gmra.mxu0 %v3611_v34 }
  0xb7   : > { %1438 = vmatmul.bf16.gmra.mxu3 %v4140_v7 }
  0xb9   : > { %973 = vmatmul.bf16.gmra.mxu1 %v4140_v7 }
  0xc1   : > { %v4154_v33 = vpop.f32.mrf.mxu0  ;;  %1256 = vmatmul.bf16.gmra.mxu2 %v4152_v62 }
  0xc4   : > { %v4162_v21 = vpop.f32.mrf.mxu2 }
  0xc5   : > { %1640 = vmatmul.bf16.gmra.mxu0 %v3837_v9 }
  0xc6   : > { %v4164_v22 = vpop.f32.mrf.mxu1 }
  0xc7   : > { %1443 = vmatmul.bf16.gmra.mxu3 %v4159_v19 }
  0xc9   : > { %v4176_v5 = vpop.f32.mrf.mxu0  ;;  %978 = vmatmul.bf16.gmra.mxu1 %v4159_v19 }
  0xca   : > { %v4179_v44 = vpop.f32.mrf.mxu3 }
  0xcb   : > { %4759 = vst [vmem:[#allocation23_spill] sm:$0xff] %v4179_v44  ;;  %v4265_v44 = vpack.c.bf16 %v1074_v53, %v1072_v1  ;;  %v1078_v53 = vrot.slane %v3751_v0, 2 }
  0xcc   : > { %v4189_v11 = vpop.f32.mrf.mxu2 }
  0xcd   : > { %4767 = vst [vmem:[#allocation31_spill] sm:$0xff] %v4265_v44 }
  0xce   : > { %v4193_v40 = vpop.f32.mrf.mxu1 }
  0xd1   : > { %1261 = vmatmul.bf16.gmra.mxu2 %v4191_v13 }
  0xd2   : > { %v4195_v3 = vpop.f32.mrf.mxu0  ;;  %v4198_v17 = vpop.f32.mrf.mxu3 }
  0xd3   : > { %4760 = vst [vmem:[#allocation24_spill] sm:$0xff] %v4198_v17  ;;  %v3237_v17 = vld [vmem:[%s4693_s1 + $0x158] sm:$0xff] }
  0xd4   : > { %v4205_v46 = vpop.f32.mrf.mxu2  ;;  %1810 = vmatpush.bf16.msra.mxu1 %v3237_v17  ;;  %v1075_v17 = vrot.slane %v3733_v56, 2 }
  0xd5   : > { %1645 = vmatmul.bf16.gmra.mxu0 %v3924_v52  ;;  %v3261_v52 = vld [vmem:[%s4693_s1 + $0x218] sm:$0xff] }
  0xd6   : > { %v4207_v20 = vpop.f32.mrf.mxu1  ;;  %2388 = vmatpush.bf16.msra.mxu0 %v3261_v52  ;;  %v1076_v52 = vrot.slane %v3749_v63, 2 }
  0xd7   : > { %1448 = vmatmul.bf16.gmra.mxu3 %v4202_v6 }
  0xd9   : > { %983 = vmatmul.bf16.gmra.mxu1 %v4202_v6 }
  0xda   : > { %v4213_v27 = vpop.f32.mrf.mxu0  ;;  %v4216_v2 = vpop.f32.mrf.mxu3 }
  0xdb   : > { %4762 = vst [vmem:[#allocation26_spill] sm:$0xff] %v4216_v2 }
  0xdc   : > { %v4220_v48 = vpop.f32.mrf.mxu2 }
  0xde   : > { %v4224_v41 = vpop.f32.mrf.mxu1 }
  0xe1   : > { %1266 = vmatmul.bf16.gmra.mxu2 %v4222_v37 }
  0xe2   : > { %v4226_v43 = vpop.f32.mrf.mxu0  ;;  %v4229_v45 = vpop.f32.mrf.mxu3 }
  0xe3   : > { %4764 = vst [vmem:[#allocation28_spill] sm:$0xff] %v4229_v45  ;;  %v3245_v45 = vld [vmem:[%s4693_s1 + $0x198] sm:$0xff] }
  0xe4   : > { %v4236_v29 = vpop.f32.mrf.mxu2  ;;  %1997 = vmatpush.bf16.msra.mxu2 %v3245_v45 }
  0xe5   : > { %1650 = vmatmul.bf16.gmra.mxu0 %v4013_v61  ;;  %v3253_v61 = vld [vmem:[%s4693_s1 + $0x1d8] sm:$0xff] }
  0xe6   : > { %v4238_v12 = vpop.f32.mrf.mxu1  ;;  %2194 = vmatpush.bf16.msra.mxu3 %v3253_v61 }
  0xe7   : > { %1453 = vmatmul.bf16.gmra.mxu3 %v4233_v58 }
  0xe9   : > { %988 = vmatmul.bf16.gmra.mxu1 %v4233_v58  ;;  %v1079_v58 = vsel %vm1034_vm1, %v1076_v52, %v1078_v53 }
  0xea   : > { %v4250_v2 = vpop.f32.mrf.mxu0  ;;  %v4253_v55 = vpop.f32.mrf.mxu3 }
  0xeb   : > { %4766 = vst [vmem:[#allocation30_spill] sm:$0xff] %v4253_v55 }
  0xec   : > { %v4263_v37 = vpop.f32.mrf.mxu2 }
  0xee   : > { %v4267_v45 = vpop.f32.mrf.mxu1 }
  0xf1   : > { %1271 = vmatmul.bf16.gmra.mxu2 %v4265_v44 }
  0xf2   : > { %v4269_v14 = vpop.f32.mrf.mxu0  ;;  %v4272_v61 = vpop.f32.mrf.mxu3 }
  0xf3   : > { %4768 = vst [vmem:[#allocation32_spill] sm:$0xff] %v4272_v61 }
  0xf4   : > { %v4279_v47 = vpop.f32.mrf.mxu2 }
  0xf5   : > { %1655 = vmatmul.bf16.gmra.mxu0 %v3780_v26  ;;  %v1077_v26 = vsel %vm1034_vm1, %v1075_v17, %v1076_v52 }
  0xf6   : > { %v954_v1 = vpop.f32.mrf.mxu1  ;;  %v4295_v56 = vpack.c.bf16 %v1079_v58, %v1077_v26  ;;  %v1080_v26 = vrot.slane %v3821_v57, 2  ;;  %v1081_v58 = vrot.slane %v3825_v59, 2 }
  0xf7   : > { %1458 = vmatmul.bf16.gmra.mxu3 %v4276_v4  ;;  %v955_v55 = vadd.f32 %v954_v1, %v4154_v33  ;;  %v4303_v1 = vpack.c.bf16 %v3825_v59, %v3821_v57 }
  0xf8   : > { %4771 = vst [vmem:[#allocation35_spill] sm:$0xff] %v4295_v56  ;;  %v1082_v59 = vsel %vm1034_vm1, %v1080_v26, %v1081_v58 }
  0xf9   : > { %993 = vmatmul.bf16.gmra.mxu1 %v4276_v4 }
  0xfa   : > { %v4286_v61 = vpop.f32.mrf.mxu0  ;;  %v4289_v44 = vpop.f32.mrf.mxu3 }
  0xfb   : > { %4770 = vst [vmem:[#allocation34_spill] sm:$0xff] %v4289_v44 }
  0xfc   : > { %v4293_v6 = vpop.f32.mrf.mxu2 }
  0xfe   : > { %v956_v63 = vpop.f32.mrf.mxu1 }
  0xff   : > { %v957_v0 = vadd.f32 %v956_v63, %v4176_v5  ;;  %v1083_v5 = vrot.slane %v3827_v60, 2 }
 0x101   : > { %1276 = vmatmul.bf16.gmra.mxu2 %v4295_v56  ;;  %v1084_v60 = vsel %vm1034_vm1, %v1081_v58, %v1083_v5 }
 0x102   : > { %v1621_v9 = vpop.f32.mrf.mxu0  ;;  %v4299_v33 = vpop.f32.mrf.mxu3  ;;  %v4326_v4 = vpack.c.bf16 %v1084_v60, %v1082_v59  ;;  %v1085_v60 = vrot.slane %v3913_v39, 2 }
 0x103   : > { %4772 = vst [vmem:[#allocation36_spill] sm:$0xff] %v4299_v33  ;;  %v3244_v33 = vld [vmem:[%s4693_s1 + $0x190] sm:$0xff] }
 0x104   : > { %v1237_v17 = vpop.f32.mrf.mxu2  ;;  %1998 = vmatpush.bf16.msra.mxu2 %v3244_v33 }
 0x105   : > { %1660 = vmatmul.bf16.gmra.mxu0 %v3889_v50  ;;  %v1317_v52 = vadd.f32 %v1237_v17, %v955_v55  ;;  %v3252_v50 = vld [vmem:[%s4693_s1 + $0x1d0] sm:$0xff] }
 0x106   : > { %v959_v53 = vpop.f32.mrf.mxu1  ;;  %2195 = vmatpush.bf16.msra.mxu3 %v3252_v50 }
 0x107   : > { %1463 = vmatmul.bf16.gmra.mxu3 %v4303_v1  ;;  %v960_v63 = vadd.f32 %v959_v53, %v4195_v3  ;;  %v3236_v3 = vld [vmem:[%s4693_s1 + $0x150] sm:$0xff] }
 0x108   : > { %v3260_v53 = vld [vmem:[%s4693_s1 + $0x210] sm:$0xff]  ;;  %1811 = vmatpush.bf16.msra.mxu1 %v3236_v3 }
 0x109   : > { %998 = vmatmul.bf16.gmra.mxu1 %v4303_v1  ;;  %2389 = vmatpush.bf16.msra.mxu0 %v3260_v53 }
 0x10a   : > { %v1623_v55 = vpop.f32.mrf.mxu0  ;;  %v1424_v57 = vpop.f32.mrf.mxu3 }
 0x10b   : > { %v1504_v17 = vadd.f32 %v1424_v57, %v1317_v52  ;;  %v4334_v57 = vpack.c.bf16 %v3917_v35, %v3913_v39 }
 0x10c   : > { %v1239_v44 = vpop.f32.mrf.mxu2 }
 0x10d   : > { %v1318_v56 = vadd.f32 %v1239_v44, %v957_v0  ;;  %v4328_v33 = vadd.f32 %v1621_v9, %v1504_v17  ;;  %v1088_v17 = vrot.slane %v3919_v42, 2 }
 0x10e   : > { %v961_v26 = vpop.f32.mrf.mxu1 }
 0x10f   : > { %v962_v50 = vadd.f32 %v961_v26, %v4213_v27  ;;  %v1086_v27 = vrot.slane %v3917_v35, 2 }
 0x111   : > { %1281 = vmatmul.bf16.gmra.mxu2 %v4326_v4  ;;  %v1087_v26 = vsel %vm1034_vm1, %v1085_v60, %v1086_v27  ;;  %v4355_v60 = vpack.c.bf16 %v4008_v15, %v4004_v54 }
 0x112   : > { %v1626_v52 = vpop.f32.mrf.mxu0  ;;  %v1426_v58 = vpop.f32.mrf.mxu3 }
 0x113   : > { %v1505_v5 = vadd.f32 %v1426_v58, %v1318_v56 }
 0x114   : > { %v1242_v44 = vpop.f32.mrf.mxu2 }
 0x115   : > { %1665 = vmatmul.bf16.gmra.mxu0 %v3987_v28  ;;  %v1319_v0 = vadd.f32 %v1242_v44, %v960_v63  ;;  %v4337_v59 = vadd.f32 %v1623_v55, %v1505_v5  ;;  %v1089_v63 = vsel %vm1034_vm1, %v1086_v27, %v1088_v17  ;;  %v1090_v17 = vrot.slane %v4004_v54, 2 }
 0x116   : > { %v964_v9 = vpop.f32.mrf.mxu1  ;;  %v4347_v39 = vpack.c.bf16 %v1089_v63, %v1087_v26 }
 0x117   : > { %4773 = vst [vmem:[#allocation37_spill] sm:$0xff] %v4337_v59  ;;  %1468 = vmatmul.bf16.gmra.mxu3 %v4334_v57  ;;  %v965_v56 = vadd.f32 %v964_v9, %v4226_v43 }
 0x119   : > { %1003 = vmatmul.bf16.gmra.mxu1 %v4334_v57 }
 0x11a   : > { %v1628_v3 = vpop.f32.mrf.mxu0  ;;  %v1429_v53 = vpop.f32.mrf.mxu3 }
 0x11b   : > { %v1506_v55 = vadd.f32 %v1429_v53, %v1319_v0  ;;  %v4775_v53 = vld [vmem:[#allocation19_spill] sm:$0xff] }
 0x11c   : > { %v1244_v58 = vpop.f32.mrf.mxu2  ;;  %v1093_v26 = vrot.slane %v4775_v53, 2 }
 0x11d   : > { %v1320_v5 = vadd.f32 %v1244_v58, %v962_v50  ;;  %v4349_v35 = vadd.f32 %v1626_v52, %v1506_v55  ;;  %v3243_v55 = vld [vmem:[%s4693_s1 + $0x188] sm:$0xff] }
 0x11e   : > { %v966_v42 = vpop.f32.mrf.mxu1  ;;  %1999 = vmatpush.bf16.msra.mxu2 %v3243_v55  ;;  %v4777_v55 = vld [vmem:[#allocation4_spill] sm:$0xff] }
 0x11f   : > { %v967_v44 = vadd.f32 %v966_v42, %v4250_v2  ;;  %v1091_v2 = vrot.slane %v4008_v15, 2  ;;  %v3259_v42 = vld [vmem:[%s4693_s1 + $0x208] sm:$0xff] }
 0x120   : > { %2390 = vmatpush.bf16.msra.mxu0 %v3259_v42 }
 0x121   : > { %1286 = vmatmul.bf16.gmra.mxu2 %v4347_v39  ;;  %v1092_v15 = vsel %vm1034_vm1, %v1090_v17, %v1091_v2  ;;  %v1094_v58 = vsel %vm1034_vm1, %v1091_v2, %v1093_v26 }
 0x122   : > { %v1631_v59 = vpop.f32.mrf.mxu0  ;;  %v1431_v43 = vpop.f32.mrf.mxu3 }
 0x123   : > { %v1507_v9 = vadd.f32 %v1431_v43, %v1320_v5 }
 0x124   : > { %v1247_v0 = vpop.f32.mrf.mxu2 }
 0x125   : > { %1670 = vmatmul.bf16.gmra.mxu0 %v4052_v36  ;;  %v1321_v50 = vadd.f32 %v1247_v0, %v965_v56  ;;  %v4358_v27 = vadd.f32 %v1628_v3, %v1507_v9  ;;  %v3251_v56 = vld [vmem:[%s4693_s1 + $0x1c8] sm:$0xff]  ;;  %v4380_v0 = vpack.c.bf16 %v1094_v58, %v1092_v15 }
 0x126   : > { %v969_v52 = vpop.f32.mrf.mxu1  ;;  %2196 = vmatpush.bf16.msra.mxu3 %v3251_v56  ;;  %v4778_v56 = vld [vmem:[#allocation5_spill] sm:$0xff]  ;;  %v4785_v36 = vld [vmem:[#allocation10_spill] sm:$0xff] }
 0x127   : > { %4774 = vst [vmem:[#allocation38_spill] sm:$0xff] %v4358_v27  ;;  %1473 = vmatmul.bf16.gmra.mxu3 %v4355_v60  ;;  %v970_v63 = vadd.f32 %v969_v52, %v4269_v14  ;;  %v3235_v14 = vld [vmem:[%s4693_s1 + $0x148] sm:$0xff]  ;;  %v4780_v27 = vld [vmem:[#allocation7_spill] sm:$0xff] }
 0x128   : > { %1812 = vmatpush.bf16.msra.mxu1 %v3235_v14  ;;  %v4782_v14 = vld [vmem:[#allocation6_spill] sm:$0xff] }
 0x129   : > { %1008 = vmatmul.bf16.gmra.mxu1 %v4355_v60  ;;  %v1098_v42 = vrot.slane %v4782_v14, 2 }
 0x12a   : > { %v1633_v3 = vpop.f32.mrf.mxu0  ;;  %v1434_v54 = vpop.f32.mrf.mxu3 }
 0x12b   : > { %v1508_v5 = vadd.f32 %v1434_v54, %v1321_v50  ;;  %v4388_v54 = vpack.c.bf16 %v4778_v56, %v4777_v55 }
 0x12c   : > { %v1249_v43 = vpop.f32.mrf.mxu2 }
 0x12d   : > { %v1322_v9 = vadd.f32 %v1249_v43, %v967_v44  ;;  %v4382_v52 = vadd.f32 %v1631_v59, %v1508_v5  ;;  %4779 = vst [vmem:[#allocation4_spill] sm:$0xff] %v4388_v54  ;;  %v1095_v5 = vrot.slane %v4777_v55, 2 }
 0x12e   : > { %v971_v17 = vpop.f32.mrf.mxu1 }
 0x12f   : > { %4776 = vst [vmem:[#allocation19_spill] sm:$0xff] %v4382_v52  ;;  %v972_v2 = vadd.f32 %v971_v17, %v4286_v61  ;;  %v1096_v61 = vrot.slane %v4778_v56, 2 }
 0x131   : > { %1291 = vmatmul.bf16.gmra.mxu2 %v4380_v0  ;;  %v1097_v17 = vsel %vm1034_vm1, %v1095_v5, %v1096_v61 }
 0x132   : > { %v1636_v50 = vpop.f32.mrf.mxu0  ;;  %v1436_v53 = vpop.f32.mrf.mxu3 }
 0x133   : > { %v1509_v26 = vadd.f32 %v1436_v53, %v1322_v9 }
 0x134   : > { %v1252_v44 = vpop.f32.mrf.mxu2 }
 0x135   : > { %1675 = vmatmul.bf16.gmra.mxu0 %v4780_v27  ;;  %v1323_v15 = vadd.f32 %v1252_v44, %v970_v63  ;;  %v4391_v58 = vadd.f32 %v1633_v3, %v1509_v26  ;;  %v1099_v63 = vsel %vm1034_vm1, %v1096_v61, %v1098_v42  ;;  %v3424_v61 = vld [vmem:[%s3542_s27 + $0x78] sm:$0xff]  }
 0x136   : > { %v974_v59 = vpop.f32.mrf.mxu1  ;;  %v4400_v44 = vpack.c.bf16 %v1099_v63, %v1097_v17  ;;  %v3328_v42 = vunpack.c.l.bf16 %v3424_v61 }
 0x137   : > { %4781 = vst [vmem:[#allocation5_spill] sm:$0xff] %v4391_v58  ;;  %1478 = vmatmul.bf16.gmra.mxu3 %v4388_v54  ;;  %v975_v52 = vadd.f32 %v974_v59, %v4136_v10  ;;  %v3475_v59 = vld [vmem:[%s4694_s2] ss:$0 sm:$0xff] }
 0x139   : > { %1013 = vmatmul.bf16.gmra.mxu1 %v4388_v54  ;;  %v4784_v54 = vld [vmem:[#allocation9_spill] sm:$0xff] }
 0x13a   : > { %v1638_v43 = vpop.f32.mrf.mxu0  ;;  %v1439_v9 = vpop.f32.mrf.mxu3  ;;  %v4408_v5 = vpack.c.bf16 %v4785_v36, %v4784_v54  ;;  %v1100_v17 = vrot.slane %v4784_v54, 2 }
 0x13b   : > { %v1510_v3 = vadd.f32 %v1439_v9, %v1323_v15  ;;  %v4786_v15 = vld [vmem:[#allocation13_spill] sm:$0xff]  ;;  %v3329_v9 = vunpack.c.h.bf16 %v3424_v61 }
 0x13c   : > { %v1254_v53 = vpop.f32.mrf.mxu2 }
 0x13d   : > { %v1324_v26 = vadd.f32 %v1254_v53, %v972_v2  ;;  %v4402_v55 = vadd.f32 %v1636_v50, %v1510_v3  ;;  %v4788_v53 = vld [vmem:[#allocation11_spill] sm:$0xff] }
 0x13e   : > { %v976_v56 = vpop.f32.mrf.mxu1  ;;  %v1103_v10 = vrot.slane %v4788_v53, 2 }
 0x13f   : > { %4783 = vst [vmem:[#allocation6_spill] sm:$0xff] %v4402_v55  ;;  %v336_v55 = vmul.f32 %v3475_v59, %v3329_v9 }
 0x141   : > { %1296 = vmatmul.bf16.gmra.mxu2 %v4400_v44 }
 0x142   : > { %v1641_v14 = vpop.f32.mrf.mxu0  ;;  %v1441_v58 = vpop.f32.mrf.mxu3 }
 0x143   : > { %v1511_v27 = vadd.f32 %v1441_v58, %v1324_v26  ;;  %v1101_v58 = vrot.slane %v4785_v36, 2  ;;  %v335_v26 = vmul.f32 %v3475_v59, %v3328_v42  ;;  %v3476_v36 = vld [vmem:[%s4695_s3] ss:$0 sm:$0xff] }
 0x144   : > { %v1257_v2 = vpop.f32.mrf.mxu2 }
 0x145   : > { %1680 = vmatmul.bf16.gmra.mxu0 %v4786_v15  ;;  %v1325_v50 = vadd.f32 %v1257_v2, %v975_v52  ;;  %v4413_v63 = vadd.f32 %v1638_v43, %v1511_v27  ;;  %v3242_v52 = vld [vmem:[%s4693_s1 + $0x180] sm:$0xff]  ;;  %v370_v54 = vadd.f32 %v3476_v36, %v335_v26  ;;  %v371_v43 = vadd.f32 %v3476_v36, %v336_v55 }
 0x146   : > { %v979_v3 = vpop.f32.mrf.mxu1  ;;  %v3250_v27 = vld [vmem:[%s4693_s1 + $0x1c0] sm:$0xff]  ;;  %2000 = vmatpush.bf16.msra.mxu2 %v3242_v52  ;;  %v1102_v42 = vsel %vm1034_vm1, %v1100_v17, %v1101_v58  ;;  %v1104_v9 = vsel %vm1034_vm1, %v1101_v58, %v1103_v10  ;;  %v977_v15 = vadd.f32 %v976_v56, %v4150_v31 }
 0x147   : > { %4787 = vst [vmem:[#allocation9_spill] sm:$0xff] %v4413_v63  ;;  %1483 = vmatmul.bf16.gmra.mxu3 %v4408_v5  ;;  %v402_v53 = vmax.f32 %v370_v54, 0.0  ;;  %v403_v59 = vmax.f32 %v371_v43, 0.0  ;;  %v3234_v26 = vld [vmem:[%s4693_s1 + $0x140] sm:$0xff]  ;;  %v4440_v17 = vpack.c.bf16 %v1104_v9, %v1102_v42  ;;  %v4790_v54 = vld [vmem:[#allocation15_spill] sm:$0xff] }
 0x148   : > { %2197 = vmatpush.bf16.msra.mxu3 %v3250_v27  ;;  %v3258_v55 = vld [vmem:[%s4693_s1 + $0x200] sm:$0xff]  ;;  %1813 = vmatpush.bf16.msra.mxu1 %v3234_v26  ;;  %v980_v27 = vadd.f32 %v979_v3, %v4164_v22 }
 0x149   : > { %1018 = vmatmul.bf16.gmra.mxu1 %v4408_v5  ;;  %478 = vst [vmem:[#allocation2 + $0x181] sm:$0xff] %v402_v53  ;;  %2391 = vmatpush.bf16.msra.mxu0 %v3258_v55  ;;  %v4791_v43 = vld [vmem:[#allocation17_spill] sm:$0xff] }
 0x14a   : > { %v1643_v61 = vpop.f32.mrf.mxu0  ;;  %v1444_v2 = vpop.f32.mrf.mxu3  ;;  %479 = vst [vmem:[#allocation2 + $0x189] sm:$0xff] %v403_v59  ;;  %v4793_v59 = vld [vmem:[#allocation16_spill] sm:$0xff] }
 0x14b   : > { %v1512_v63 = vadd.f32 %v1444_v2, %v1325_v50  ;;  %v4448_v2 = vpack.c.bf16 %v4791_v43, %v4790_v54  ;;  %v1108_v26 = vrot.slane %v4793_v59, 2 }
 0x14c   : > { %v1259_v52 = vpop.f32.mrf.mxu2 }
 0x14d   : > { %v1326_v36 = vadd.f32 %v1259_v52, %v977_v15  ;;  %v4442_v58 = vadd.f32 %v1641_v14, %v1512_v63  ;;  %v4792_v15 = vld [vmem:[#allocation18_spill] sm:$0xff]  ;;  %v1105_v14 = vrot.slane %v4790_v54, 2  ;;  %v1106_v63 = vrot.slane %v4791_v43, 2 }
 0x14e   : > { %v981_v50 = vpop.f32.mrf.mxu1 }
 0x14f   : > { %4789 = vst [vmem:[#allocation10_spill] sm:$0xff] %v4442_v58  ;;  %v1107_v52 = vsel %vm1034_vm1, %v1105_v14, %v1106_v63  ;;  %v4469_v14 = vpack.c.bf16 %v4040_v18, %v4034_v51 }
 0x151   : > { %1301 = vmatmul.bf16.gmra.mxu2 %v4440_v17 }
 0x152   : > { %v1646_v31 = vpop.f32.mrf.mxu0  ;;  %v1446_v56 = vpop.f32.mrf.mxu3 }
 0x153   : > { %v1513_v10 = vadd.f32 %v1446_v56, %v1326_v36  ;;  %v1109_v36 = vsel %vm1034_vm1, %v1106_v63, %v1108_v26  ;;  %v1113_v63 = vrot.slane %v4042_v8, 2 }
 0x154   : > { %v1262_v42 = vpop.f32.mrf.mxu2  ;;  %v4461_v43 = vpack.c.bf16 %v1109_v36, %v1107_v52 }
 0x155   : > { %1685 = vmatmul.bf16.gmra.mxu0 %v4792_v15  ;;  %v1327_v9 = vadd.f32 %v1262_v42, %v980_v27  ;;  %v4454_v55 = vadd.f32 %v1643_v61, %v1513_v10  ;;  %v982_v27 = vadd.f32 %v981_v50, %v4193_v40  ;;  %v1110_v50 = vrot.slane %v4034_v51, 2 }
 0x156   : > { %v984_v53 = vpop.f32.mrf.mxu1 }
 0x157   : > { %4794 = vst [vmem:[#allocation11_spill] sm:$0xff] %v4454_v55  ;;  %1488 = vmatmul.bf16.gmra.mxu3 %v4448_v2  ;;  %v985_v58 = vadd.f32 %v984_v53, %v4207_v20  ;;  %v4479_v20 = vld [vmem:[#allocation2 + $0x188] sm:$0xff]  ;;  %v4481_v53 = vld [vmem:[#allocation2 + $0x190] sm:$0x3] }
 0x158   : > { %v1540_v8 = vrot.slane %v4479_v20, 1 }
 0x159   : > { %1023 = vmatmul.bf16.gmra.mxu1 %v4448_v2 }
 0x15a   : > { %v1648_v22 = vpop.f32.mrf.mxu0  ;;  %v1449_v3 = vpop.f32.mrf.mxu3 }
 0x15b   : > { %v1514_v56 = vadd.f32 %v1449_v3, %v1327_v9 }
 0x15c   : > { %v1264_v54 = vpop.f32.mrf.mxu2 }
 0x15d   : > { %v1328_v42 = vadd.f32 %v1264_v54, %v982_v27  ;;  %v4463_v59 = vadd.f32 %v1646_v31, %v1514_v56  ;;  %v1111_v31 = vrot.slane %v4040_v18, 2 }
 0x15e   : > { %v986_v61 = vpop.f32.mrf.mxu1 }
 0x15f   : > { %4795 = vst [vmem:[#allocation15_spill] sm:$0xff] %v4463_v59  ;;  %v1112_v52 = vsel %vm1034_vm1, %v1110_v50, %v1111_v31  ;;  %v1114_v51 = vsel %vm1034_vm1, %v1111_v31, %v1113_v63  ;;  %v987_v56 = vadd.f32 %v986_v61, %v4224_v41 }
 0x160   : > { %v4491_v54 = vpack.c.bf16 %v1114_v51, %v1112_v52 }
 0x161   : > { %1306 = vmatmul.bf16.gmra.mxu2 %v4461_v43 }
 0x162   : > { %v1651_v10 = vpop.f32.mrf.mxu0  ;;  %v1451_v55 = vpop.f32.mrf.mxu3 }
 0x163   : > { %v1515_v15 = vadd.f32 %v1451_v55, %v1328_v42  ;;  %v4477_v55 = vld [vmem:[#allocation2 + $0x180] sm:$0xff] }
 0x164   : > { %v1267_v40 = vpop.f32.mrf.mxu2  ;;  %v1539_v18 = vrot.slane %v4477_v55, 1  ;;  %v4503_v61 = vpack.c.bf16 %v4479_v20, %v4477_v55 }
 0x165   : > { %1690 = vmatmul.bf16.gmra.mxu0 %v4061_v24  ;;  %v1329_v9 = vadd.f32 %v1267_v40, %v985_v58  ;;  %v4475_v26 = vadd.f32 %v1648_v22, %v1515_v15  ;;  %v1542_v58 = vrot.slane %v4481_v53, 1 }
 0x166   : > { %v989_v3 = vpop.f32.mrf.mxu1  ;;  %v1541_v40 = vsel %vm614_vm0, %v1539_v18, %v1540_v8 }
 0x167   : > { %4796 = vst [vmem:[#allocation17_spill] sm:$0xff] %v4475_v26  ;;  %1493 = vmatmul.bf16.gmra.mxu3 %v4469_v14  ;;  %v1543_v50 = vsel %vm614_vm0, %v1540_v8, %v1542_v58  ;;  %v990_v41 = vadd.f32 %v989_v3, %v4238_v12 }
 0x168   : > { %v4497_v63 = vpack.c.bf16 %v1543_v50, %v1541_v40 }
 0x169   : > { %1028 = vmatmul.bf16.gmra.mxu1 %v4469_v14 }
 0x16a   : > { %v1653_v36 = vpop.f32.mrf.mxu0  ;;  %v1454_v15 = vpop.f32.mrf.mxu3 }
 0x16b   : > { %v1516_v22 = vadd.f32 %v1454_v15, %v1329_v9 }
 0x16c   : > { %v1269_v27 = vpop.f32.mrf.mxu2 }
 0x16d   : > { %v1330_v42 = vadd.f32 %v1269_v27, %v987_v56  ;;  %v4495_v26 = vadd.f32 %v1651_v10, %v1516_v22 }
 0x16e   : > { %v991_v31 = vpop.f32.mrf.mxu1 }
 0x16f   : > { %v992_v12 = vadd.f32 %v991_v31, %v4267_v45 }
 0x171   : > { %1311 = vmatmul.bf16.gmra.mxu2 %v4491_v54 }
 0x172   : > { %v1656_v24 = vpop.f32.mrf.mxu0  ;;  %v1456_v59 = vpop.f32.mrf.mxu3 }
 0x173   : > { %v1517_v9 = vadd.f32 %v1456_v59, %v1330_v42 }
 0x174   : > { %v1272_v52 = vpop.f32.mrf.mxu2 }
 0x175   : > { %1695 = vmatmul.bf16.gmra.mxu0 %v4497_v63  ;;  %v1331_v51 = vadd.f32 %v1272_v52, %v990_v41  ;;  %v4506_v10 = vadd.f32 %v1653_v36, %v1517_v9 }
 0x176   : > { %v994_v18 = vpop.f32.mrf.mxu1 }
 0x177   : > { %1498 = vmatmul.bf16.gmra.mxu3 %v4503_v61  ;;  %v995_v40 = vadd.f32 %v994_v18, %v4162_v21 }
 0x179   : > { %1814 = vmatmul.bf16.vlgmr.msra.gmra.mxu1 %v4091_v25 }
 0x17a   : > { %v1658_v8 = vpop.f32.mrf.mxu0  ;;  %v1459_v58 = vpop.f32.mrf.mxu3 }
 0x17b   : > { %v1518_v59 = vadd.f32 %v1459_v58, %v1331_v51 }
 0x17c   : > { %v1274_v3 = vpop.f32.mrf.mxu2 }
 0x17d   : > { %v1332_v15 = vadd.f32 %v1274_v3, %v992_v12  ;;  %v4511_v22 = vadd.f32 %v1656_v24, %v1518_v59 }
 0x17e   : > { %v996_v56 = vpop.f32.mrf.mxu1 }
 0x181   : > { %2001 = vmatmul.bf16.vlgmr.msra.gmra.mxu2 %v4096_v32  ;;  %v997_v32 = vadd.f32 %v996_v56, %v4189_v11 }
 0x182   : > { %v1661_v27 = vpop.f32.mrf.mxu0  ;;  %v1461_v36 = vpop.f32.mrf.mxu3 }
 0x183   : > { %v1519_v42 = vadd.f32 %v1461_v36, %v1332_v15 }
 0x184   : > { %v1277_v50 = vpop.f32.mrf.mxu2 }
 0x185   : > { %2392 = vmatmul.bf16.vlgmr.msra.gmra.mxu0 %v4106_v38  ;;  %v1333_v25 = vadd.f32 %v1277_v50, %v995_v40  ;;  %v4516_v9 = vadd.f32 %v1658_v8, %v1519_v42 }
 0x186   : > { %v999_v41 = vpop.f32.mrf.mxu1 }
 0x187   : > { %2198 = vmatmul.bf16.vlgmr.msra.gmra.mxu3 %v3999_v49  ;;  %v1000_v12 = vadd.f32 %v999_v41, %v4205_v46 }
 0x189   : > { %1819 = vmatmul.bf16.gmra.mxu1 %v4106_v38 }
 0x18a   : > { %v1663_v45 = vpop.f32.mrf.mxu0  ;;  %v1464_v24 = vpop.f32.mrf.mxu3 }
 0x18b   : > { %v1520_v31 = vadd.f32 %v1464_v24, %v1333_v25 }
 0x18c   : > { %v1279_v52 = vpop.f32.mrf.mxu2 }
 0x18d   : > { %v1334_v51 = vadd.f32 %v1279_v52, %v997_v32  ;;  %v4521_v58 = vadd.f32 %v1661_v27, %v1520_v31 }
 0x18e   : > { %v1001_v21 = vpop.f32.mrf.mxu1 }
 0x191   : > { %2006 = vmatmul.bf16.gmra.mxu2 %v4111_v30  ;;  %v1002_v30 = vadd.f32 %v1001_v21, %v4220_v48 }
 0x192   : > { %v1666_v18 = vpop.f32.mrf.mxu0  ;;  %v1466_v8 = vpop.f32.mrf.mxu3 }
 0x193   : > { %v1521_v59 = vadd.f32 %v1466_v8, %v1334_v51 }
 0x194   : > { %v1282_v49 = vpop.f32.mrf.mxu2 }
 0x195   : > { %2397 = vmatmul.bf16.gmra.mxu0 %v4133_v23  ;;  %v1335_v38 = vadd.f32 %v1282_v49, %v1000_v12  ;;  %v4526_v3 = vadd.f32 %v1663_v45, %v1521_v59 }
 0x196   : > { %v1004_v15 = vpop.f32.mrf.mxu1 }
 0x197   : > { %2203 = vmatmul.bf16.gmra.mxu3 %v4058_v16  ;;  %v1005_v45 = vadd.f32 %v1004_v15, %v4236_v29 }
 0x199   : > { %1824 = vmatmul.bf16.gmra.mxu1 %v4133_v23 }
 0x19a   : > { %v1668_v11 = vpop.f32.mrf.mxu0  ;;  %v1469_v56 = vpop.f32.mrf.mxu3 }
 0x19b   : > { %v1522_v27 = vadd.f32 %v1469_v56, %v1335_v38 }
 0x19c   : > { %v1284_v36 = vpop.f32.mrf.mxu2 }
 0x19d   : > { %v1336_v42 = vadd.f32 %v1284_v36, %v1002_v30  ;;  %v4531_v40 = vadd.f32 %v1666_v18, %v1522_v27 }
 0x19e   : > { %v1006_v46 = vpop.f32.mrf.mxu1 }
 0x1a1   : > { %2011 = vmatmul.bf16.gmra.mxu2 %v4140_v7  ;;  %v1007_v7 = vadd.f32 %v1006_v46, %v4263_v37  ;;  %v4797_v37 = vld [vmem:[#allocation8_spill] sm:$0xff] }
 0x1a2   : > { %v1671_v50 = vpop.f32.mrf.mxu0  ;;  %v1471_v25 = vpop.f32.mrf.mxu3 }
 0x1a3   : > { %v1523_v41 = vadd.f32 %v1471_v25, %v1336_v42 }
 0x1a4   : > { %v1287_v16 = vpop.f32.mrf.mxu2 }
 0x1a5   : > { %2402 = vmatmul.bf16.gmra.mxu0 %v4152_v62  ;;  %v1337_v23 = vadd.f32 %v1287_v16, %v1005_v45  ;;  %v4536_v24 = vadd.f32 %v1668_v11, %v1523_v41  ;;  %v4799_v45 = vld [vmem:[#allocation23_spill] sm:$0xff] }
 0x1a6   : > { %v1009_v31 = vpop.f32.mrf.mxu1 }
 0x1a7   : > { %2208 = vmatmul.bf16.gmra.mxu3 %v3611_v34  ;;  %v1010_v49 = vadd.f32 %v1009_v31, %v4279_v47 }
 0x1a9   : > { %1829 = vmatmul.bf16.gmra.mxu1 %v4152_v62 }
 0x1aa   : > { %v1673_v48 = vpop.f32.mrf.mxu0  ;;  %v1474_v32 = vpop.f32.mrf.mxu3 }
 0x1ab   : > { %v1524_v52 = vadd.f32 %v1474_v32, %v1337_v23  ;;  %v4800_v23 = vld [vmem:[#allocation27_spill] sm:$0xff] }
 0x1ac   : > { %v1289_v51 = vpop.f32.mrf.mxu2 }
 0x1ad   : > { %v1338_v21 = vadd.f32 %v1289_v51, %v1007_v7  ;;  %v4541_v18 = vadd.f32 %v1671_v50, %v1524_v52  ;;  %v4798_v50 = vld [vmem:[#allocation25_spill] sm:$0xff] }
 0x1ae   : > { %v1011_v29 = vpop.f32.mrf.mxu1 }
 0x1b1   : > { %2016 = vmatmul.bf16.gmra.mxu2 %v4159_v19  ;;  %v1012_v19 = vadd.f32 %v1011_v29, %v4293_v6  ;;  %v4801_v6 = vld [vmem:[#allocation14_spill] sm:$0xff] }
 0x1b2   : > { %v1676_v8 = vpop.f32.mrf.mxu0  ;;  %v1476_v59 = vpop.f32.mrf.mxu3 }
 0x1b3   : > { %v1525_v12 = vadd.f32 %v1476_v59, %v1338_v21  ;;  %v4802_v21 = vld [vmem:[#allocation24_spill] sm:$0xff] }
 0x1b4   : > { %v1292_v34 = vpop.f32.mrf.mxu2 }
 0x1b5   : > { %2407 = vmatmul.bf16.gmra.mxu0 %v4191_v13  ;;  %v1339_v62 = vadd.f32 %v1292_v34, %v1010_v49  ;;  %v4546_v38 = vadd.f32 %v1673_v48, %v1525_v12 }
 0x1b6   : > { %v1014_v15 = vpop.f32.mrf.mxu1 }
 0x1b7   : > { %2213 = vmatmul.bf16.gmra.mxu3 %v4797_v37  ;;  %v1015_v16 = vadd.f32 %v1014_v15, %v4799_v45  ;;  %v4807_v45 = vld [vmem:[#allocation28_spill] sm:$0xff] }
 0x1b9   : > { %1834 = vmatmul.bf16.gmra.mxu1 %v4191_v13 }
 0x1ba   : > { %v1678_v11 = vpop.f32.mrf.mxu0  ;;  %v1479_v56 = vpop.f32.mrf.mxu3 }
 0x1bb   : > { %v1526_v27 = vadd.f32 %v1479_v56, %v1339_v62  ;;  %v4803_v62 = vld [vmem:[#allocation29_spill] sm:$0xff] }
 0x1bc   : > { %v1294_v30 = vpop.f32.mrf.mxu2 }
 0x1bd   : > { %v1340_v36 = vadd.f32 %v1294_v30, %v1012_v19  ;;  %v4551_v42 = vadd.f32 %v1676_v8, %v1526_v27  ;;  %v4805_v27 = vld [vmem:[#allocation31_spill] sm:$0xff] }
 0x1be   : > { %v1016_v47 = vpop.f32.mrf.mxu1 }
 0x1bf   : > { %v1017_v29 = vadd.f32 %v1016_v47, %v4802_v21  ;;  %v4806_v47 = vld [vmem:[#allocation20_spill] sm:$0xff]  ;;  %v4809_v21 = vld [vmem:[#allocation30_spill] sm:$0xff] }
 0x1c1   : > { %2021 = vmatmul.bf16.gmra.mxu2 %v4798_v50 }
 0x1c2   : > { %v1681_v46 = vpop.f32.mrf.mxu0  ;;  %v1481_v25 = vpop.f32.mrf.mxu3 }
 0x1c3   : > { %v1527_v41 = vadd.f32 %v1481_v25, %v1340_v36 }
 0x1c4   : > { %v1297_v31 = vpop.f32.mrf.mxu2 }
 0x1c5   : > { %2412 = vmatmul.bf16.gmra.mxu0 %v4800_v23  ;;  %v1341_v13 = vadd.f32 %v1297_v31, %v1015_v16  ;;  %v4556_v48 = vadd.f32 %v1678_v11, %v1527_v41  ;;  %v4804_v11 = vld [vmem:[#allocation26_spill] sm:$0xff] }
 0x1c6   : > { %v1019_v32 = vpop.f32.mrf.mxu1 }
 0x1c7   : > { %2218 = vmatmul.bf16.gmra.mxu3 %v4801_v6  ;;  %v1020_v56 = vadd.f32 %v1019_v32, %v4804_v11 }
 0x1c9   : > { %1839 = vmatmul.bf16.gmra.mxu1 %v4800_v23 }
 0x1ca   : > { %v1683_v52 = vpop.f32.mrf.mxu0  ;;  %v1484_v7 = vpop.f32.mrf.mxu3 }
 0x1cb   : > { %v1528_v51 = vadd.f32 %v1484_v7, %v1341_v13  ;;  %v4808_v7 = vld [vmem:[#allocation33_spill] sm:$0xff] }
 0x1cc   : > { %v1299_v8 = vpop.f32.mrf.mxu2 }
 0x1cd   : > { %v1342_v59 = vadd.f32 %v1299_v8, %v1017_v29  ;;  %v4561_v12 = vadd.f32 %v1681_v46, %v1528_v51  ;;  %v4810_v8 = vld [vmem:[#allocation35_spill] sm:$0xff] }
 0x1ce   : > { %v1021_v49 = vpop.f32.mrf.mxu1 }
 0x1cf   : > { %v1022_v16 = vadd.f32 %v1021_v49, %v4807_v45  ;;  %v4811_v49 = vld [vmem:[#allocation3_spill] sm:$0xff] }
 0x1d1   : > { %2026 = vmatmul.bf16.gmra.mxu2 %v4803_v62 }
 0x1d2   : > { %v1686_v34 = vpop.f32.mrf.mxu0  ;;  %v1486_v15 = vpop.f32.mrf.mxu3 }
 0x1d3   : > { %v1529_v37 = vadd.f32 %v1486_v15, %v1342_v59 }
 0x1d4   : > { %v1302_v19 = vpop.f32.mrf.mxu2 }
 0x1d5   : > { %2417 = vmatmul.bf16.gmra.mxu0 %v4805_v27  ;;  %v1343_v30 = vadd.f32 %v1302_v19, %v1020_v56  ;;  %v4566_v36 = vadd.f32 %v1683_v52, %v1529_v37 }
 0x1d6   : > { %v1024_v50 = vpop.f32.mrf.mxu1 }
 0x1d7   : > { %2223 = vmatmul.bf16.gmra.mxu3 %v4806_v47  ;;  %v1025_v29 = vadd.f32 %v1024_v50, %v4809_v21 }
 0x1d9   : > { %1844 = vmatmul.bf16.gmra.mxu1 %v4805_v27  ;;  %v4812_v27 = vld [vmem:[#allocation32_spill] sm:$0xff] }
 0x1da   : > { %v1688_v25 = vpop.f32.mrf.mxu0  ;;  %v1489_v46 = vpop.f32.mrf.mxu3 }
 0x1db   : > { %v1530_v41 = vadd.f32 %v1489_v46, %v1343_v30 }
 0x1dc   : > { %v1304_v23 = vpop.f32.mrf.mxu2 }
 0x1dd   : > { %v1344_v31 = vadd.f32 %v1304_v23, %v1022_v16  ;;  %v4571_v13 = vadd.f32 %v1686_v34, %v1530_v41  ;;  %v4813_v16 = vld [vmem:[#allocation34_spill] sm:$0xff] }
 0x1de   : > { %v1026_v32 = vpop.f32.mrf.mxu1 }
 0x1df   : > { %v1027_v19 = vadd.f32 %v1026_v32, %v4812_v27  ;;  %v4814_v32 = vld [vmem:[#allocation12_spill] sm:$0xff] }
 0x1e1   : > { %2031 = vmatmul.bf16.gmra.mxu2 %v4808_v7 }
 0x1e2   : > { %v1691_v6 = vpop.f32.mrf.mxu0  ;;  %v1491_v52 = vpop.f32.mrf.mxu3 }
 0x1e3   : > { %v1531_v51 = vadd.f32 %v1491_v52, %v1344_v31 }
 0x1e4   : > { %v1307_v59 = vpop.f32.mrf.mxu2 }
 0x1e5   : > { %2422 = vmatmul.bf16.gmra.mxu0 %v4810_v8  ;;  %v1345_v62 = vadd.f32 %v1307_v59, %v1025_v29  ;;  %v4576_v15 = vadd.f32 %v1688_v25, %v1531_v51 }
 0x1e6   : > { %v1029_v37 = vpop.f32.mrf.mxu1 }
 0x1e7   : > { %2228 = vmatmul.bf16.gmra.mxu3 %v4811_v49  ;;  %v1030_v23 = vadd.f32 %v1029_v37, %v4813_v16 }
 0x1e9   : > { %1849 = vmatmul.bf16.gmra.mxu1 %v4810_v8  ;;  %v4815_v8 = vld [vmem:[#allocation36_spill] sm:$0xff] }
 0x1ea   : > { %v1693_v11 = vpop.f32.mrf.mxu0  ;;  %v1494_v34 = vpop.f32.mrf.mxu3 }
 0x1eb   : > { %v1532_v56 = vadd.f32 %v1494_v34, %v1345_v62 }
 0x1ec   : > { %v1309_v30 = vpop.f32.mrf.mxu2 }
 0x1ed   : > { %v1346_v47 = vadd.f32 %v1309_v30, %v1027_v19  ;;  %v4581_v46 = vadd.f32 %v1691_v6, %v1532_v56 }
 0x1ee   : > { %v1031_v50 = vpop.f32.mrf.mxu1 }
 0x1f1   : > { %2036 = vmatmul.bf16.gmra.mxu2 %v4303_v1  ;;  %v1032_v1 = vadd.f32 %v1031_v50, %v4815_v8 }
 0x1f2   : > { %v1696_v41 = vpop.f32.mrf.mxu0  ;;  %v1496_v25 = vpop.f32.mrf.mxu3 }
 0x1f3   : > { %v1533_v45 = vadd.f32 %v1496_v25, %v1346_v47 }
 0x1f4   : > { %v1312_v31 = vpop.f32.mrf.mxu2 }
 0x1f5   : > { %2427 = vmatmul.bf16.gmra.mxu0 %v4326_v4  ;;  %v1347_v7 = vadd.f32 %v1312_v31, %v1030_v23  ;;  %v4586_v52 = vadd.f32 %v1693_v11, %v1533_v45 }
 0x1f6   : > { %v1815_v51 = vpop.f32.mrf.mxu1 }
 0x1f7   : > { %2233 = vmatmul.bf16.gmra.mxu3 %v4814_v32  ;;  %v1895_v30 = vadd.f32 %v1815_v51, %v4328_v33 }
 0x1f9   : > { %1854 = vmatmul.bf16.gmra.mxu1 %v4326_v4 }
 0x1fa   : > { %v1698_v21 = vpop.f32.mrf.mxu0  ;;  %v1499_v6 = vpop.f32.mrf.mxu3 }
 0x1fb   : > { %v1534_v29 = vadd.f32 %v1499_v6, %v1347_v7 }
 0x1fc   : > { %v1314_v59 = vpop.f32.mrf.mxu2 }
 0x1fd   : > { %v1348_v62 = vadd.f32 %v1314_v59, %v1032_v1  ;;  %v4591_v49 = vadd.f32 %v1696_v41, %v1534_v29  ;;  %v4817_v59 = vld [vmem:[#allocation21_spill] sm:$0xff] }
 0x1fe   : > { %v1817_v37 = vpop.f32.mrf.mxu1 }
 0x201   : > { %2041 = vmatmul.bf16.gmra.mxu2 %v4334_v57  ;;  %v4816_v57 = vld [vmem:[#allocation37_spill] sm:$0xff] }
 0x202   : > { %v2393_v34 = vpop.f32.mrf.mxu0  ;;  %v1501_v11 = vpop.f32.mrf.mxu3  ;;  %v1896_v45 = vadd.f32 %v1817_v37, %v4816_v57 }
 0x203   : > { %v1535_v56 = vadd.f32 %v1501_v11, %v1348_v62 }
 0x204   : > { %v2002_v27 = vpop.f32.mrf.mxu2 }
 0x205   : > { %2432 = vmatmul.bf16.gmra.mxu0 %v4347_v39  ;;  %v4595_v19 = vadd.f32 %v1698_v21, %v1535_v56  ;;  %v2082_v50 = vadd.f32 %v2002_v27, %v1895_v30 }
 0x206   : > { %v1820_v4 = vpop.f32.mrf.mxu1 }
 0x207   : > { %2238 = vmatmul.bf16.gmra.mxu3 %v3987_v28 }
 0x209   : > { %1859 = vmatmul.bf16.gmra.mxu1 %v4347_v39  ;;  %v1897_v39 = vadd.f32 %v1820_v4, %v4349_v35  ;;  %v4818_v4 = vld [vmem:[#allocation38_spill] sm:$0xff] }
 0x20a   : > { %v2395_v47 = vpop.f32.mrf.mxu0  ;;  %v2199_v41 = vpop.f32.mrf.mxu3 }
 0x20b   : > { %v2279_v16 = vadd.f32 %v2199_v41, %v2082_v50 }
 0x20c   : > { %v2004_v25 = vpop.f32.mrf.mxu2 }
 0x20d   : > { %v2083_v31 = vadd.f32 %v2004_v25, %v1896_v45  ;;  %v2473_v32 = vadd.f32 %v2393_v34, %v2279_v16  ;;  %v4819_v16 = vld [vmem:[#allocation4_spill] sm:$0xff] }
 0x20e   : > { %v1822_v23 = vpop.f32.mrf.mxu1 }
 0x20f   : > { %v2606_v6 = vmul.f32 %v2473_v32, %v2473_v32  ;;  %v1898_v30 = vadd.f32 %v1822_v23, %v4818_v4 }
 0x211   : > { %2046 = vmatmul.bf16.gmra.mxu2 %v4355_v60 }
 0x212   : > { %v2398_v7 = vpop.f32.mrf.mxu0  ;;  %v2201_v21 = vpop.f32.mrf.mxu3 }
 0x213   : > { %v2280_v28 = vadd.f32 %v2201_v21, %v2083_v31 }
 0x214   : > { %v2007_v33 = vpop.f32.mrf.mxu2 }
 0x215   : > { %2437 = vmatmul.bf16.gmra.mxu0 %v4380_v0  ;;  %v2474_v51 = vadd.f32 %v2395_v47, %v2280_v28  ;;  %v2084_v62 = vadd.f32 %v2007_v33, %v1897_v39  ;;  %v4820_v28 = vld [vmem:[#allocation19_spill] sm:$0xff] }
 0x216   : > { %v1825_v29 = vpop.f32.mrf.mxu1 }
 0x217   : > { %v3333_v8 = vpack.c.bf16 %v2474_v51, %v2473_v32  ;;  %v2569_v60 = vadd.f32 %v2474_v51, %v2473_v32  ;;  %v2607_v1 = vmul.f32 %v2474_v51, %v2474_v51  ;;  %2243 = vmatmul.bf16.gmra.mxu3 %v4817_v59  ;;  %v1899_v33 = vadd.f32 %v1825_v29, %v4820_v28 }
 0x219   : > { %3334 = vst [vmem:[%s4609_s30] sm:$0xff] %v3333_v8   ;;  %v2638_v37 = vadd.f32 %v2607_v1, %v2606_v6  ;;  %1864 = vmatmul.bf16.gmra.mxu1 %v4380_v0  ;;  %v4821_v6 = vld [vmem:[#allocation7_spill] sm:$0xff] }
 0x21a   : > { %v2400_v34 = vpop.f32.mrf.mxu0  ;;  %v2204_v35 = vpop.f32.mrf.mxu3 }
 0x21b   : > { %v2281_v11 = vadd.f32 %v2204_v35, %v2084_v62 }
 0x21c   : > { %v2009_v56 = vpop.f32.mrf.mxu2 }
 0x21d   : > { %v2475_v27 = vadd.f32 %v2398_v7, %v2281_v11  ;;  %v2085_v25 = vadd.f32 %v2009_v56, %v1898_v30  ;;  %v4822_v11 = vld [vmem:[#allocation5_spill] sm:$0xff] }
 0x21e   : > { %v1827_v47 = vpop.f32.mrf.mxu1 }
 0x21f   : > { %v2570_v50 = vadd.f32 %v2569_v60, %v2475_v27  ;;  %v2608_v41 = vmul.f32 %v2475_v27, %v2475_v27 }
 0x221   : > { %v2639_v57 = vadd.f32 %v2638_v37, %v2608_v41  ;;  %2051 = vmatmul.bf16.gmra.mxu2 %v4819_v16  ;;  %v4823_v16 = vld [vmem:[#allocation6_spill] sm:$0xff] }
 0x222   : > { %v2403_v45 = vpop.f32.mrf.mxu0  ;;  %v2206_v31 = vpop.f32.mrf.mxu3 }
 0x223   : > { %v2282_v32 = vadd.f32 %v2206_v31, %v2085_v25 }
 0x224   : > { %v2012_v0 = vpop.f32.mrf.mxu2 }
 0x225   : > { %2442 = vmatmul.bf16.gmra.mxu0 %v4400_v44  ;;  %v2476_v21 = vadd.f32 %v2400_v34, %v2282_v32  ;;  %v2086_v8 = vadd.f32 %v2012_v0, %v1899_v33  ;;  %v1900_v34 = vadd.f32 %v1827_v47, %v4822_v11  ;;  %v1733_v11 = vrot.slane %v4477_v55, 2 }
 0x226   : > { %v1830_v7 = vpop.f32.mrf.mxu1 }
 0x227   : > { %v3338_v51 = vpack.c.bf16 %v2476_v21, %v2475_v27  ;;  %v2571_v23 = vadd.f32 %v2570_v50, %v2476_v21  ;;  %v2609_v39 = vmul.f32 %v2476_v21, %v2476_v21  ;;  %2248 = vmatmul.bf16.gmra.mxu3 %v4821_v6  ;;  %v1901_v31 = vadd.f32 %v1830_v7, %v4823_v16  ;;  %v4824_v21 = vld [vmem:[#allocation13_spill] sm:$0xff] }
 0x229   : > { %3425 = vst [vmem:[%s4609_s30 + $0x8] sm:$0xff] %v3338_v51   ;;  %v2640_v60 = vadd.f32 %v2639_v57, %v2609_v39  ;;  %1869 = vmatmul.bf16.gmra.mxu1 %v4400_v44 }
 0x22a   : > { %v2405_v1 = vpop.f32.mrf.mxu0  ;;  %v2209_v59 = vpop.f32.mrf.mxu3 }
 0x22b   : > { %v2283_v62 = vadd.f32 %v2209_v59, %v2086_v8  ;;  %v4825_v8 = vld [vmem:[#allocation9_spill] sm:$0xff] }
 0x22c   : > { %v2014_v37 = vpop.f32.mrf.mxu2 }
 0x22d   : > { %v2477_v35 = vadd.f32 %v2403_v45, %v2283_v62  ;;  %v2087_v27 = vadd.f32 %v2014_v37, %v1900_v34  ;;  %v1734_v34 = vrot.slane %v4479_v20, 2  ;;  %v4827_v20 = vld [vmem:[#allocation18_spill] sm:$0xff] }
 0x22e   : > { %v1832_v56 = vpop.f32.mrf.mxu1 }
 0x22f   : > { %v2572_v29 = vadd.f32 %v2571_v23, %v2477_v35  ;;  %v2610_v4 = vmul.f32 %v2477_v35, %v2477_v35 }
 0x231   : > { %v2641_v30 = vadd.f32 %v2640_v60, %v2610_v4  ;;  %2056 = vmatmul.bf16.gmra.mxu2 %v4408_v5  ;;  %v1902_v60 = vadd.f32 %v1832_v56, %v4825_v8  ;;  %v1736_v56 = vrot.slane %v4481_v53, 2 }
 0x232   : > { %v2408_v50 = vpop.f32.mrf.mxu0  ;;  %v2211_v41 = vpop.f32.mrf.mxu3 }
 0x233   : > { %v2284_v25 = vadd.f32 %v2211_v41, %v2087_v27 }
 0x234   : > { %v2017_v44 = vpop.f32.mrf.mxu2 }
 0x235   : > { %2447 = vmatmul.bf16.gmra.mxu0 %v4440_v17  ;;  %v2478_v57 = vadd.f32 %v2405_v1, %v2284_v25  ;;  %v2088_v28 = vadd.f32 %v2017_v44, %v1901_v31  ;;  %v1735_v25 = vsel %vm1034_vm1, %v1733_v11, %v1734_v34 }
 0x236   : > { %v1835_v45 = vpop.f32.mrf.mxu1 }
 0x237   : > { %v3343_v32 = vpack.c.bf16 %v2478_v57, %v2477_v35  ;;  %v2573_v47 = vadd.f32 %v2572_v29, %v2478_v57  ;;  %v2611_v0 = vmul.f32 %v2478_v57, %v2478_v57  ;;  %2253 = vmatmul.bf16.gmra.mxu3 %v4824_v21 }
 0x239   : > { %3426 = vst [vmem:[%s4609_s30 + $0x10] sm:$0xff] %v3343_v32   ;;  %v2642_v33 = vadd.f32 %v2641_v30, %v2611_v0  ;;  %1874 = vmatmul.bf16.gmra.mxu1 %v4440_v17  ;;  %v4826_v30 = vld [vmem:[#allocation10_spill] sm:$0xff] }
 0x23a   : > { %v2410_v51 = vpop.f32.mrf.mxu0  ;;  %v2214_v5 = vpop.f32.mrf.mxu3 }
 0x23b   : > { %v2285_v23 = vadd.f32 %v2214_v5, %v2088_v28  ;;  %v4828_v28 = vld [vmem:[#allocation11_spill] sm:$0xff] }
 0x23c   : > { %v2019_v39 = vpop.f32.mrf.mxu2 }
 0x23d   : > { %v2479_v6 = vadd.f32 %v2408_v50, %v2285_v23  ;;  %v2089_v62 = vadd.f32 %v2019_v39, %v1902_v60  ;;  %v1903_v50 = vadd.f32 %v1835_v45, %v4826_v30 }
 0x23e   : > { %v1837_v1 = vpop.f32.mrf.mxu1 }
 0x23f   : > { %v2574_v7 = vadd.f32 %v2573_v47, %v2479_v6  ;;  %v2612_v59 = vmul.f32 %v2479_v6, %v2479_v6 }
 0x241   : > { %v2643_v37 = vadd.f32 %v2642_v33, %v2612_v59  ;;  %2061 = vmatmul.bf16.gmra.mxu2 %v4448_v2  ;;  %v1737_v2 = vsel %vm1034_vm1, %v1734_v34, %v1736_v56  ;;  %v1904_v33 = vadd.f32 %v1837_v1, %v4828_v28 }
 0x242   : > { %v2413_v35 = vpop.f32.mrf.mxu0  ;;  %v2216_v29 = vpop.f32.mrf.mxu3  ;;  %v1740_v31 = vpack.c.bf16 %v1737_v2, %v1735_v25  ;;  %v4831_v25 = vld [vmem:[#allocation17_spill] sm:$0xff] }
 0x243   : > { %v2286_v17 = vadd.f32 %v2216_v29, %v2089_v62  ;;  %v4829_v62 = vld [vmem:[#allocation15_spill] sm:$0xff]  ;;  %v4830_v29 = vld [vmem:[#allocation22_spill] sm:$0xff] }
 0x244   : > { %v2022_v4 = vpop.f32.mrf.mxu2 }
 0x245   : > { %2452 = vmatmul.bf16.gmra.mxu0 %v4461_v43  ;;  %v2480_v27 = vadd.f32 %v2410_v51, %v2286_v17  ;;  %v2090_v16 = vadd.f32 %v2022_v4, %v1903_v50 }
 0x246   : > { %v1840_v41 = vpop.f32.mrf.mxu1 }
 0x247   : > { %v3348_v44 = vpack.c.bf16 %v2480_v27, %v2479_v6  ;;  %v2575_v55 = vadd.f32 %v2574_v7, %v2480_v27  ;;  %v2613_v57 = vmul.f32 %v2480_v27, %v2480_v27  ;;  %2258 = vmatmul.bf16.gmra.mxu3 %v4827_v20 }
 0x249   : > { %3427 = vst [vmem:[%s4609_s30 + $0x18] sm:$0xff] %v3348_v44   ;;  %v2644_v32 = vadd.f32 %v2643_v37, %v2613_v57  ;;  %1879 = vmatmul.bf16.gmra.mxu1 %v4461_v43  ;;  %v1905_v37 = vadd.f32 %v1840_v41, %v4829_v62 }
 0x24a   : > { %v2415_v47 = vpop.f32.mrf.mxu0  ;;  %v2219_v53 = vpop.f32.mrf.mxu3 }
 0x24b   : > { %v2287_v0 = vadd.f32 %v2219_v53, %v2090_v16 }
 0x24c   : > { %v2024_v45 = vpop.f32.mrf.mxu2 }
 0x24d   : > { %v2481_v21 = vadd.f32 %v2413_v35, %v2287_v0  ;;  %v2091_v39 = vadd.f32 %v2024_v45, %v1904_v33 }
 0x24e   : > { %v1842_v51 = vpop.f32.mrf.mxu1 }
 0x24f   : > { %v2576_v5 = vadd.f32 %v2575_v55, %v2481_v21  ;;  %v2614_v23 = vmul.f32 %v2481_v21, %v2481_v21  ;;  %v1906_v2 = vadd.f32 %v1842_v51, %v4831_v25 }
 0x251   : > { %v2645_v6 = vadd.f32 %v2644_v32, %v2614_v23  ;;  %2066 = vmatmul.bf16.gmra.mxu2 %v4469_v14  ;;  %v533_v23 = vld [vmem:[#allocation2 + $0x1a8] sm:$0x3] }
 0x252   : > { %v2418_v8 = vpop.f32.mrf.mxu0  ;;  %v2221_v60 = vpop.f32.mrf.mxu3 }
 0x253   : > { %v2288_v7 = vadd.f32 %v2221_v60, %v2091_v39 }
 0x254   : > { %v2027_v43 = vpop.f32.mrf.mxu2 }
 0x255   : > { %2457 = vmatmul.bf16.gmra.mxu0 %v4491_v54  ;;  %v2482_v59 = vadd.f32 %v2415_v47, %v2288_v7  ;;  %v2092_v17 = vadd.f32 %v2027_v43, %v1905_v37  ;;  %v2314_v7 = vrot.slane %v533_v23, 2 }
 0x256   : > { %v1845_v35 = vpop.f32.mrf.mxu1 }
 0x257   : > { %v3353_v11 = vpack.c.bf16 %v2482_v59, %v2481_v21  ;;  %v2577_v1 = vadd.f32 %v2576_v5, %v2482_v59  ;;  %v2615_v34 = vmul.f32 %v2482_v59, %v2482_v59  ;;  %2263 = vmatmul.bf16.gmra.mxu3 %v4830_v29  ;;  %v1907_v0 = vadd.f32 %v1845_v35, %v4495_v26  ;;  %v531_v5 = vld [vmem:[#allocation2 + $0x198] sm:$0xff] }
 0x258   : > { %v2117_v37 = vrot.slane %v531_v5, 1 }
 0x259   : > { %3428 = vst [vmem:[%s4609_s30 + $0x20] sm:$0xff] %v3353_v11   ;;  %v2646_v4 = vadd.f32 %v2645_v6, %v2615_v34  ;;  %1884 = vmatmul.bf16.gmra.mxu1 %v4491_v54  ;;  %v2120_v11 = vrot.slane %v533_v23, 1 }
 0x25a   : > { %v2420_v56 = vpop.f32.mrf.mxu0  ;;  %v2224_v14 = vpop.f32.mrf.mxu3 }
 0x25b   : > { %v2289_v27 = vadd.f32 %v2224_v14, %v2092_v17 }
 0x25c   : > { %v2029_v30 = vpop.f32.mrf.mxu2 }
 0x25d   : > { %v2483_v50 = vadd.f32 %v2418_v8, %v2289_v27  ;;  %v2093_v57 = vadd.f32 %v2029_v30, %v1906_v2  ;;  %v3477_v8 = vld [vmem:[#allocation2 + $0x8] sm:$0xff] }
 0x25e   : > { %v1847_v44 = vpop.f32.mrf.mxu1  ;;  %v2312_v60 = vrot.slane %v3477_v8, 2  ;;  %v1927_v62 = vpack.c.bf16 %v3477_v8, %v531_v5  ;;  %v2118_v35 = vrot.slane %v3477_v8, 1 }
 0x25f   : > { %v2578_v41 = vadd.f32 %v2577_v1, %v2483_v50  ;;  %v2616_v55 = vmul.f32 %v2483_v50, %v2483_v50 }
 0x260   : > { %v2315_v29 = vsel %vm1034_vm1, %v2312_v60, %v2314_v7  ;;  %v2119_v14 = vsel %vm614_vm0, %v2117_v37, %v2118_v35  ;;  %v2121_v27 = vsel %vm614_vm0, %v2118_v35, %v2120_v11 }
 0x261   : > { %v2647_v20 = vadd.f32 %v2646_v4, %v2616_v55  ;;  %2071 = vmatmul.bf16.gmra.mxu2 %v4503_v61  ;;  %v2311_v61 = vrot.slane %v531_v5, 2 }
 0x262   : > { %v2423_v16 = vpop.f32.mrf.mxu0  ;;  %v2226_v32 = vpop.f32.mrf.mxu3 }
 0x263   : > { %v2290_v47 = vadd.f32 %v2226_v32, %v2093_v57  ;;  %v2313_v34 = vsel %vm1034_vm1, %v2311_v61, %v2312_v60 }
 0x264   : > { %v2032_v53 = vpop.f32.mrf.mxu2  ;;  %v2318_v30 = vpack.c.bf16 %v2315_v29, %v2313_v34 }
 0x265   : > { %2462 = vmatmul.bf16.gmra.mxu0 %v1740_v31  ;;  %v2484_v54 = vadd.f32 %v2420_v56, %v2290_v47  ;;  %v2094_v51 = vadd.f32 %v2032_v53, %v1907_v0 }
 0x266   : > { %v1850_v45 = vpop.f32.mrf.mxu1 }
 0x267   : > { %v3358_v21 = vpack.c.bf16 %v2484_v54, %v2483_v50  ;;  %v2579_v28 = vadd.f32 %v2578_v41, %v2484_v54  ;;  %v2617_v33 = vmul.f32 %v2484_v54, %v2484_v54  ;;  %2268 = vmatmul.bf16.gmra.mxu3 %v4497_v63  ;;  %v1908_v63 = vadd.f32 %v1847_v44, %v4506_v10 }
 0x268   : > { %v2124_v10 = vpack.c.bf16 %v2121_v27, %v2119_v14  ;;  %v1909_v57 = vadd.f32 %v1850_v45, %v4511_v22 }
 0x269   : > { %3429 = vst [vmem:[%s4609_s30 + $0x28] sm:$0xff] %v3358_v21   ;;  %v2648_v39 = vadd.f32 %v2647_v20, %v2617_v33  ;;  %1889 = vmatmul.bf16.gmra.mxu1 %v1740_v31 }
 0x26a   : > { %v2425_v6 = vpop.f32.mrf.mxu0  ;;  %v2229_v43 = vpop.f32.mrf.mxu3 }
 0x26b   : > { %v2291_v59 = vadd.f32 %v2229_v43, %v2094_v51 }
 0x26c   : > { %v2034_v26 = vpop.f32.mrf.mxu2 }
 0x26d   : > { %v2485_v1 = vadd.f32 %v2423_v16, %v2291_v59  ;;  %v2095_v56 = vadd.f32 %v2034_v26, %v1908_v63 }
 0x26e   : > { %v1852_v17 = vpop.f32.mrf.mxu1 }
 0x26f   : > { %v2580_v31 = vadd.f32 %v2579_v28, %v2485_v1  ;;  %v2618_v4 = vmul.f32 %v2485_v1, %v2485_v1  ;;  %v1910_v5 = vadd.f32 %v1852_v17, %v4516_v9 }
 0x271   : > { %v2649_v50 = vadd.f32 %v2648_v39, %v2618_v4  ;;  %2076 = vmatmul.bf16.gmra.mxu2 %v1927_v62 }
 0x272   : > { %v2428_v25 = vpop.f32.mrf.mxu0  ;;  %v2231_v2 = vpop.f32.mrf.mxu3 }
 0x273   : > { %v2292_v41 = vadd.f32 %v2231_v2, %v2095_v56 }
 0x274   : > { %v2037_v44 = vpop.f32.mrf.mxu2 }
 0x275   : > { %2467 = vmatmul.bf16.gmra.mxu0 %v2318_v30  ;;  %v2486_v55 = vadd.f32 %v2425_v6, %v2292_v41  ;;  %v2096_v53 = vadd.f32 %v2037_v44, %v1909_v57 }
 0x276   : > { %v1855_v20 = vpop.f32.mrf.mxu1 }
 0x277   : > { %v3363_v16 = vpack.c.bf16 %v2486_v55, %v2485_v1  ;;  %v2581_v32 = vadd.f32 %v2580_v31, %v2486_v55  ;;  %v2619_v47 = vmul.f32 %v2486_v55, %v2486_v55  ;;  %2273 = vmatmul.bf16.gmra.mxu3 %v2124_v10  ;;  %v1911_v59 = vadd.f32 %v1855_v20, %v4521_v58 }
 0x279   : > { %3430 = vst [vmem:[%s4609_s30 + $0x30] sm:$0xff] %v3363_v16   ;;  %v2650_v54 = vadd.f32 %v2649_v50, %v2619_v47 }
 0x27a   : > { %v2430_v0 = vpop.f32.mrf.mxu0  ;;  %v2234_v21 = vpop.f32.mrf.mxu3 }
 0x27b   : > { %v2293_v28 = vadd.f32 %v2234_v21, %v2096_v53 }
 0x27c   : > { %v2039_v33 = vpop.f32.mrf.mxu2 }
 0x27d   : > { %v2487_v51 = vadd.f32 %v2428_v25, %v2293_v28  ;;  %v2097_v22 = vadd.f32 %v2039_v33, %v1910_v5 }
 0x27e   : > { %v1857_v23 = vpop.f32.mrf.mxu1 }
 0x27f   : > { %v2582_v39 = vadd.f32 %v2581_v32, %v2487_v51  ;;  %v2620_v6 = vmul.f32 %v2487_v51, %v2487_v51  ;;  %v1912_v31 = vadd.f32 %v1857_v23, %v4526_v3 }
 0x281   : > { %v2651_v45 = vadd.f32 %v2650_v54, %v2620_v6 }
 0x282   : > { %v2433_v61 = vpop.f32.mrf.mxu0  ;;  %v2236_v8 = vpop.f32.mrf.mxu3 }
 0x283   : > { %v2294_v60 = vadd.f32 %v2236_v8, %v2097_v22 }
 0x284   : > { %v2042_v7 = vpop.f32.mrf.mxu2 }
 0x285   : > { %v2488_v43 = vadd.f32 %v2430_v0, %v2294_v60  ;;  %v2098_v11 = vadd.f32 %v2042_v7, %v1911_v59 }
 0x286   : > { %v1860_v26 = vpop.f32.mrf.mxu1 }
 0x287   : > { %v3368_v62 = vpack.c.bf16 %v2488_v43, %v2487_v51  ;;  %v2583_v37 = vadd.f32 %v2582_v39, %v2488_v43  ;;  %v2621_v35 = vmul.f32 %v2488_v43, %v2488_v43  ;;  %v1913_v10 = vadd.f32 %v1860_v26, %v4531_v40 }
 0x289   : > { %3431 = vst [vmem:[%s4609_s30 + $0x38] sm:$0xff] %v3368_v62   ;;  %v2652_v9 = vadd.f32 %v2651_v45, %v2621_v35 }
 0x28a   : > { %v2435_v1 = vpop.f32.mrf.mxu0  ;;  %v2239_v63 = vpop.f32.mrf.mxu3 }
 0x28b   : > { %v2295_v34 = vadd.f32 %v2239_v63, %v2098_v11 }
 0x28c   : > { %v2044_v29 = vpop.f32.mrf.mxu2 }
 0x28d   : > { %v2489_v17 = vadd.f32 %v2433_v61, %v2295_v34  ;;  %v2099_v27 = vadd.f32 %v2044_v29, %v1912_v31 }
 0x28e   : > { %v1862_v4 = vpop.f32.mrf.mxu1 }
 0x28f   : > { %v2584_v56 = vadd.f32 %v2583_v37, %v2489_v17  ;;  %v2622_v14 = vmul.f32 %v2489_v17, %v2489_v17  ;;  %v1914_v21 = vadd.f32 %v1862_v4, %v4536_v24 }
 0x291   : > { %v2653_v58 = vadd.f32 %v2652_v9, %v2622_v14 }
 0x292   : > { %v2438_v30 = vpop.f32.mrf.mxu0  ;;  %v2241_v50 = vpop.f32.mrf.mxu3 }
 0x293   : > { %v2296_v25 = vadd.f32 %v2241_v50, %v2099_v27 }
 0x294   : > { %v2047_v2 = vpop.f32.mrf.mxu2 }
 0x295   : > { %v2490_v41 = vadd.f32 %v2435_v1, %v2296_v25  ;;  %v2100_v16 = vadd.f32 %v2047_v2, %v1913_v10 }
 0x296   : > { %v1865_v44 = vpop.f32.mrf.mxu1 }
 0x297   : > { %v3373_v55 = vpack.c.bf16 %v2490_v41, %v2489_v17  ;;  %v2585_v57 = vadd.f32 %v2584_v56, %v2490_v41  ;;  %v2623_v20 = vmul.f32 %v2490_v41, %v2490_v41  ;;  %v1915_v61 = vadd.f32 %v1865_v44, %v4541_v18 }
 0x299   : > { %3432 = vst [vmem:[%s4609_s30 + $0x40] sm:$0xff] %v3373_v55   ;;  %v2654_v3 = vadd.f32 %v2653_v58, %v2623_v20 }
 0x29a   : > { %v2440_v32 = vpop.f32.mrf.mxu0  ;;  %v2244_v47 = vpop.f32.mrf.mxu3 }
 0x29b   : > { %v2297_v53 = vadd.f32 %v2244_v47, %v2100_v16 }
 0x29c   : > { %v2049_v54 = vpop.f32.mrf.mxu2 }
 0x29d   : > { %v2491_v0 = vadd.f32 %v2438_v30, %v2297_v53  ;;  %v2101_v5 = vadd.f32 %v2049_v54, %v1914_v21 }
 0x29e   : > { %v1867_v28 = vpop.f32.mrf.mxu1 }
 0x29f   : > { %v2586_v33 = vadd.f32 %v2585_v57, %v2491_v0  ;;  %v2624_v51 = vmul.f32 %v2491_v0, %v2491_v0  ;;  %v1916_v9 = vadd.f32 %v1867_v28, %v4546_v38 }
 0x2a1   : > { %v2655_v40 = vadd.f32 %v2654_v3, %v2624_v51 }
 0x2a2   : > { %v2443_v23 = vpop.f32.mrf.mxu0  ;;  %v2246_v39 = vpop.f32.mrf.mxu3 }
 0x2a3   : > { %v2298_v6 = vadd.f32 %v2246_v39, %v2101_v5 }
 0x2a4   : > { %v2052_v22 = vpop.f32.mrf.mxu2 }
 0x2a5   : > { %v2492_v45 = vadd.f32 %v2440_v32, %v2298_v6  ;;  %v2102_v59 = vadd.f32 %v2052_v22, %v1915_v61 }
 0x2a6   : > { %v1870_v8 = vpop.f32.mrf.mxu1 }
 0x2a7   : > { %v3378_v60 = vpack.c.bf16 %v2492_v45, %v2491_v0  ;;  %v2587_v7 = vadd.f32 %v2586_v33, %v2492_v45  ;;  %v2625_v43 = vmul.f32 %v2492_v45, %v2492_v45  ;;  %v1917_v27 = vadd.f32 %v1870_v8, %v4551_v42 }
 0x2a9   : > { %3433 = vst [vmem:[%s4609_s30 + $0x48] sm:$0xff] %v3378_v60   ;;  %v2656_v24 = vadd.f32 %v2655_v40, %v2625_v43 }
 0x2aa   : > { %v2445_v26 = vpop.f32.mrf.mxu0  ;;  %v2249_v62 = vpop.f32.mrf.mxu3 }
 0x2ab   : > { %v2299_v37 = vadd.f32 %v2249_v62, %v2102_v59 }
 0x2ac   : > { %v2054_v35 = vpop.f32.mrf.mxu2 }
 0x2ad   : > { %v2493_v11 = vadd.f32 %v2443_v23, %v2299_v37  ;;  %v2103_v29 = vadd.f32 %v2054_v35, %v1916_v9 }
 0x2ae   : > { %v1872_v1 = vpop.f32.mrf.mxu1 }
 0x2af   : > { %v2588_v63 = vadd.f32 %v2587_v7, %v2493_v11  ;;  %v2626_v34 = vmul.f32 %v2493_v11, %v2493_v11  ;;  %v1918_v20 = vadd.f32 %v1872_v1, %v4556_v48 }
 0x2b1   : > { %v2657_v18 = vadd.f32 %v2656_v24, %v2626_v34 }
 0x2b2   : > { %v2448_v17 = vpop.f32.mrf.mxu0  ;;  %v2251_v31 = vpop.f32.mrf.mxu3 }
 0x2b3   : > { %v2300_v4 = vadd.f32 %v2251_v31, %v2103_v29 }
 0x2b4   : > { %v2057_v56 = vpop.f32.mrf.mxu2 }
 0x2b5   : > { %v2494_v14 = vadd.f32 %v2445_v26, %v2300_v4  ;;  %v2104_v2 = vadd.f32 %v2057_v56, %v1917_v27 }
 0x2b6   : > { %v1875_v58 = vpop.f32.mrf.mxu1 }
 0x2b7   : > { %v3383_v30 = vpack.c.bf16 %v2494_v14, %v2493_v11  ;;  %v2589_v50 = vadd.f32 %v2588_v63, %v2494_v14  ;;  %v2627_v25 = vmul.f32 %v2494_v14, %v2494_v14  ;;  %v1919_v33 = vadd.f32 %v1875_v58, %v4561_v12 }
 0x2b9   : > { %3434 = vst [vmem:[%s4609_s30 + $0x50] sm:$0xff] %v3383_v30   ;;  %v2658_v38 = vadd.f32 %v2657_v18, %v2627_v25 }
 0x2ba   : > { %v2450_v41 = vpop.f32.mrf.mxu0  ;;  %v2254_v10 = vpop.f32.mrf.mxu3 }
 0x2bb   : > { %v2301_v44 = vadd.f32 %v2254_v10, %v2104_v2 }
 0x2bc   : > { %v2059_v55 = vpop.f32.mrf.mxu2 }
 0x2bd   : > { %v2495_v57 = vadd.f32 %v2448_v17, %v2301_v44  ;;  %v2105_v47 = vadd.f32 %v2059_v55, %v1918_v20 }
 0x2be   : > { %v1877_v16 = vpop.f32.mrf.mxu1 }
 0x2bf   : > { %v2590_v3 = vadd.f32 %v2589_v50, %v2495_v57  ;;  %v2628_v32 = vmul.f32 %v2495_v57, %v2495_v57  ;;  %v1920_v60 = vadd.f32 %v1877_v16, %v4566_v36 }
 0x2c1   : > { %v2659_v42 = vadd.f32 %v2658_v38, %v2628_v32 }
 0x2c2   : > { %v2453_v53 = vpop.f32.mrf.mxu0  ;;  %v2256_v54 = vpop.f32.mrf.mxu3 }
 0x2c3   : > { %v2302_v0 = vadd.f32 %v2256_v54, %v2105_v47 }
 0x2c4   : > { %v2062_v21 = vpop.f32.mrf.mxu2 }
 0x2c5   : > { %v2496_v28 = vadd.f32 %v2450_v41, %v2302_v0  ;;  %v2106_v23 = vadd.f32 %v2062_v21, %v1919_v33 }
 0x2c6   : > { %v1880_v39 = vpop.f32.mrf.mxu1 }
 0x2c7   : > { %v3388_v51 = vpack.c.bf16 %v2496_v28, %v2495_v57  ;;  %v2591_v5 = vadd.f32 %v2590_v3, %v2496_v28  ;;  %v2629_v40 = vmul.f32 %v2496_v28, %v2496_v28  ;;  %v1921_v9 = vadd.f32 %v1880_v39, %v4571_v13 }
 0x2c9   : > { %3435 = vst [vmem:[%s4609_s30 + $0x58] sm:$0xff] %v3388_v51   ;;  %v2660_v48 = vadd.f32 %v2659_v42, %v2629_v40 }
 0x2ca   : > { %v2455_v6 = vpop.f32.mrf.mxu0  ;;  %v2259_v22 = vpop.f32.mrf.mxu3 }
 0x2cb   : > { %v2303_v45 = vadd.f32 %v2259_v22, %v2106_v23 }
 0x2cc   : > { %v2064_v61 = vpop.f32.mrf.mxu2 }
 0x2cd   : > { %v2497_v8 = vadd.f32 %v2453_v53, %v2303_v45  ;;  %v2107_v59 = vadd.f32 %v2064_v61, %v1920_v60 }
 0x2ce   : > { %v1882_v12 = vpop.f32.mrf.mxu1 }
 0x2cf   : > { %v2592_v7 = vadd.f32 %v2591_v5, %v2497_v8  ;;  %v2630_v43 = vmul.f32 %v2497_v8, %v2497_v8  ;;  %v1922_v27 = vadd.f32 %v1882_v12, %v4576_v15 }
 0x2d1   : > { %v2661_v24 = vadd.f32 %v2660_v48, %v2630_v43 }
 0x2d2   : > { %v2261_v26 = vpop.f32.mrf.mxu3  ;;  %v2458_v62 = vpop.f32.mrf.mxu0 }
 0x2d3   : > { %v2304_v37 = vadd.f32 %v2261_v26, %v2107_v59 }
 0x2d4   : > { %v2067_v35 = vpop.f32.mrf.mxu2 }
 0x2d5   : > { %v2498_v11 = vadd.f32 %v2455_v6, %v2304_v37  ;;  %v2108_v29 = vadd.f32 %v2067_v35, %v1921_v9 }
 0x2d6   : > { %v1885_v31 = vpop.f32.mrf.mxu1 }
 0x2d7   : > { %v3393_v1 = vpack.c.bf16 %v2498_v11, %v2497_v8  ;;  %v2593_v63 = vadd.f32 %v2592_v7, %v2498_v11  ;;  %v2631_v34 = vmul.f32 %v2498_v11, %v2498_v11  ;;  %v1923_v10 = vadd.f32 %v1885_v31, %v4581_v46 }
 0x2d9   : > { %3436 = vst [vmem:[%s4609_s30 + $0x60] sm:$0xff] %v3393_v1   ;;  %v2662_v18 = vadd.f32 %v2661_v24, %v2631_v34 }
 0x2da   : > { %v2264_v36 = vpop.f32.mrf.mxu3  ;;  %v2460_v4 = vpop.f32.mrf.mxu0 }
 0x2db   : > { %v2305_v17 = vadd.f32 %v2264_v36, %v2108_v29 }
 0x2dc   : > { %v2069_v56 = vpop.f32.mrf.mxu2 }
 0x2dd   : > { %v2499_v14 = vadd.f32 %v2458_v62, %v2305_v17  ;;  %v2109_v50 = vadd.f32 %v2069_v56, %v1922_v27 }
 0x2de   : > { %v1887_v44 = vpop.f32.mrf.mxu1 }
 0x2df   : > { %v2594_v58 = vadd.f32 %v2593_v63, %v2499_v14  ;;  %v2632_v30 = vmul.f32 %v2499_v14, %v2499_v14  ;;  %v1924_v54 = vadd.f32 %v1887_v44, %v4586_v52 }
 0x2e1   : > { %v2663_v25 = vadd.f32 %v2662_v18, %v2632_v30 }
 0x2e2   : > { %v2266_v13 = vpop.f32.mrf.mxu3  ;;  %v2463_v55 = vpop.f32.mrf.mxu0 }
 0x2e3   : > { %v2306_v2 = vadd.f32 %v2266_v13, %v2109_v50 }
 0x2e4   : > { %v2072_v38 = vpop.f32.mrf.mxu2 }
 0x2e5   : > { %v2500_v41 = vadd.f32 %v2460_v4, %v2306_v2  ;;  %v2110_v3 = vadd.f32 %v2072_v38, %v1923_v10 }
 0x2e6   : > { %v1890_v33 = vpop.f32.mrf.mxu1 }
 0x2e7   : > { %v3398_v57 = vpack.c.bf16 %v2500_v41, %v2499_v14  ;;  %v2595_v20 = vadd.f32 %v2594_v58, %v2500_v41  ;;  %v2633_v16 = vmul.f32 %v2500_v41, %v2500_v41  ;;  %v1925_v48 = vadd.f32 %v1890_v33, %v4591_v49 }
 0x2e9   : > { %3437 = vst [vmem:[%s4609_s30 + $0x68] sm:$0xff] %v3398_v57   ;;  %v2664_v32 = vadd.f32 %v2663_v25, %v2633_v16 }
 0x2ea   : > { %v2269_v15 = vpop.f32.mrf.mxu3  ;;  %v2465_v46 = vpop.f32.mrf.mxu0 }
 0x2eb   : > { %v2307_v47 = vadd.f32 %v2269_v15, %v2110_v3 }
 0x2ec   : > { %v2074_v42 = vpop.f32.mrf.mxu2 }
 0x2ed   : > { %v2501_v53 = vadd.f32 %v2463_v55, %v2307_v47  ;;  %v2111_v28 = vadd.f32 %v2074_v42, %v1924_v54 }
 0x2ee   : > { %v1892_v52 = vpop.f32.mrf.mxu1 }
 0x2ef   : > { %v2596_v0 = vadd.f32 %v2595_v20, %v2501_v53  ;;  %v2634_v21 = vmul.f32 %v2501_v53, %v2501_v53  ;;  %v1926_v12 = vadd.f32 %v1892_v52, %v4595_v19 }
 0x2f1   : > { %v2665_v51 = vadd.f32 %v2664_v32, %v2634_v21 }
 0x2f2   : > { %v2271_v5 = vpop.f32.mrf.mxu3  ;;  %v2468_v60 = vpop.f32.mrf.mxu0 }
 0x2f3   : > { %v2308_v40 = vadd.f32 %v2271_v5, %v2111_v28 }
 0x2f4   : > { %v2077_v23 = vpop.f32.mrf.mxu2 }
 0x2f5   : > { %v2502_v39 = vadd.f32 %v2465_v46, %v2308_v40  ;;  %v2112_v61 = vadd.f32 %v2077_v23, %v1925_v48 }
 0x2f7   : > { %v3403_v6 = vpack.c.bf16 %v2502_v39, %v2501_v53  ;;  %v2597_v22 = vadd.f32 %v2596_v0, %v2502_v39  ;;  %v2635_v45 = vmul.f32 %v2502_v39, %v2502_v39 }
 0x2f9   : > { %3438 = vst [vmem:[%s4609_s30 + $0x70] sm:$0xff] %v3403_v6   ;;  %v2666_v8 = vadd.f32 %v2665_v51, %v2635_v45 }
 0x2fa   : > { %v2274_v7 = vpop.f32.mrf.mxu3  ;;  %v2470_v9 = vpop.f32.mrf.mxu0 }
 0x2fb   : > { %v2309_v43 = vadd.f32 %v2274_v7, %v2112_v61 }
 0x2fc   : > { %v2079_v59 = vpop.f32.mrf.mxu2 }
 0x2fd   : > { %v2503_v24 = vadd.f32 %v2468_v60, %v2309_v43  ;;  %v2113_v37 = vadd.f32 %v2079_v59, %v1926_v12 }
 0x2ff   : > { %v2598_v26 = vadd.f32 %v2597_v22, %v2503_v24  ;;  %v2636_v62 = vmul.f32 %v2503_v24, %v2503_v24 }
 0x301   : > { %v2667_v35 = vadd.f32 %v2666_v8, %v2636_v62 }
 0x302   : > { %v2276_v49 = vpop.f32.mrf.mxu3 }
 0x303   : > { %v2310_v11 = vadd.f32 %v2276_v49, %v2113_v37 }
 0x305   : > { %v2504_v1 = vadd.f32 %v2470_v9, %v2310_v11 }
 0x307   : > { %v3408_v63 = vpack.c.bf16 %v2504_v1, %v2503_v24  ;;  %v2599_v34 = vadd.f32 %v2598_v26, %v2504_v1  ;;  %v2637_v29 = vmul.f32 %v2504_v1, %v2504_v1 }
 0x309   : > { %3439 = vst [vmem:[%s4609_s30 + $0x78] sm:$0xff] %v3408_v63   ;;  %v2600_v18 = vrot.slane %v2599_v34, 4  ;;  %v2668_v36 = vadd.f32 %v2667_v35, %v2637_v29 }
 0x30b   : > { %v2601_v17 = vadd.f32 %v2600_v18, %v2599_v34  ;;  %v2669_v31 = vrot.slane %v2668_v36, 4 }
 0x30d   : > { %v2602_v4 = vrot.slane %v2601_v17, 2  ;;  %v2670_v56 = vadd.f32 %v2669_v31, %v2668_v36 }
 0x30f   : > { %v2603_v19 = vadd.f32 %v2602_v4, %v2601_v17  ;;  %v2671_v14 = vrot.slane %v2670_v56, 2 }
 0x311   : > { %v2604_v27 = vrot.slane %v2603_v19, 1  ;;  %v2672_v58 = vadd.f32 %v2671_v14, %v2670_v56 }
 0x313   : > { %v2673_v30 = vrot.slane %v2672_v58, 1  ;;  %v2605_v50 = vadd.f32 %v2604_v27, %v2603_v19 }
 0x315   : > { %v2674_v25 = vadd.f32 %v2673_v30, %v2672_v58 }
 0x317   : > { %v2676_v13 = vsel %vm2675_vm2, %v2605_v50, %v2674_v25 }
 0x318   : > { %2677 = vst [vmem:[%s235_s8] sm:$0x3] %v2676_v13 }
 0x319 PF: > { %s16_s18 = sadd.s32 1, %s3484_s18  }
 0x31a   : > { %p13_p4 = scmp.ge.s32.totalorder %s16_s18, 4  }
 0x31c   :  { %15 = sbr.rel (!%p13_p4) target bundleno = 1 (0x1), region = 88 }

</bundles_post_ra>
